<compile_context>
chip_gen: v5e
topology: v5e:2x2
jax: 0.10.0
libtpu: 0.0.40
codegen_flags: <defaults>
</compile_context>

<pallas_src>
import functools

import jax
import jax.numpy as jnp
from jax import lax
from jax.experimental import pallas as pl
from jax.experimental.pallas import tpu as pltpu

NEG_SLOPE = 0.01  # torch.nn.LeakyReLU default negative_slope


def _leaky_relu(x):
    return jnp.where(x >= 0, x, NEG_SLOPE * x)


def _round_up(x, m):
    return ((x + m - 1) // m) * m


def _conv3x3_bf16(xpad4, w_ref, H, W):
    """3x3 'same' conv on an already zero-padded NHWC block via MXU matmuls.

    xpad4: (NB, H+2, W+2, C) bf16 value (padded by 1 pixel).
    w_ref: (9*C, Cout) bf16 ref; row order (ky, kx, c) with c fastest
           (== w_hwio.reshape(9*C, Cout)).
    Returns (NB*H*W, Cout) f32.
    """
    nb, _, _, c = xpad4.shape
    rows = nb * H * W
    taps = [xpad4[:, ky:ky + H, kx:kx + W, :]
            for ky in range(3) for kx in range(3)]
    if c < 128:
        # Small C: one K=9*C matmul (im2col); the lane concat is cheap here.
        patches = jnp.concatenate(taps, axis=-1).reshape(rows, 9 * c)
        return jnp.dot(patches, w_ref[...], preferred_element_type=jnp.float32)
    # Large C: skip the 9x patch materialization (vst-bound); accumulate one
    # matmul per tap into a single f32 accumulator instead.
    acc = jnp.zeros((rows, w_ref.shape[1]), jnp.float32)
    for t in range(9):
        lhs = taps[t].reshape(rows, c)
        acc = acc + jnp.dot(lhs, w_ref[t * c:(t + 1) * c, :],
                            preferred_element_type=jnp.float32)
    return acc


def _resblock_kernel(*refs, NB, H, W, Cin, Chid, Cout, side_off, has_side,
                     lane_dense):
    """One batch block per grid step.

    refs (has_side):  xpad, w1, w2, out, hpad_scratch
    refs (identity):  xpad, xres, w1, w2, out, hpad_scratch
      xpad: (NB, H+2, W+2, Cin) bf16   (HBM-padded input block)
      xres: (NB, H, W, Cin)     f32    (exact residual, identity case only)
      w1:   (9*Cin, C1)         bf16   (conv1 [| zero pad | side conv])
      w2:   (9*Chid, Cout)      bf16
      out:  (NB, H, W*Cout) or (NB, H, W, Cout) f32
      hpad_scratch: (NB, H+2, W+2, Chid) bf16 VMEM scratch
    """
    if has_side:
        xpad_ref, w1_ref, w2_ref, out_ref, hpad = refs
        xres_ref = None
    else:
        xpad_ref, xres_ref, w1_ref, w2_ref, out_ref, hpad = refs

    rows = NB * H * W

    # ---- conv1 (+ fused, lane-aligned side conv): bf16 operands, f32 acc ----
    xpad = xpad_ref[...]                                  # bf16, already padded
    acc1 = _conv3x3_bf16(xpad, w1_ref, H, W)              # (rows, C1) f32

    # norm_layer = Identity ; non_linear = LeakyReLU
    h = _leaky_relu(acc1[:, :Chid])                       # (rows, Chid) f32

    # ---- padded hidden activation in VMEM scratch (no concat-pad copies) ----
    zrow = jnp.zeros((NB, 1, W + 2, Chid), jnp.bfloat16)
    zcol = jnp.zeros((NB, H, 1, Chid), jnp.bfloat16)
    hpad[:, 0:1, :, :] = zrow                             # borders zeroed each
    hpad[:, H + 1:H + 2, :, :] = zrow                     # step (safe w/ megacore)
    hpad[:, 1:H + 1, 0:1, :] = zcol
    hpad[:, 1:H + 1, W + 1:W + 2, :] = zcol
    hpad[:, 1:H + 1, 1:W + 1, :] = (
        h.astype(jnp.bfloat16).reshape(NB, H, W, Chid))   # cast h ONCE

    # ---- conv2 over the padded hidden activation ----
    acc2 = _conv3x3_bf16(hpad[...], w2_ref, H, W)         # (rows, Cout) f32

    # ---- residual branch ----
    if has_side:
        res = acc1[:, side_off:side_off + Cout]           # fused side conv, f32
    else:
        res = xres_ref[...].reshape(rows, Cin)            # exact f32 identity skip

    # out += residual ; output_norm = Identity ; final_activ = LeakyReLU
    o = _leaky_relu(acc2 + res)                           # (rows, Cout) f32
    if lane_dense:
        out_ref[...] = o.reshape(NB, H, W * Cout)         # lane-dense store
    else:
        out_ref[...] = o.reshape(NB, H, W, Cout)


def _vmem_budgets():
    """Generation-aware VMEM sizing -> (vmem_limit_bytes, block_budget_bytes)."""
    try:
        cap = int(pltpu.get_tpu_info().vmem_capacity_bytes)
    except Exception:                      # unknown runtime: assume v7x-sized VMEM
        cap = 64 << 20
    cap = max(cap, 32 << 20)
    vmem_limit = min((cap * 3) // 4, 96 << 20)   # ~48 MiB v7x, 96 MiB v5e/v6e
    return int(vmem_limit), int(vmem_limit * 4 // 5)


def _pick_batch_block(N, H, W, Cin, Chid, Cout, C1, has_side):
    """Largest divisor of N that leaves >=2 grid steps (megacore / pipelining)
    and keeps the per-step working set inside the generation-aware budget."""
    vmem_limit, budget = _vmem_budgets()
    hp, wp = H + 2, W + 2
    # Static per-call VMEM: weight blocks (double-buffered by the pipeline).
    static = 2 * 2 * (9 * Cin * C1 + 9 * Chid * Cout)
    per_img = (
        2 * 2 * hp * wp * Cin                          # bf16 padded input (x2 bufs)
        + (0 if has_side else 2 * 4 * H * W * Cin)     # f32 identity residual (x2)
        + 2 * 4 * H * W * Cout                         # f32 output block (x2 bufs)
        + 2 * hp * wp * Chid                           # bf16 padded-hidden scratch
        + 2 * H * W * 9 * (Cin + Chid)                 # bf16 im2col patches
        + 4 * H * W * (C1 + Cout + Chid)               # f32 accumulators + hidden
    )
    per_img = int(per_img * 3 // 2)                    # relayout / spill slack
    nb_cap = max(1, (budget - static) // max(per_img, 1))
    nb = max(1, min(nb_cap, N // 2 if N > 1 else 1))   # >=2 grid steps when possible
    while N % nb:
        nb -= 1
    return nb, vmem_limit


def resblock_forward(x_nchw, w1_hwio, w2_hwio, wside_hwio=None):
    """ResBlock forward. x_nchw: (N, Cin, H, W) f32; weights HWIO (3,3,in,out)."""
    N, Cin, H, W = x_nchw.shape
    Chid = w1_hwio.shape[3]
    Cout = w2_hwio.shape[3]
    has_side = wside_hwio is not None
    assert has_side == (Cout != Cin)
    assert w2_hwio.shape[2] == Chid

    # Layout glue (wrapper): NCHW -> NHWC, HBM-side halo pad, single bf16 cast.
    x_nhwc = jnp.transpose(x_nchw, (0, 2, 3, 1)).astype(jnp.float32)
    x_pad = jnp.pad(x_nhwc, ((0, 0), (1, 1), (1, 1), (0, 0))).astype(jnp.bfloat16)

    # im2col weights in bf16 (f32 accumulation happens on the MXU).
    w1_2d = w1_hwio.reshape(9 * Cin, Chid).astype(jnp.bfloat16)
    w2_2d = w2_hwio.reshape(9 * Chid, Cout).astype(jnp.bfloat16)
    if has_side:
        side_off = _round_up(Chid, 128)           # lane-aligned split point
        parts = [w1_2d]
        if side_off > Chid:
            parts.append(jnp.zeros((9 * Cin, side_off - Chid), jnp.bfloat16))
        parts.append(wside_hwio.reshape(9 * Cin, Cout).astype(jnp.bfloat16))
        w1cat = jnp.concatenate(parts, axis=1)    # [conv1 | 0-pad | side conv]
    else:
        side_off = Chid
        w1cat = w1_2d
    C1 = w1cat.shape[1]

    NB, vmem_limit = _pick_batch_block(N, H, W, Cin, Chid, Cout, C1, has_side)

    in_specs = [pl.BlockSpec((NB, H + 2, W + 2, Cin), lambda n: (n, 0, 0, 0))]
    args = [x_pad]
    if not has_side:
        # Exact f32 residual for the identity skip (kept separate from the bf16
        # conv input so the skip connection loses no precision).
        in_specs.append(pl.BlockSpec((NB, H, W, Cin), lambda n: (n, 0, 0, 0)))
        args.append(x_nhwc)
    in_specs += [
        pl.BlockSpec((9 * Cin, C1), lambda n: (0, 0)),
        pl.BlockSpec((9 * Chid, Cout), lambda n: (0, 0)),
    ]
    args += [w1cat, w2_2d]

    flops = 2 * N * H * W * 9 * (Cin * C1 + Chid * Cout)
    bytes_accessed = (
        x_pad.size * 2
        + (0 if has_side else N * H * W * Cin * 4)
        + w1cat.size * 2 + w2_2d.size * 2
        + N * H * W * Cout * 4)
    cost = pl.CostEstimate(flops=flops, transcendentals=0,
                           bytes_accessed=bytes_accessed)

    def _launch(lane_dense):
        kernel = functools.partial(
            _resblock_kernel, NB=NB, H=H, W=W, Cin=Cin, Chid=Chid, Cout=Cout,
            side_off=side_off, has_side=has_side, lane_dense=lane_dense)
        if lane_dense:
            out_shape = jax.ShapeDtypeStruct((N, H, W * Cout), jnp.float32)
            out_spec = pl.BlockSpec((NB, H, W * Cout), lambda n: (n, 0, 0))
        else:
            out_shape = jax.ShapeDtypeStruct((N, H, W, Cout), jnp.float32)
            out_spec = pl.BlockSpec((NB, H, W, Cout), lambda n: (n, 0, 0, 0))
        return pl.pallas_call(
            kernel,
            out_shape=out_shape,
            grid_spec=pltpu.PrefetchScalarGridSpec(
                num_scalar_prefetch=0,
                grid=(N // NB,),
                in_specs=in_specs,
                out_specs=out_spec,
                scratch_shapes=[pltpu.VMEM((NB, H + 2, W + 2, Chid),
                                           jnp.bfloat16)]),
            compiler_params=pltpu.CompilerParams(
                dimension_semantics=("parallel",),
                vmem_limit_bytes=vmem_limit),
            cost_estimate=cost,
        )(*args)

    if Cout % 128 != 0:
        # Prefer a lane-dense (NB, H, W*Cout) output slab; fall back to the
        # plain NHWC block if this Mosaic build rejects the in-kernel repack.
        try:
            out = _launch(True)
        except Exception:
            out = _launch(False)
    else:
        out = _launch(False)          # Cout already lane-dense

    out_nhwc = out.reshape(N, H, W, Cout)
    return jnp.transpose(out_nhwc, (0, 3, 1, 2))          # back to NCHW


# ----------------------------- reference ------------------------------------

def _conv3x3_ref(x_nhwc, w_hwio):
    return lax.conv_general_dilated(
        x_nhwc, w_hwio, window_strides=(1, 1), padding=((1, 1), (1, 1)),
        dimension_numbers=("NHWC", "HWIO", "NHWC"),
        precision=lax.Precision.HIGHEST)


def _resblock_ref(x_nchw, w1_hwio, w2_hwio, wside_hwio=None):
    x = jnp.transpose(x_nchw, (0, 2, 3, 1)).astype(jnp.float32)
    res = x if wside_hwio is None else _conv3x3_ref(x, wside_hwio)
    h = _leaky_relu(_conv3x3_ref(x, w1_hwio))
    out = _leaky_relu(_conv3x3_ref(h, w2_hwio) + res)
    return jnp.transpose(out, (0, 3, 1, 2))


def _rand_w_hwio(key, cin, cout):
    # nn.Conv2d-style kaiming-uniform-like bound, OIHW -> HWIO.
    bound = 1.0 / ((cin * 9.0) ** 0.5)
    w_oihw = jax.random.uniform(key, (cout, cin, 3, 3), jnp.float32, -bound, bound)
    return jnp.transpose(w_oihw, (2, 3, 1, 0))


if __name__ == "__main__":
    key = jax.random.PRNGKey(0)
    kx, k1, k2, k3, k4, k5 = jax.random.split(key, 6)

    # Case 1: ResBlock defaults (out_c == in_c == hid_c -> identity skip).
    N, C, H, W = 2, 4, 16, 16
    x = jax.random.normal(kx, (N, C, H, W), jnp.float32)
    w1 = _rand_w_hwio(k1, C, C)
    w2 = _rand_w_hwio(k2, C, C)

    out = jax.block_until_ready(resblock_forward(x, w1, w2))
    ref = _resblock_ref(x, w1, w2)
    assert out.shape == (N, C, H, W)
    assert jnp.allclose(out, ref, rtol=2e-2, atol=2e-2), "mismatch (identity skip)"

    # Case 2: out_c != in_c -> side_block conv (fused into conv1's matmul).
    Cout = 8  # hid_c defaults to out_c in the module
    w1b = _rand_w_hwio(k3, C, Cout)
    w2b = _rand_w_hwio(k4, Cout, Cout)
    wsb = _rand_w_hwio(k5, C, Cout)

    out2 = jax.block_until_ready(resblock_forward(x, w1b, w2b, wsb))
    ref2 = _resblock_ref(x, w1b, w2b, wsb)
    assert out2.shape == (N, Cout, H, W)
    assert jnp.allclose(out2, ref2, rtol=2e-2, atol=2e-2), "mismatch (side block)"

    print("KERNEL_OK")
</pallas_src>

<mosaic_0001>
module attributes {stable_mosaic.version = 11 : i64} {
  func.func @_resblock_kernel(%arg0: i32, %arg1: memref<1x18x18x4xbf16, #tpu.memory_space<vmem>>, %arg2: memref<1x16x16x4xf32, #tpu.memory_space<vmem>>, %arg3: memref<36x4xbf16, #tpu.memory_space<vmem>>, %arg4: memref<36x4xbf16, #tpu.memory_space<vmem>>, %arg5: memref<1x16x64xf32, #tpu.memory_space<vmem>>, %arg6: memref<1x18x18x4xbf16, #tpu.memory_space<vmem>>) attributes {dimension_semantics = [#tpu.dimension_semantics<parallel>], iteration_bounds = array<i64: 2>, scalar_prefetch = 0 : i64, scratch_operands = 1 : i64, tpu.core_type = #tpu.core_type<tc>, window_params = [{transform_indices = @transform_0, window_bounds = array<i64: 1, 18, 18, 4>}, {transform_indices = @transform_1, window_bounds = array<i64: 1, 16, 16, 4>}, {pipeline_mode = #tpu.pipeline_mode<synchronous>, transform_indices = @transform_2, window_bounds = array<i64: 36, 4>}, {pipeline_mode = #tpu.pipeline_mode<synchronous>, transform_indices = @transform_3, window_bounds = array<i64: 36, 4>}, {transform_indices = @transform_4, window_bounds = array<i64: 1, 16, 64>}]} {
    %c0 = arith.constant 0 : index
    %c0_0 = arith.constant 0 : index
    %c0_1 = arith.constant 0 : index
    %c0_2 = arith.constant 0 : index
    %0 = vector.load %arg1[%c0, %c0_0, %c0_1, %c0_2] : memref<1x18x18x4xbf16, #tpu.memory_space<vmem>>, vector<1x18x18x4xbf16>
    %1 = vector.extract_strided_slice %0 {offsets = [0, 0, 0, 0], sizes = [1, 16, 16, 4], strides = [1, 1, 1, 1]} : vector<1x18x18x4xbf16> to vector<1x16x16x4xbf16>
    %2 = vector.extract_strided_slice %0 {offsets = [0, 0, 1, 0], sizes = [1, 16, 16, 4], strides = [1, 1, 1, 1]} : vector<1x18x18x4xbf16> to vector<1x16x16x4xbf16>
    %3 = vector.extract_strided_slice %0 {offsets = [0, 0, 2, 0], sizes = [1, 16, 16, 4], strides = [1, 1, 1, 1]} : vector<1x18x18x4xbf16> to vector<1x16x16x4xbf16>
    %4 = vector.extract_strided_slice %0 {offsets = [0, 1, 0, 0], sizes = [1, 16, 16, 4], strides = [1, 1, 1, 1]} : vector<1x18x18x4xbf16> to vector<1x16x16x4xbf16>
    %5 = vector.extract_strided_slice %0 {offsets = [0, 1, 1, 0], sizes = [1, 16, 16, 4], strides = [1, 1, 1, 1]} : vector<1x18x18x4xbf16> to vector<1x16x16x4xbf16>
    %6 = vector.extract_strided_slice %0 {offsets = [0, 1, 2, 0], sizes = [1, 16, 16, 4], strides = [1, 1, 1, 1]} : vector<1x18x18x4xbf16> to vector<1x16x16x4xbf16>
    %7 = vector.extract_strided_slice %0 {offsets = [0, 2, 0, 0], sizes = [1, 16, 16, 4], strides = [1, 1, 1, 1]} : vector<1x18x18x4xbf16> to vector<1x16x16x4xbf16>
    %8 = vector.extract_strided_slice %0 {offsets = [0, 2, 1, 0], sizes = [1, 16, 16, 4], strides = [1, 1, 1, 1]} : vector<1x18x18x4xbf16> to vector<1x16x16x4xbf16>
    %9 = vector.extract_strided_slice %0 {offsets = [0, 2, 2, 0], sizes = [1, 16, 16, 4], strides = [1, 1, 1, 1]} : vector<1x18x18x4xbf16> to vector<1x16x16x4xbf16>
    %10 = tpu.concatenate %1, %2, %3, %4, %5, %6, %7, %8, %9 in 3 : vector<1x16x16x4xbf16>, vector<1x16x16x4xbf16>, vector<1x16x16x4xbf16>, vector<1x16x16x4xbf16>, vector<1x16x16x4xbf16>, vector<1x16x16x4xbf16>, vector<1x16x16x4xbf16>, vector<1x16x16x4xbf16>, vector<1x16x16x4xbf16> -> vector<1x16x16x36xbf16>
    %11 = vector.shape_cast %10 : vector<1x16x16x36xbf16> to vector<256x36xbf16>
    %c0_3 = arith.constant 0 : index
    %c0_4 = arith.constant 0 : index
    %12 = vector.load %arg3[%c0_3, %c0_4] : memref<36x4xbf16, #tpu.memory_space<vmem>>, vector<36x4xbf16>
    %cst = arith.constant dense<0.000000e+00> : vector<256x4xf32>
    %13 = tpu.matmul %11, %12, %cst {dimension_numbers = #tpu.dot_dimension_numbers<[1], [0], [0], [1], [0, 0, 1, 1], [], []>} : vector<256x36xbf16>, vector<36x4xbf16>, vector<256x4xf32> -> vector<256x4xf32>
    %cst_5 = arith.constant 0.000000e+00 : f32
    %14 = vector.broadcast %cst_5 : f32 to vector<256x4xf32>
    %15 = arith.cmpf oge, %13, %14 : vector<256x4xf32>
    %cst_6 = arith.constant 0.00999999977 : f32
    %16 = vector.broadcast %cst_6 : f32 to vector<256x4xf32>
    %17 = arith.mulf %16, %13 : vector<256x4xf32>
    %18 = arith.select %15, %13, %17 : vector<256x4xi1>, vector<256x4xf32>
    %cst_7 = arith.constant 0.000000e+00 : bf16
    %19 = vector.broadcast %cst_7 : bf16 to vector<1x1x18x4xbf16>
    %cst_8 = arith.constant 0.000000e+00 : bf16
    %20 = vector.broadcast %cst_8 : bf16 to vector<1x16x1x4xbf16>
    %c0_9 = arith.constant 0 : index
    %c0_10 = arith.constant 0 : index
    %c0_11 = arith.constant 0 : index
    %c0_12 = arith.constant 0 : index
    %21 = vector.load %arg6[%c0_9, %c0_10, %c0_11, %c0_12] : memref<1x18x18x4xbf16, #tpu.memory_space<vmem>>, vector<1x1x18x4xbf16>
    tpu.vector_store %arg6[%c0_9, %c0_10, %c0_11, %c0_12], %19 {strides = array<i32>} : memref<1x18x18x4xbf16, #tpu.memory_space<vmem>>, vector<1x1x18x4xbf16>,
    %c0_13 = arith.constant 0 : index
    %c17 = arith.constant 17 : index
    %c0_14 = arith.constant 0 : index
    %c0_15 = arith.constant 0 : index
    %22 = vector.load %arg6[%c0_13, %c17, %c0_14, %c0_15] : memref<1x18x18x4xbf16, #tpu.memory_space<vmem>>, vector<1x1x18x4xbf16>
    tpu.vector_store %arg6[%c0_13, %c17, %c0_14, %c0_15], %19 {strides = array<i32>} : memref<1x18x18x4xbf16, #tpu.memory_space<vmem>>, vector<1x1x18x4xbf16>,
    %c0_16 = arith.constant 0 : index
    %c1 = arith.constant 1 : index
    %c0_17 = arith.constant 0 : index
    %c0_18 = arith.constant 0 : index
    %23 = vector.load %arg6[%c0_16, %c1, %c0_17, %c0_18] : memref<1x18x18x4xbf16, #tpu.memory_space<vmem>>, vector<1x16x1x4xbf16>
    tpu.vector_store %arg6[%c0_16, %c1, %c0_17, %c0_18], %20 {strides = array<i32>} : memref<1x18x18x4xbf16, #tpu.memory_space<vmem>>, vector<1x16x1x4xbf16>,
    %c0_19 = arith.constant 0 : index
    %c1_20 = arith.constant 1 : index
    %c17_21 = arith.constant 17 : index
    %c0_22 = arith.constant 0 : index
    %24 = vector.load %arg6[%c0_19, %c1_20, %c17_21, %c0_22] : memref<1x18x18x4xbf16, #tpu.memory_space<vmem>>, vector<1x16x1x4xbf16>
    tpu.vector_store %arg6[%c0_19, %c1_20, %c17_21, %c0_22], %20 {strides = array<i32>} : memref<1x18x18x4xbf16, #tpu.memory_space<vmem>>, vector<1x16x1x4xbf16>,
    %25 = arith.truncf %18 : vector<256x4xf32> to vector<256x4xbf16>
    %26 = vector.shape_cast %25 : vector<256x4xbf16> to vector<1x16x16x4xbf16>
    %c0_23 = arith.constant 0 : index
    %c1_24 = arith.constant 1 : index
    %c1_25 = arith.constant 1 : index
    %c0_26 = arith.constant 0 : index
    %27 = vector.load %arg6[%c0_23, %c1_24, %c1_25, %c0_26] : memref<1x18x18x4xbf16, #tpu.memory_space<vmem>>, vector<1x16x16x4xbf16>
    tpu.vector_store %arg6[%c0_23, %c1_24, %c1_25, %c0_26], %26 {strides = array<i32>} : memref<1x18x18x4xbf16, #tpu.memory_space<vmem>>, vector<1x16x16x4xbf16>,
    %c0_27 = arith.constant 0 : index
    %c0_28 = arith.constant 0 : index
    %c0_29 = arith.constant 0 : index
    %c0_30 = arith.constant 0 : index
    %28 = vector.load %arg6[%c0_27, %c0_28, %c0_29, %c0_30] : memref<1x18x18x4xbf16, #tpu.memory_space<vmem>>, vector<1x18x18x4xbf16>
    %29 = vector.extract_strided_slice %28 {offsets = [0, 0, 0, 0], sizes = [1, 16, 16, 4], strides = [1, 1, 1, 1]} : vector<1x18x18x4xbf16> to vector<1x16x16x4xbf16>
    %30 = vector.extract_strided_slice %28 {offsets = [0, 0, 1, 0], sizes = [1, 16, 16, 4], strides = [1, 1, 1, 1]} : vector<1x18x18x4xbf16> to vector<1x16x16x4xbf16>
    %31 = vector.extract_strided_slice %28 {offsets = [0, 0, 2, 0], sizes = [1, 16, 16, 4], strides = [1, 1, 1, 1]} : vector<1x18x18x4xbf16> to vector<1x16x16x4xbf16>
    %32 = vector.extract_strided_slice %28 {offsets = [0, 1, 0, 0], sizes = [1, 16, 16, 4], strides = [1, 1, 1, 1]} : vector<1x18x18x4xbf16> to vector<1x16x16x4xbf16>
    %33 = vector.extract_strided_slice %28 {offsets = [0, 1, 1, 0], sizes = [1, 16, 16, 4], strides = [1, 1, 1, 1]} : vector<1x18x18x4xbf16> to vector<1x16x16x4xbf16>
    %34 = vector.extract_strided_slice %28 {offsets = [0, 1, 2, 0], sizes = [1, 16, 16, 4], strides = [1, 1, 1, 1]} : vector<1x18x18x4xbf16> to vector<1x16x16x4xbf16>
    %35 = vector.extract_strided_slice %28 {offsets = [0, 2, 0, 0], sizes = [1, 16, 16, 4], strides = [1, 1, 1, 1]} : vector<1x18x18x4xbf16> to vector<1x16x16x4xbf16>
    %36 = vector.extract_strided_slice %28 {offsets = [0, 2, 1, 0], sizes = [1, 16, 16, 4], strides = [1, 1, 1, 1]} : vector<1x18x18x4xbf16> to vector<1x16x16x4xbf16>
    %37 = vector.extract_strided_slice %28 {offsets = [0, 2, 2, 0], sizes = [1, 16, 16, 4], strides = [1, 1, 1, 1]} : vector<1x18x18x4xbf16> to vector<1x16x16x4xbf16>
    %38 = tpu.concatenate %29, %30, %31, %32, %33, %34, %35, %36, %37 in 3 : vector<1x16x16x4xbf16>, vector<1x16x16x4xbf16>, vector<1x16x16x4xbf16>, vector<1x16x16x4xbf16>, vector<1x16x16x4xbf16>, vector<1x16x16x4xbf16>, vector<1x16x16x4xbf16>, vector<1x16x16x4xbf16>, vector<1x16x16x4xbf16> -> vector<1x16x16x36xbf16>
    %39 = vector.shape_cast %38 : vector<1x16x16x36xbf16> to vector<256x36xbf16>
    %c0_31 = arith.constant 0 : index
    %c0_32 = arith.constant 0 : index
    %40 = vector.load %arg4[%c0_31, %c0_32] : memref<36x4xbf16, #tpu.memory_space<vmem>>, vector<36x4xbf16>
    %cst_33 = arith.constant dense<0.000000e+00> : vector<256x4xf32>
    %41 = tpu.matmul %39, %40, %cst_33 {dimension_numbers = #tpu.dot_dimension_numbers<[1], [0], [0], [1], [0, 0, 1, 1], [], []>} : vector<256x36xbf16>, vector<36x4xbf16>, vector<256x4xf32> -> vector<256x4xf32>
    %c0_34 = arith.constant 0 : index
    %c0_35 = arith.constant 0 : index
    %c0_36 = arith.constant 0 : index
    %c0_37 = arith.constant 0 : index
    %42 = vector.load %arg2[%c0_34, %c0_35, %c0_36, %c0_37] : memref<1x16x16x4xf32, #tpu.memory_space<vmem>>, vector<1x16x16x4xf32>
    %43 = vector.shape_cast %42 : vector<1x16x16x4xf32> to vector<256x4xf32>
    %44 = arith.addf %41, %43 : vector<256x4xf32>
    %cst_38 = arith.constant 0.000000e+00 : f32
    %45 = vector.broadcast %cst_38 : f32 to vector<256x4xf32>
    %46 = arith.cmpf oge, %44, %45 : vector<256x4xf32>
    %cst_39 = arith.constant 0.00999999977 : f32
    %47 = vector.broadcast %cst_39 : f32 to vector<256x4xf32>
    %48 = arith.mulf %47, %44 : vector<256x4xf32>
    %49 = arith.select %46, %44, %48 : vector<256x4xi1>, vector<256x4xf32>
    %50 = vector.shape_cast %49 : vector<256x4xf32> to vector<1x16x64xf32>
    %c0_40 = arith.constant 0 : index
    %c0_41 = arith.constant 0 : index
    %c0_42 = arith.constant 0 : index
    %51 = vector.load %arg5[%c0_40, %c0_41, %c0_42] : memref<1x16x64xf32, #tpu.memory_space<vmem>>, vector<1x16x64xf32>
    tpu.vector_store %arg5[%c0_40, %c0_41, %c0_42], %50 {strides = array<i32>} : memref<1x16x64xf32, #tpu.memory_space<vmem>>, vector<1x16x64xf32>,
    return
  }
  func.func @transform_0(%arg0: i32) -> (i32, i32, i32, i32) {
    %c0_i32 = arith.constant 0 : i32
    %c0_i32_0 = arith.constant 0 : i32
    %c0_i32_1 = arith.constant 0 : i32
    %c0_i32_2 = arith.constant 0 : i32
    return %arg0, %c0_i32, %c0_i32_0, %c0_i32_1 : i32, i32, i32, i32
  }
  func.func @transform_1(%arg0: i32) -> (i32, i32, i32, i32) {
    %c0_i32 = arith.constant 0 : i32
    %c0_i32_0 = arith.constant 0 : i32
    %c0_i32_1 = arith.constant 0 : i32
    %c0_i32_2 = arith.constant 0 : i32
    return %arg0, %c0_i32, %c0_i32_0, %c0_i32_1 : i32, i32, i32, i32
  }
  func.func @transform_2(%arg0: i32) -> (i32, i32) {
    %c0_i32 = arith.constant 0 : i32
    %c0_i32_0 = arith.constant 0 : i32
    %c0_i32_1 = arith.constant 0 : i32
    return %c0_i32, %c0_i32_0 : i32, i32
  }
  func.func @transform_3(%arg0: i32) -> (i32, i32) {
    %c0_i32 = arith.constant 0 : i32
    %c0_i32_0 = arith.constant 0 : i32
    %c0_i32_1 = arith.constant 0 : i32
    return %c0_i32, %c0_i32_0 : i32, i32
  }
  func.func @transform_4(%arg0: i32) -> (i32, i32, i32) {
    %c0_i32 = arith.constant 0 : i32
    %c0_i32_0 = arith.constant 0 : i32
    %c0_i32_1 = arith.constant 0 : i32
    return %arg0, %c0_i32, %c0_i32_0 : i32, i32, i32
  }
}

module attributes {stable_mosaic.version = 11 : i64} {
  func.func @_resblock_kernel(%arg0: i32, %arg1: memref<1x18x18x4xbf16, #tpu.memory_space<vmem>>, %arg2: memref<1x16x16x4xf32, #tpu.memory_space<vmem>>, %arg3: memref<36x4xbf16, #tpu.memory_space<vmem>>, %arg4: memref<36x4xbf16, #tpu.memory_space<vmem>>, %arg5: memref<1x16x16x4xf32, #tpu.memory_space<vmem>>, %arg6: memref<1x18x18x4xbf16, #tpu.memory_space<vmem>>) attributes {dimension_semantics = [#tpu.dimension_semantics<parallel>], iteration_bounds = array<i64: 2>, scalar_prefetch = 0 : i64, scratch_operands = 1 : i64, tpu.core_type = #tpu.core_type<tc>, window_params = [{transform_indices = @transform_0, window_bounds = array<i64: 1, 18, 18, 4>}, {transform_indices = @transform_1, window_bounds = array<i64: 1, 16, 16, 4>}, {pipeline_mode = #tpu.pipeline_mode<synchronous>, transform_indices = @transform_2, window_bounds = array<i64: 36, 4>}, {pipeline_mode = #tpu.pipeline_mode<synchronous>, transform_indices = @transform_3, window_bounds = array<i64: 36, 4>}, {transform_indices = @transform_4, window_bounds = array<i64: 1, 16, 16, 4>}]} {
    %c0 = arith.constant 0 : index
    %c0_0 = arith.constant 0 : index
    %c0_1 = arith.constant 0 : index
    %c0_2 = arith.constant 0 : index
    %0 = vector.load %arg1[%c0, %c0_0, %c0_1, %c0_2] : memref<1x18x18x4xbf16, #tpu.memory_space<vmem>>, vector<1x18x18x4xbf16>
    %1 = vector.extract_strided_slice %0 {offsets = [0, 0, 0, 0], sizes = [1, 16, 16, 4], strides = [1, 1, 1, 1]} : vector<1x18x18x4xbf16> to vector<1x16x16x4xbf16>
    %2 = vector.extract_strided_slice %0 {offsets = [0, 0, 1, 0], sizes = [1, 16, 16, 4], strides = [1, 1, 1, 1]} : vector<1x18x18x4xbf16> to vector<1x16x16x4xbf16>
    %3 = vector.extract_strided_slice %0 {offsets = [0, 0, 2, 0], sizes = [1, 16, 16, 4], strides = [1, 1, 1, 1]} : vector<1x18x18x4xbf16> to vector<1x16x16x4xbf16>
    %4 = vector.extract_strided_slice %0 {offsets = [0, 1, 0, 0], sizes = [1, 16, 16, 4], strides = [1, 1, 1, 1]} : vector<1x18x18x4xbf16> to vector<1x16x16x4xbf16>
    %5 = vector.extract_strided_slice %0 {offsets = [0, 1, 1, 0], sizes = [1, 16, 16, 4], strides = [1, 1, 1, 1]} : vector<1x18x18x4xbf16> to vector<1x16x16x4xbf16>
    %6 = vector.extract_strided_slice %0 {offsets = [0, 1, 2, 0], sizes = [1, 16, 16, 4], strides = [1, 1, 1, 1]} : vector<1x18x18x4xbf16> to vector<1x16x16x4xbf16>
    %7 = vector.extract_strided_slice %0 {offsets = [0, 2, 0, 0], sizes = [1, 16, 16, 4], strides = [1, 1, 1, 1]} : vector<1x18x18x4xbf16> to vector<1x16x16x4xbf16>
    %8 = vector.extract_strided_slice %0 {offsets = [0, 2, 1, 0], sizes = [1, 16, 16, 4], strides = [1, 1, 1, 1]} : vector<1x18x18x4xbf16> to vector<1x16x16x4xbf16>
    %9 = vector.extract_strided_slice %0 {offsets = [0, 2, 2, 0], sizes = [1, 16, 16, 4], strides = [1, 1, 1, 1]} : vector<1x18x18x4xbf16> to vector<1x16x16x4xbf16>
    %10 = tpu.concatenate %1, %2, %3, %4, %5, %6, %7, %8, %9 in 3 : vector<1x16x16x4xbf16>, vector<1x16x16x4xbf16>, vector<1x16x16x4xbf16>, vector<1x16x16x4xbf16>, vector<1x16x16x4xbf16>, vector<1x16x16x4xbf16>, vector<1x16x16x4xbf16>, vector<1x16x16x4xbf16>, vector<1x16x16x4xbf16> -> vector<1x16x16x36xbf16>
    %11 = vector.shape_cast %10 : vector<1x16x16x36xbf16> to vector<256x36xbf16>
    %c0_3 = arith.constant 0 : index
    %c0_4 = arith.constant 0 : index
    %12 = vector.load %arg3[%c0_3, %c0_4] : memref<36x4xbf16, #tpu.memory_space<vmem>>, vector<36x4xbf16>
    %cst = arith.constant dense<0.000000e+00> : vector<256x4xf32>
    %13 = tpu.matmul %11, %12, %cst {dimension_numbers = #tpu.dot_dimension_numbers<[1], [0], [0], [1], [0, 0, 1, 1], [], []>} : vector<256x36xbf16>, vector<36x4xbf16>, vector<256x4xf32> -> vector<256x4xf32>
    %cst_5 = arith.constant 0.000000e+00 : f32
    %14 = vector.broadcast %cst_5 : f32 to vector<256x4xf32>
    %15 = arith.cmpf oge, %13, %14 : vector<256x4xf32>
    %cst_6 = arith.constant 0.00999999977 : f32
    %16 = vector.broadcast %cst_6 : f32 to vector<256x4xf32>
    %17 = arith.mulf %16, %13 : vector<256x4xf32>
    %18 = arith.select %15, %13, %17 : vector<256x4xi1>, vector<256x4xf32>
    %cst_7 = arith.constant 0.000000e+00 : bf16
    %19 = vector.broadcast %cst_7 : bf16 to vector<1x1x18x4xbf16>
    %cst_8 = arith.constant 0.000000e+00 : bf16
    %20 = vector.broadcast %cst_8 : bf16 to vector<1x16x1x4xbf16>
    %c0_9 = arith.constant 0 : index
    %c0_10 = arith.constant 0 : index
    %c0_11 = arith.constant 0 : index
    %c0_12 = arith.constant 0 : index
    %21 = vector.load %arg6[%c0_9, %c0_10, %c0_11, %c0_12] : memref<1x18x18x4xbf16, #tpu.memory_space<vmem>>, vector<1x1x18x4xbf16>
    tpu.vector_store %arg6[%c0_9, %c0_10, %c0_11, %c0_12], %19 {strides = array<i32>} : memref<1x18x18x4xbf16, #tpu.memory_space<vmem>>, vector<1x1x18x4xbf16>,
    %c0_13 = arith.constant 0 : index
    %c17 = arith.constant 17 : index
    %c0_14 = arith.constant 0 : index
    %c0_15 = arith.constant 0 : index
    %22 = vector.load %arg6[%c0_13, %c17, %c0_14, %c0_15] : memref<1x18x18x4xbf16, #tpu.memory_space<vmem>>, vector<1x1x18x4xbf16>
    tpu.vector_store %arg6[%c0_13, %c17, %c0_14, %c0_15], %19 {strides = array<i32>} : memref<1x18x18x4xbf16, #tpu.memory_space<vmem>>, vector<1x1x18x4xbf16>,
    %c0_16 = arith.constant 0 : index
    %c1 = arith.constant 1 : index
    %c0_17 = arith.constant 0 : index
    %c0_18 = arith.constant 0 : index
    %23 = vector.load %arg6[%c0_16, %c1, %c0_17, %c0_18] : memref<1x18x18x4xbf16, #tpu.memory_space<vmem>>, vector<1x16x1x4xbf16>
    tpu.vector_store %arg6[%c0_16, %c1, %c0_17, %c0_18], %20 {strides = array<i32>} : memref<1x18x18x4xbf16, #tpu.memory_space<vmem>>, vector<1x16x1x4xbf16>,
    %c0_19 = arith.constant 0 : index
    %c1_20 = arith.constant 1 : index
    %c17_21 = arith.constant 17 : index
    %c0_22 = arith.constant 0 : index
    %24 = vector.load %arg6[%c0_19, %c1_20, %c17_21, %c0_22] : memref<1x18x18x4xbf16, #tpu.memory_space<vmem>>, vector<1x16x1x4xbf16>
    tpu.vector_store %arg6[%c0_19, %c1_20, %c17_21, %c0_22], %20 {strides = array<i32>} : memref<1x18x18x4xbf16, #tpu.memory_space<vmem>>, vector<1x16x1x4xbf16>,
    %25 = arith.truncf %18 : vector<256x4xf32> to vector<256x4xbf16>
    %26 = vector.shape_cast %25 : vector<256x4xbf16> to vector<1x16x16x4xbf16>
    %c0_23 = arith.constant 0 : index
    %c1_24 = arith.constant 1 : index
    %c1_25 = arith.constant 1 : index
    %c0_26 = arith.constant 0 : index
    %27 = vector.load %arg6[%c0_23, %c1_24, %c1_25, %c0_26] : memref<1x18x18x4xbf16, #tpu.memory_space<vmem>>, vector<1x16x16x4xbf16>
    tpu.vector_store %arg6[%c0_23, %c1_24, %c1_25, %c0_26], %26 {strides = array<i32>} : memref<1x18x18x4xbf16, #tpu.memory_space<vmem>>, vector<1x16x16x4xbf16>,
    %c0_27 = arith.constant 0 : index
    %c0_28 = arith.constant 0 : index
    %c0_29 = arith.constant 0 : index
    %c0_30 = arith.constant 0 : index
    %28 = vector.load %arg6[%c0_27, %c0_28, %c0_29, %c0_30] : memref<1x18x18x4xbf16, #tpu.memory_space<vmem>>, vector<1x18x18x4xbf16>
    %29 = vector.extract_strided_slice %28 {offsets = [0, 0, 0, 0], sizes = [1, 16, 16, 4], strides = [1, 1, 1, 1]} : vector<1x18x18x4xbf16> to vector<1x16x16x4xbf16>
    %30 = vector.extract_strided_slice %28 {offsets = [0, 0, 1, 0], sizes = [1, 16, 16, 4], strides = [1, 1, 1, 1]} : vector<1x18x18x4xbf16> to vector<1x16x16x4xbf16>
    %31 = vector.extract_strided_slice %28 {offsets = [0, 0, 2, 0], sizes = [1, 16, 16, 4], strides = [1, 1, 1, 1]} : vector<1x18x18x4xbf16> to vector<1x16x16x4xbf16>
    %32 = vector.extract_strided_slice %28 {offsets = [0, 1, 0, 0], sizes = [1, 16, 16, 4], strides = [1, 1, 1, 1]} : vector<1x18x18x4xbf16> to vector<1x16x16x4xbf16>
    %33 = vector.extract_strided_slice %28 {offsets = [0, 1, 1, 0], sizes = [1, 16, 16, 4], strides = [1, 1, 1, 1]} : vector<1x18x18x4xbf16> to vector<1x16x16x4xbf16>
    %34 = vector.extract_strided_slice %28 {offsets = [0, 1, 2, 0], sizes = [1, 16, 16, 4], strides = [1, 1, 1, 1]} : vector<1x18x18x4xbf16> to vector<1x16x16x4xbf16>
    %35 = vector.extract_strided_slice %28 {offsets = [0, 2, 0, 0], sizes = [1, 16, 16, 4], strides = [1, 1, 1, 1]} : vector<1x18x18x4xbf16> to vector<1x16x16x4xbf16>
    %36 = vector.extract_strided_slice %28 {offsets = [0, 2, 1, 0], sizes = [1, 16, 16, 4], strides = [1, 1, 1, 1]} : vector<1x18x18x4xbf16> to vector<1x16x16x4xbf16>
    %37 = vector.extract_strided_slice %28 {offsets = [0, 2, 2, 0], sizes = [1, 16, 16, 4], strides = [1, 1, 1, 1]} : vector<1x18x18x4xbf16> to vector<1x16x16x4xbf16>
    %38 = tpu.concatenate %29, %30, %31, %32, %33, %34, %35, %36, %37 in 3 : vector<1x16x16x4xbf16>, vector<1x16x16x4xbf16>, vector<1x16x16x4xbf16>, vector<1x16x16x4xbf16>, vector<1x16x16x4xbf16>, vector<1x16x16x4xbf16>, vector<1x16x16x4xbf16>, vector<1x16x16x4xbf16>, vector<1x16x16x4xbf16> -> vector<1x16x16x36xbf16>
    %39 = vector.shape_cast %38 : vector<1x16x16x36xbf16> to vector<256x36xbf16>
    %c0_31 = arith.constant 0 : index
    %c0_32 = arith.constant 0 : index
    %40 = vector.load %arg4[%c0_31, %c0_32] : memref<36x4xbf16, #tpu.memory_space<vmem>>, vector<36x4xbf16>
    %cst_33 = arith.constant dense<0.000000e+00> : vector<256x4xf32>
    %41 = tpu.matmul %39, %40, %cst_33 {dimension_numbers = #tpu.dot_dimension_numbers<[1], [0], [0], [1], [0, 0, 1, 1], [], []>} : vector<256x36xbf16>, vector<36x4xbf16>, vector<256x4xf32> -> vector<256x4xf32>
    %c0_34 = arith.constant 0 : index
    %c0_35 = arith.constant 0 : index
    %c0_36 = arith.constant 0 : index
    %c0_37 = arith.constant 0 : index
    %42 = vector.load %arg2[%c0_34, %c0_35, %c0_36, %c0_37] : memref<1x16x16x4xf32, #tpu.memory_space<vmem>>, vector<1x16x16x4xf32>
    %43 = vector.shape_cast %42 : vector<1x16x16x4xf32> to vector<256x4xf32>
    %44 = arith.addf %41, %43 : vector<256x4xf32>
    %cst_38 = arith.constant 0.000000e+00 : f32
    %45 = vector.broadcast %cst_38 : f32 to vector<256x4xf32>
    %46 = arith.cmpf oge, %44, %45 : vector<256x4xf32>
    %cst_39 = arith.constant 0.00999999977 : f32
    %47 = vector.broadcast %cst_39 : f32 to vector<256x4xf32>
    %48 = arith.mulf %47, %44 : vector<256x4xf32>
    %49 = arith.select %46, %44, %48 : vector<256x4xi1>, vector<256x4xf32>
    %50 = vector.shape_cast %49 : vector<256x4xf32> to vector<1x16x16x4xf32>
    %c0_40 = arith.constant 0 : index
    %c0_41 = arith.constant 0 : index
    %c0_42 = arith.constant 0 : index
    %c0_43 = arith.constant 0 : index
    %51 = vector.load %arg5[%c0_40, %c0_41, %c0_42, %c0_43] : memref<1x16x16x4xf32, #tpu.memory_space<vmem>>, vector<1x16x16x4xf32>
    tpu.vector_store %arg5[%c0_40, %c0_41, %c0_42, %c0_43], %50 {strides = array<i32>} : memref<1x16x16x4xf32, #tpu.memory_space<vmem>>, vector<1x16x16x4xf32>,
    return
  }
  func.func @transform_0(%arg0: i32) -> (i32, i32, i32, i32) {
    %c0_i32 = arith.constant 0 : i32
    %c0_i32_0 = arith.constant 0 : i32
    %c0_i32_1 = arith.constant 0 : i32
    %c0_i32_2 = arith.constant 0 : i32
    return %arg0, %c0_i32, %c0_i32_0, %c0_i32_1 : i32, i32, i32, i32
  }
  func.func @transform_1(%arg0: i32) -> (i32, i32, i32, i32) {
    %c0_i32 = arith.constant 0 : i32
    %c0_i32_0 = arith.constant 0 : i32
    %c0_i32_1 = arith.constant 0 : i32
    %c0_i32_2 = arith.constant 0 : i32
    return %arg0, %c0_i32, %c0_i32_0, %c0_i32_1 : i32, i32, i32, i32
  }
  func.func @transform_2(%arg0: i32) -> (i32, i32) {
    %c0_i32 = arith.constant 0 : i32
    %c0_i32_0 = arith.constant 0 : i32
    %c0_i32_1 = arith.constant 0 : i32
    return %c0_i32, %c0_i32_0 : i32, i32
  }
  func.func @transform_3(%arg0: i32) -> (i32, i32) {
    %c0_i32 = arith.constant 0 : i32
    %c0_i32_0 = arith.constant 0 : i32
    %c0_i32_1 = arith.constant 0 : i32
    return %c0_i32, %c0_i32_0 : i32, i32
  }
  func.func @transform_4(%arg0: i32) -> (i32, i32, i32, i32) {
    %c0_i32 = arith.constant 0 : i32
    %c0_i32_0 = arith.constant 0 : i32
    %c0_i32_1 = arith.constant 0 : i32
    %c0_i32_2 = arith.constant 0 : i32
    return %arg0, %c0_i32, %c0_i32_0, %c0_i32_1 : i32, i32, i32, i32
  }
}

</mosaic_0001>

<bundles_post_ra>
// kernel: tpu_custom_call.1
= control target key start
LH: loop header
LB: loop body
LE: loop exit
PB: predicated region body
PF: predicated region fallthrough
CT: control target
= control target key end

     0   :  { %s3710_s15 = smov 0   ;;  %s5590_s0 = inlined_call_operand.vmem [shape: bf16[2,18,18,4], index: 0, kind: input, shape index: {}]   ;;  %s5591_s1 = inlined_call_operand.vmem [shape: f32[2,16,16,4], index: 1, kind: input, shape index: {}]   ;;  %s5592_s2 = inlined_call_operand.vmem [shape: bf16[36,4], index: 2, kind: input, shape index: {}]   ;;  %s5593_s3 = inlined_call_operand.vmem [shape: bf16[36,4], index: 3, kind: input, shape index: {}]   ;;  %s5594_s4 = inlined_call_operand.vmem [shape: f32[2,16,16,4], index: 4, kind: output, shape index: {}]  }
   0x1 LB: > { %s3381_s16 = sadd.s32 4294967295, %s3674_s15   ;;  %p3385_p0 = scmp.ge.s32.totalorder %s3674_s15, 1  ;;  %s3674_s15 = sphi %s3710_s15, %s14_s15  }
   0x2   : > { %p172_p1 = scmp.lt.s32.totalorder %s3674_s15, 3 }
   0x4   : > { %p173_p2 = pnand %p3385_p0, %p172_p1 }
   0x6   : > { %176 = sbr.rel (%p173_p2) target bundleno = 1186 (0x4a2), region = 36 }
   0xb   : > { %p203_p3 = scmp.lt.s32.totalorder %s3381_s16, 1  ;;  %vm5597_vm0 = vsmask.f32 7424  ;;  %s3676_s21 = smov 4   ;;  %vm5596_vm1 = vcmask 1046528   ;;  %vm5595_vm2 = vcmask 1041408  }
   0xc   : > { %s3677_s22 = smov 8   ;;  %s3678_s23 = smov 12   ;;  %vm945_vm3 = vcmask 31744   ;;  %vm5599_vm4 = vcmask 97280   ;;  %vm978_vm5 = vcmask 64512   ;;  %vm5600_vm6 = vcmask 130048  }
   0xd   : > { %s5741_s16 = smov (!%p203_p3, %s3381_s16), 1  ;;  %s3679_s24 = smov 24   ;;  %vm5598_vm7 = vcmask 162816   ;;  %vm1110_vm8 = vcmask 195584   ;;  %vm1143_vm9 = vcmask 228352   ;;  %vm1176_vm10 = vcmask 261120  }
   0xe   : > { %s3633_s17 = smul.u32 216, %s5741_s16  ;;  %s3680_s25 = smov 20   ;;  %vm1229_vm11 = vcmask 293888   ;;  %vm1454_vm12 = vcmask 24576   ;;  %vm1462_vm13 = vsmask.f32 256 }
   0xf   : > { %s3681_s26 = smov 16   ;;  %s3682_s27 = smov 32   ;;  %vm4473_vm14 = vmand %vm1454_vm12, %vm1462_vm13  ;;  %vm1512_vm15 = vsmask.f32 7938 }
  0x10   : > { %s3724_s20 = scalar_lea.vmem %s5590_s0, %s3633_s17  ;;  %s3683_s28 = smov 28  }
  0x11   : > { %v3727_v0 = vld [vmem:[%s3724_s20 + $0x30] sm:$0xff]  ;;  %v233_v1 = vld [vmem:[%s3724_s20 + $0x38] sm:$0x1]  ;;  %v227_v4 = vld [vmem:[%s3724_s20 + $0x20] sm:$0x1]  ;;  %s3585_s17 = sshll.u32 %s5741_s16, 8 }
  0x12   : > { %v3731_v2 = vld [vmem:[%s3724_s20 + $0x18] sm:$0xff]  ;;  %v373_v3 = vunpack.c.l.b16 %v233_v1  ;;  %v3735_v5 = vld [vmem:[%s3724_s20] sm:$0xff]  ;;  %v221_v6 = vld [vmem:[%s3724_s20 + $0x8] sm:$0x1]  ;;  %v451_v7 = vshrl.u32 %v3727_v0, 16  ;;  %v453_v8 = vshll.u32 %v3727_v0, 16  ;;  %v371_v9 = vunpack.c.l.b16 %v227_v4 }
  0x13   : > { %v427_v10 = vshrl.u32 %v3731_v2, 16  ;;  %v236_v11 = vld [vmem:[%s3724_s20 + $0x44] sm:$0x1]  ;;  %v429_v13 = vshll.u32 %v3731_v2, 16  ;;  %v369_v14 = vunpack.c.l.b16 %v221_v6  ;;  %v403_v15 = vshrl.u32 %v3735_v5, 16  ;;  %v3747_v16 = vld [vmem:[%s3724_s20 + $0x3c] sm:$0xff] }
  0x14   : > { %v3742_v12 = vpack.c.b16 %v373_v3, %v373_v3  ;;  %v455_v17 = vrot.slane %v453_v8, 1  ;;  %v3749_v18 = vpack.c.b16 %v371_v9, %v371_v9  ;;  %v405_v19 = vshll.u32 %v3735_v5, 16  ;;  %v230_v25 = vld [vmem:[%s3724_s20 + $0x2c] sm:$0x1]  ;;  %v3761_v30 = vld [vmem:[%s3724_s20 + $0x24] sm:$0xff]  ;;  %v3794_v59 = vld [vmem:[%s3724_s20 + $0x54] sm:$0xff] }
  0x15   : > { %v374_v20 = vunpack.c.l.b16 %v236_v11  ;;  %v431_v22 = vrot.slane %v429_v13, 1  ;;  %v3753_v23 = vpack.c.b16 %v369_v14, %v369_v14  ;;  %v463_v24 = vshrl.u32 %v3747_v16, 16  ;;  %v3767_v39 = vld [vmem:[%s3724_s20 + $0xc] sm:$0xff]  ;;  %v224_v40 = vld [vmem:[%s3724_s20 + $0x14] sm:$0x1]  ;;  %v3775_v45 = vld [vmem:[%s3724_s20 + $0x60] sm:$0xff] }
  0x16   : > { %v458_v21 = vshll.u32 %v3742_v12, 16  ;;  %v456_v26 = vor.u32 %v455_v17, %v451_v7  ;;  %v434_v27 = vshll.u32 %v3749_v18, 16  ;;  %v407_v28 = vrot.slane %v405_v19, 1  ;;  %v245_v46 = vld [vmem:[%s3724_s20 + $0x68] sm:$0x1] }
  0x17   : > { %v3758_v29 = vpack.c.b16 %v374_v20, %v374_v20  ;;  %v432_v32 = vor.u32 %v431_v22, %v427_v10  ;;  %v410_v33 = vshll.u32 %v3753_v23, 16  ;;  %v465_v34 = vshll.u32 %v3747_v16, 16  ;;  %v242_v60 = vld [vmem:[%s3724_s20 + $0x5c] sm:$0x1]  ;;  %v3807_v8 = vld [vmem:[%s3724_s20 + $0x48] sm:$0xff] }
  0x18   : > { %v460_v31 = vrot.slane %v458_v21, 1  ;;  %v436_v35 = vrot.slane %v434_v27, 1  ;;  %v408_v36 = vor.u32 %v407_v28, %v403_v15  ;;  %v372_v38 = vunpack.c.l.b16 %v230_v25  ;;  %v239_v9 = vld [vmem:[%s3724_s20 + $0x50] sm:$0x1]  ;;  %v254_v21 = vld [vmem:[%s3724_s20 + $0x8c] sm:$0x1] }
  0x19   : > { %v470_v37 = vshll.u32 %v3758_v29, 16  ;;  %v412_v42 = vrot.slane %v410_v33, 1  ;;  %v467_v43 = vrot.slane %v465_v34, 1  ;;  %v439_v44 = vshrl.u32 %v3761_v30, 16  ;;  %v3821_v27 = vld [vmem:[%s3724_s20 + $0x84] sm:$0xff]  ;;  %v3828_v34 = vld [vmem:[%s3724_s20 + $0x78] sm:$0xff] }
  0x1a   : > { %v3771_v41 = vsel %vm5597_vm0, %v456_v26, %v460_v31  ;;  %v3781_v47 = vsel %vm5597_vm0, %v432_v32, %v436_v35  ;;  %v3783_v49 = vpack.c.b16 %v372_v38, %v372_v38  ;;  %v441_v50 = vshll.u32 %v3761_v30, 16 }
  0x1b   : > { %602 = vrot.lane.b32.xlu2 %v3771_v41, %s3676_s21  ;;  %v472_v48 = vrot.slane %v470_v37, 1  ;;  %598 = vrot.lane.b32.xlu1 %v3781_v47, %s3676_s21  ;;  %v413_v51 = vsel %vm5597_vm0, %v408_v36, %v412_v42  ;;  %v468_v52 = vor.u32 %v467_v43, %v463_v24  ;;  %v370_v53 = vunpack.c.l.b16 %v224_v40  ;;  %v251_v40 = vld [vmem:[%s3724_s20 + $0x80] sm:$0x1] }
  0x1c   : > { %v415_v54 = vshrl.u32 %v3767_v39, 16  ;;  %594 = vrot.lane.b32.xlu0 %v413_v51, %s3676_s21  ;;  %v443_v55 = vrot.slane %v441_v50, 1  ;;  %v446_v56 = vshll.u32 %v3783_v49, 16  ;;  %v417_v57 = vshll.u32 %v3767_v39, 16 }
  0x1d   : > { %v377_v58 = vunpack.c.l.b16 %v245_v46  ;;  %v3798_v61 = vsel %vm5597_vm0, %v468_v52, %v472_v48  ;;  %v3800_v62 = vpack.c.b16 %v370_v53, %v370_v53  ;;  %v499_v63 = vshrl.u32 %v3775_v45, 16  ;;  %v3847_v52 = vld [vmem:[%s3724_s20 + $0x6c] sm:$0xff]  ;;  %v248_v53 = vld [vmem:[%s3724_s20 + $0x74] sm:$0x1] }
  0x1e   : > { %v501_v1 = vshll.u32 %v3775_v45, 16  ;;  %v444_v3 = vor.u32 %v443_v55, %v439_v44  ;;  %v448_v4 = vrot.slane %v446_v56, 1  ;;  %v419_v6 = vrot.slane %v417_v57, 1 }
  0x1f   : > { %v3804_v7 = vpack.c.b16 %v377_v58, %v377_v58  ;;  %v422_v10 = vshll.u32 %v3800_v62, 16  ;;  %v376_v13 = vunpack.c.l.b16 %v242_v60  ;;  %v487_v14 = vshrl.u32 %v3794_v59, 16  ;;  %v3855_v58 = vld [vmem:[%s3724_s20 + $0xa8] sm:$0xff] }
  0x20   : > { %v503_v11 = vrot.slane %v501_v1, 1  ;;  %v3813_v15 = vsel %vm5597_vm0, %v444_v3, %v448_v4  ;;  %v420_v17 = vor.u32 %v419_v6, %v415_v54  ;;  %v489_v20 = vshll.u32 %v3794_v59, 16  ;;  %v263_v4 = vld [vmem:[%s3724_s20 + $0xb0] sm:$0x1] }
  0x21   : > { %v506_v19 = vshll.u32 %v3804_v7, 16  ;;  %v424_v22 = vrot.slane %v422_v10, 1  ;;  %v3818_v25 = vpack.c.b16 %v376_v13, %v376_v13  ;;  %v375_v26 = vunpack.c.l.b16 %v239_v9 }
  0x22   : > { %v504_v24 = vor.u32 %v503_v11, %v499_v63  ;;  %v491_v31 = vrot.slane %v489_v20, 1  ;;  %v475_v32 = vshrl.u32 %v3807_v8, 16  ;;  %v477_v33 = vshll.u32 %v3807_v8, 16  ;;  %v3871_v20 = vld [vmem:[%s3724_s20 + $0x9c] sm:$0xff] }
  0x23   : > { %604 = vrot.lane.b32.xlu2 %v3798_v61, %s3676_s21  ;;  %v508_v28 = vrot.slane %v506_v19, 1  ;;  %600 = vrot.lane.b32.xlu1 %v3813_v15, %s3676_s21  ;;  %v3833_v35 = vsel %vm5597_vm0, %v420_v17, %v424_v22  ;;  %v494_v36 = vshll.u32 %v3818_v25, 16  ;;  %v3836_v37 = vpack.c.b16 %v375_v26, %v375_v26 }
  0x24   : > { %v380_v38 = vunpack.c.l.b16 %v254_v21  ;;  %596 = vrot.lane.b32.xlu0 %v3833_v35, %s3676_s21  ;;  %v492_v42 = vor.u32 %v491_v31, %v487_v14  ;;  %v479_v43 = vrot.slane %v477_v33, 1  ;;  %v535_v44 = vshrl.u32 %v3821_v27, 16  ;;  %v260_v21 = vld [vmem:[%s3724_s20 + $0xa4] sm:$0x1] }
  0x25   : > { %v496_v46 = vrot.slane %v494_v36, 1  ;;  %v482_v48 = vshll.u32 %v3836_v37, 16  ;;  %v537_v51 = vshll.u32 %v3821_v27, 16  ;;  %v3851_v54 = vsel %vm5597_vm0, %v504_v24, %v508_v28 }
  0x26   : > { %v3843_v50 = vpack.c.b16 %v380_v38, %v380_v38  ;;  %v480_v55 = vor.u32 %v479_v43, %v475_v32  ;;  %v379_v56 = vunpack.c.l.b16 %v251_v40  ;;  %v525_v57 = vshll.u32 %v3828_v34, 16  ;;  %v3888_v43 = vld [vmem:[%s3724_s20 + $0x90] sm:$0xff] }
  0x27   : > { %v484_v60 = vrot.slane %v482_v48, 1  ;;  %v539_v63 = vrot.slane %v537_v51, 1  ;;  %v523_v3 = vshrl.u32 %v3828_v34, 16  ;;  %v3861_v6 = vsel %vm5597_vm0, %v492_v42, %v496_v46 }
  0x28   : > { %v542_v1 = vshll.u32 %v3843_v50, 16  ;;  %v3863_v9 = vpack.c.b16 %v379_v56, %v379_v56  ;;  %v527_v10 = vrot.slane %v525_v57, 1  ;;  %v378_v11 = vunpack.c.l.b16 %v248_v53 }
  0x29   : > { %v3866_v13 = vsel %vm5597_vm0, %v480_v55, %v484_v60  ;;  %v540_v14 = vor.u32 %v539_v63, %v535_v44  ;;  %v511_v17 = vshrl.u32 %v3847_v52, 16  ;;  %v513_v19 = vshll.u32 %v3847_v52, 16  ;;  %v257_v44 = vld [vmem:[%s3724_s20 + $0x98] sm:$0x1] }
  0x2a   : > { %v544_v22 = vrot.slane %v542_v1, 1  ;;  %v530_v24 = vshll.u32 %v3863_v9, 16  ;;  %v3877_v26 = vpack.c.b16 %v378_v11, %v378_v11  ;;  %v383_v28 = vunpack.c.l.b16 %v263_v4 }
  0x2b   : > { %610 = vrot.lane.b32.xlu2 %v3851_v54, %s3676_s21  ;;  %608 = vrot.lane.b32.xlu1 %v3861_v6, %s3676_s21  ;;  %v528_v31 = vor.u32 %v527_v10, %v523_v3  ;;  %v515_v32 = vrot.slane %v513_v19, 1  ;;  %v573_v33 = vshll.u32 %v3855_v58, 16  ;;  %v382_v42 = vunpack.c.l.b16 %v260_v21 }
  0x2c   : > { %606 = vrot.lane.b32.xlu0 %v3866_v13, %s3676_s21  ;;  %v532_v36 = vrot.slane %v530_v24, 1  ;;  %v518_v38 = vshll.u32 %v3877_v26, 16  ;;  %v3885_v40 = vpack.c.b16 %v383_v28, %v383_v28  ;;  %v561_v48 = vshll.u32 %v3871_v20, 16 }
  0x2d   : > { %v516_v46 = vor.u32 %v515_v32, %v511_v17  ;;  %v3893_v51 = vsel %vm5597_vm0, %v540_v14, %v544_v22  ;;  %v571_v55 = vshrl.u32 %v3855_v58, 16  ;;  %v3896_v56 = vpack.c.b16 %v382_v42, %v382_v42  ;;  %v266_v14 = vld [vmem:[%s3724_s20 + $0xbc] sm:$0x1]  ;;  %v3913_v22 = vld [vmem:[%s3724_s20 + $0xb4] sm:$0xff] }
  0x2e   : > { %v520_v53 = vrot.slane %v518_v38, 1  ;;  %v575_v57 = vrot.slane %v573_v33, 1  ;;  %v578_v60 = vshll.u32 %v3885_v40, 16  ;;  %v559_v63 = vshrl.u32 %v3871_v20, 16 }
  0x2f   : > { %v381_v1 = vunpack.c.l.b16 %v257_v44  ;;  %v3901_v3 = vsel %vm5597_vm0, %v528_v31, %v532_v36  ;;  %v563_v4 = vrot.slane %v561_v48, 1  ;;  %v566_v10 = vshll.u32 %v3896_v56, 16 }
  0x30   : > { %v549_v11 = vshll.u32 %v3888_v43, 16  ;;  %v3907_v17 = vsel %vm5597_vm0, %v516_v46, %v520_v53  ;;  %v547_v21 = vshrl.u32 %v3888_v43, 16  ;;  %v576_v28 = vor.u32 %v575_v57, %v571_v55 }
  0x31   : > { %v3909_v19 = vpack.c.b16 %v381_v1, %v381_v1  ;;  %v580_v31 = vrot.slane %v578_v60, 1  ;;  %v384_v33 = vunpack.c.l.b16 %v266_v14  ;;  %v564_v36 = vor.u32 %v563_v4, %v559_v63 }
  0x32   : > { %v551_v24 = vrot.slane %v549_v11, 1  ;;  %v568_v38 = vrot.slane %v566_v10, 1  ;;  %v585_v48 = vshll.u32 %v3913_v22, 16  ;;  %v583_v60 = vshrl.u32 %v3913_v22, 16 }
  0x33   : > { %616 = vrot.lane.b32.xlu2 %v3893_v51, %s3676_s21  ;;  %614 = vrot.lane.b32.xlu1 %v3901_v3, %s3676_s21  ;;  %v554_v32 = vshll.u32 %v3909_v19, 16  ;;  %v3922_v46 = vpack.c.b16 %v384_v33, %v384_v33  ;;  %v3926_v53 = vsel %vm5597_vm0, %v576_v28, %v580_v31  ;;  %v630_v4 = vrot.slane %v3767_v39, 1 }
  0x34   : > { %612 = vrot.lane.b32.xlu0 %v3907_v17, %s3676_s21  ;;  %v552_v42 = vor.u32 %v551_v24, %v547_v21  ;;  %v3929_v55 = vsel %vm5597_vm0, %v564_v36, %v568_v38  ;;  %v587_v1 = vrot.slane %v585_v48, 1  ;;  %v631_v10 = vrot.slane %v3800_v62, 1 }
  0x35   : > { %v556_v44 = vrot.slane %v554_v32, 1  ;;  %v590_v63 = vshll.u32 %v3922_v46, 16  ;;  %v627_v11 = vrot.slane %v3735_v5, 1  ;;  %v628_v14 = vrot.slane %v3753_v23, 1 }
  0x36   : > { %v588_v21 = vor.u32 %v587_v1, %v583_v60  ;;  %v3947_v28 = vsel %vm5596_vm1, %v630_v4, %v631_v10  ;;  %v639_v62 = vrot.slane %v3727_v0, 1  ;;  %v640_v23 = vrot.slane %v3742_v12, 1 }
  0x37   : > { %v3932_v57 = vsel %vm5597_vm0, %v552_v42, %v556_v44  ;;  %v592_v24 = vrot.slane %v590_v63, 1  ;;  %v629_v31 = vsel %vm5596_vm1, %v627_v11, %v628_v14  ;;  %v636_v33 = vrot.slane %v3761_v30, 1 }
  0x38   : > { %v637_v36 = vrot.slane %v3783_v49, 1  ;;  %v633_v38 = vrot.slane %v3731_v2, 1  ;;  %v634_v42 = vrot.slane %v3749_v18, 1  ;;  %v3965_v44 = vsel %vm5596_vm1, %v639_v62, %v640_v23 }
  0x39   : > { %v3951_v32 = vsel %vm5597_vm0, %v588_v21, %v592_v24  ;;  %v648_v12 = vrot.slane %v3794_v59, 1  ;;  %v649_v49 = vrot.slane %v3818_v25, 1  ;;  %v645_v18 = vrot.slane %v3807_v8, 1 }
  0x3a   : > { %v3968_v48 = vsel %vm5596_vm1, %v636_v33, %v637_v36  ;;  %v3971_v60 = vsel %vm5596_vm1, %v633_v38, %v634_v42  ;;  %v646_v1 = vrot.slane %v3836_v37, 1  ;;  %v642_v63 = vrot.slane %v3747_v16, 1 }
  0x3b   : > { %622 = vrot.lane.b32.xlu2 %v3926_v53, %s3676_s21  ;;  %620 = vrot.lane.b32.xlu1 %v3929_v55, %s3676_s21  ;;  %v643_v4 = vrot.slane %v3758_v29, 1  ;;  %v3986_v10 = vsel %vm5596_vm1, %v648_v12, %v649_v49  ;;  %v657_v25 = vrot.slane %v3828_v34, 1  ;;  %v658_v37 = vrot.slane %v3863_v9, 1 }
  0x3c   : > { %618 = vrot.lane.b32.xlu0 %v3932_v57, %s3676_s21  ;;  %v3989_v11 = vsel %vm5596_vm1, %v645_v18, %v646_v1  ;;  %v654_v29 = vrot.slane %v3847_v52, 1  ;;  %v655_v21 = vrot.slane %v3877_v26, 1  ;;  %v651_v24 = vrot.slane %v3775_v45, 1 }
  0x3d   : > { %v3992_v14 = vsel %vm5596_vm1, %v642_v63, %v643_v4  ;;  %v4007_v62 = vsel %vm5596_vm1, %v657_v25, %v658_v37  ;;  %v666_v9 = vrot.slane %v3871_v20, 1  ;;  %v667_v26 = vrot.slane %v3896_v56, 1 }
  0x3e   : > { %v4010_v23 = vsel %vm5596_vm1, %v654_v29, %v655_v21  ;;  %v664_v36 = vrot.slane %v3909_v19, 1  ;;  %v660_v38 = vrot.slane %v3821_v27, 1  ;;  %v661_v42 = vrot.slane %v3843_v50, 1 }
  0x3f   : > { %v4028_v12 = vsel %vm5596_vm1, %v666_v9, %v667_v26  ;;  %v672_v50 = vrot.slane %v3913_v22, 1  ;;  %v673_v56 = vrot.slane %v3922_v46, 1  ;;  %v669_v19 = vrot.slane %v3855_v58, 1 }
  0x40   : > { %v4034_v18 = vsel %vm5596_vm1, %v660_v38, %v661_v42  ;;  %v670_v1 = vrot.slane %v3885_v40, 1 }
  0x41   : > { %v4047_v63 = vsel %vm5596_vm1, %v672_v50, %v673_v56 }
  0x42   : > { %v4050_v4 = vsel %vm5596_vm1, %v669_v19, %v670_v1 }
  0x43   : > { %677 = vrot.lane.b32.xlu2 %v3947_v28, %s3677_s22  ;;  %675 = vrot.lane.b32.xlu1 %v629_v31, %s3677_s22  ;;  %v652_v31 = vrot.slane %v3804_v7, 1  ;;  %v663_v7 = vrot.slane %v3888_v43, 1 }
  0x44   : > { %624 = vrot.lane.b32.xlu0 %v3951_v32, %s3676_s21 }
  0x45   : > { %v4013_v33 = vsel %vm5596_vm1, %v651_v24, %v652_v31  ;;  %v4031_v49 = vsel %vm5596_vm1, %v663_v7, %v664_v36  ;;  %v4095_v24 = vld [vmem:[%s3724_s20 + $0xc0] sm:$0xff] }
  0x4b   : > { %683 = vrot.lane.b32.xlu2 %v3965_v44, %s3677_s22  ;;  %681 = vrot.lane.b32.xlu1 %v3968_v48, %s3677_s22 }
  0x4c   : > { %679 = vrot.lane.b32.xlu0 %v3971_v60, %s3677_s22 }
  0x53   : > { %689 = vrot.lane.b32.xlu2 %v3986_v10, %s3677_s22  ;;  %687 = vrot.lane.b32.xlu1 %v3989_v11, %s3677_s22 }
  0x54   : > { %685 = vrot.lane.b32.xlu0 %v3992_v14, %s3677_s22 }
  0x5b   : > { %695 = vrot.lane.b32.xlu2 %v4007_v62, %s3677_s22  ;;  %693 = vrot.lane.b32.xlu1 %v4010_v23, %s3677_s22 }
  0x5c   : > { %691 = vrot.lane.b32.xlu0 %v4013_v33, %s3677_s22 }
  0x63   : > { %701 = vrot.lane.b32.xlu2 %v4028_v12, %s3677_s22  ;;  %699 = vrot.lane.b32.xlu1 %v4031_v49, %s3677_s22 }
  0x64   : > { %697 = vrot.lane.b32.xlu0 %v4034_v18, %s3677_s22 }
  0x6b   : > { %712 = vrot.lane.b32.xlu2 %v3767_v39, %s3678_s23  ;;  %705 = vrot.lane.b32.xlu1 %v4047_v63, %s3677_s22 }
  0x6c   : > { %703 = vrot.lane.b32.xlu0 %v4050_v4, %s3677_s22 }
  0x73   : > { %718 = vrot.lane.b32.xlu2 %v3727_v0, %s3678_s23  ;;  %716 = vrot.lane.b32.xlu1 %v3761_v30, %s3678_s23 }
  0x74   : > { %714 = vrot.lane.b32.xlu0 %v3731_v2, %s3678_s23 }
  0x75   : > { %v4064_v40 = vpop.permute.xlu2 %602 }
  0x7b   : > { %724 = vrot.lane.b32.xlu2 %v3794_v59, %s3678_s23  ;;  %722 = vrot.lane.b32.xlu1 %v3807_v8, %s3678_s23 }
  0x7c   : > { %720 = vrot.lane.b32.xlu0 %v3747_v16, %s3678_s23 }
  0x7d   : > { %v4072_v46 = vpop.permute.xlu2 %604 }
  0x83   : > { %730 = vrot.lane.b32.xlu2 %v3828_v34, %s3678_s23  ;;  %728 = vrot.lane.b32.xlu1 %v3847_v52, %s3678_s23 }
  0x84   : > { %726 = vrot.lane.b32.xlu0 %v3775_v45, %s3678_s23 }
  0x85   : > { %v4080_v25 = vpop.permute.xlu2 %610 }
  0x8b   : > { %736 = vrot.lane.b32.xlu2 %v3871_v20, %s3678_s23  ;;  %734 = vrot.lane.b32.xlu1 %v3888_v43, %s3678_s23 }
  0x8c   : > { %732 = vrot.lane.b32.xlu0 %v3821_v27, %s3678_s23 }
  0x8d   : > { %v4088_v37 = vpop.permute.xlu2 %616  ;;  %v4090_v29 = vpop.permute.xlu1 %598 }
  0x8e   : > { %5601 = vst [vmem:[#allocation3_spill] sm:$0xff] %v4088_v37  ;;  %v4092_v21 = vpop.permute.xlu0 %594 }
  0x93   : > { %742 = vrot.lane.b32.xlu2 %v4095_v24, %s3678_s23  ;;  %740 = vrot.lane.b32.xlu1 %v3913_v22, %s3678_s23 }
  0x94   : > { %738 = vrot.lane.b32.xlu0 %v3855_v58, %s3678_s23 }
  0x95   : > { %v4103_v31 = vpop.permute.xlu2 %622  ;;  %v4105_v9 = vpop.permute.xlu1 %600 }
  0x96   : > { %5602 = vst [vmem:[#allocation4_spill] sm:$0xff] %v4103_v31  ;;  %v4107_v26 = vpop.permute.xlu0 %596 }
  0x9b   : > { %831 = vrot.lane.b32.xlu2 %v3731_v2, %s3679_s24  ;;  %794 = vrot.lane.b32.xlu1 %v3947_v28, %s3680_s25 }
  0x9c   : > { %759 = vrot.lane.b32.xlu0 %v3833_v35, %s3681_s26 }
  0x9d   : > { %v4115_v7 = vpop.permute.xlu2 %677  ;;  %v4117_v36 = vpop.permute.xlu1 %608 }
  0x9e   : > { %v4119_v38 = vpop.permute.xlu0 %606 }
  0xa3   : > { %761 = vrot.lane.b32.xlu2 %v3781_v47, %s3681_s26  ;;  %913 = vrot.lane.b32.xlu1 %v3971_v60, %s3682_s27 }
  0xa4   : > { %878 = vrot.lane.b32.xlu0 %v3781_v47, %s3683_s28 }
  0xa5   : > { %v4127_v28 = vpop.permute.xlu2 %683  ;;  %v4129_v35 = vpop.permute.xlu1 %614 }
  0xa6   : > { %5603 = vst [vmem:[#allocation5_spill] sm:$0xff] %v4129_v35  ;;  %v4131_v42 = vpop.permute.xlu0 %612 }
  0xab   : > { %880 = vrot.lane.b32.xlu2 %v3813_v15, %s3683_s28  ;;  %833 = vrot.lane.b32.xlu1 %v3761_v30, %s3679_s24 }
  0xac   : > { %796 = vrot.lane.b32.xlu0 %v3971_v60, %s3680_s25 }
  0xad   : > { %v4139_v50 = vpop.permute.xlu2 %689  ;;  %v4141_v56 = vpop.permute.xlu1 %620 }
  0xae   : > { %5604 = vst [vmem:[#allocation6_spill] sm:$0xff] %v4139_v50  ;;  %v4143_v47 = vpop.permute.xlu0 %618 }
  0xaf   : > { %5605 = vst [vmem:[#allocation7_spill] sm:$0xff] %v4141_v56 }
  0xb0   : > { %5606 = vst [vmem:[#allocation8_spill] sm:$0xff] %v4143_v47 }
  0xb3   : > { %765 = vrot.lane.b32.xlu2 %v3771_v41, %s3681_s26  ;;  %763 = vrot.lane.b32.xlu1 %v3813_v15, %s3681_s26 }
  0xb4   : > { %915 = vrot.lane.b32.xlu0 %v3968_v48, %s3682_s27 }
  0xb5   : > { %v4151_v19 = vpop.permute.xlu2 %695  ;;  %v4153_v1 = vpop.permute.xlu1 %675 }
  0xb6   : > { %5607 = vst [vmem:[#allocation9_spill] sm:$0xff] %v4151_v19  ;;  %v4155_v60 = vpop.permute.xlu0 %624 }
  0xb7   : > { %5608 = vst [vmem:[#allocation10_spill] sm:$0xff] %v4155_v60 }
  0xbb   : > { %882 = vrot.lane.b32.xlu2 %v3771_v41, %s3683_s28  ;;  %835 = vrot.lane.b32.xlu1 %v3727_v0, %s3679_s24 }
  0xbc   : > { %798 = vrot.lane.b32.xlu0 %v3968_v48, %s3680_s25 }
  0xbd   : > { %v4163_v31 = vpop.permute.xlu2 %701  ;;  %v4165_v15 = vpop.permute.xlu1 %681 }
  0xbe   : > { %5609 = vst [vmem:[#allocation11_spill] sm:$0xff] %v4163_v31  ;;  %v4167_v56 = vpop.permute.xlu0 %679 }
  0xc3   : > { %800 = vrot.lane.b32.xlu2 %v3965_v44, %s3680_s25  ;;  %767 = vrot.lane.b32.xlu1 %v3798_v61, %s3681_s26 }
  0xc4   : > { %917 = vrot.lane.b32.xlu0 %v3965_v44, %s3682_s27 }
  0xc5   : > { %v4175_v41 = vpop.permute.xlu2 %712  ;;  %v4177_v60 = vpop.permute.xlu1 %687 }
  0xc6   : > { %v4179_v48 = vpop.permute.xlu0 %685 }
  0xcb   : > { %919 = vrot.lane.b32.xlu2 %v3992_v14, %s3682_s27  ;;  %884 = vrot.lane.b32.xlu1 %v3798_v61, %s3683_s28 }
  0xcc   : > { %837 = vrot.lane.b32.xlu0 %v3747_v16, %s3679_s24 }
  0xcd   : > { %v4187_v31 = vpop.permute.xlu2 %718  ;;  %v4189_v47 = vpop.permute.xlu1 %693 }
  0xce   : > { %5610 = vst [vmem:[#allocation12_spill] sm:$0xff] %v4189_v47  ;;  %v4191_v44 = vpop.permute.xlu0 %691 }
  0xd3   : > { %839 = vrot.lane.b32.xlu2 %v3807_v8, %s3679_s24  ;;  %802 = vrot.lane.b32.xlu1 %v3992_v14, %s3680_s25 }
  0xd4   : > { %769 = vrot.lane.b32.xlu0 %v3866_v13, %s3681_s26 }
  0xd5   : > { %v4199_v37 = vpop.permute.xlu2 %724  ;;  %v4201_v61 = vpop.permute.xlu1 %699 }
  0xd6   : > { %5611 = vst [vmem:[#allocation13_spill] sm:$0xff] %v4201_v61  ;;  %v4203_v19 = vpop.permute.xlu0 %697 }
  0xd7   : > { %5612 = vst [vmem:[#allocation14_spill] sm:$0xff] %v4203_v19 }
  0xdb   : > { %771 = vrot.lane.b32.xlu2 %v3861_v6, %s3681_s26  ;;  %921 = vrot.lane.b32.xlu1 %v3989_v11, %s3682_s27 }
  0xdc   : > { %886 = vrot.lane.b32.xlu0 %v3866_v13, %s3683_s28 }
  0xdd   : > { %v4211_v35 = vpop.permute.xlu2 %730  ;;  %v4213_v14 = vpop.permute.xlu1 %705 }
  0xde   : > { %5613 = vst [vmem:[#allocation15_spill] sm:$0xff] %v4211_v35  ;;  %v4215_v50 = vpop.permute.xlu0 %703 }
  0xdf   : > { %5614 = vst [vmem:[#allocation16_spill] sm:$0xff] %v4213_v14  ;;  %v1213_v14 = vld [vmem:[%s5592_s2 + $0x10] sm:$0x3] }
  0xe0   : > { %5615 = vst [vmem:[#allocation17_spill] sm:$0xff] %v4215_v50  ;;  %v1223_v50 = vunpack.c.l.b16 %v1213_v14  ;;  %v3606_v14 = vld [vmem:[%s5592_s2 + $0x8] sm:$0xff] }
  0xe3   : > { %841 = vrot.lane.b32.xlu2 %v3794_v59, %s3679_s24  ;;  %804 = vrot.lane.b32.xlu1 %v3989_v11, %s3680_s25  ;;  %v1226_v59 = vpack.c.b16 %v1223_v50, %v1223_v50 }
  0xe4   : > { %773 = vrot.lane.b32.xlu0 %v3851_v54, %s3681_s26 }
  0xe5   : > { %v4223_v61 = vpop.permute.xlu2 %736  ;;  %v4225_v19 = vpop.permute.xlu1 %716  ;;  %v1264_v35 = vsel %vm5595_vm2, %v1226_v59, 0  ;;  %vm4482_vm2 = vmand %vm1454_vm12, %vm1512_vm15 }
  0xe6   : > { %5616 = vst [vmem:[#allocation18_spill] sm:$0xff] %v4223_v61  ;;  %v4227_v13 = vpop.permute.xlu0 %714  ;;  %1271 = vmatpush.bf16.msra.mxu0 %v1264_v35  ;;  %3627 = vmatpush.bf16.msra.mxu2 %v1264_v35  ;;  %v3605_v35 = vld [vmem:[%s5592_s2] sm:$0xff] }
  0xea   : > { %1272 = vmatpush.bf16.msra.mxu0 %v3606_v14  ;;  %3628 = vmatpush.bf16.msra.mxu2 %v3606_v14 }
  0xeb   : > { %775 = vrot.lane.b32.xlu2 %v3907_v17, %s3681_s26  ;;  %923 = vrot.lane.b32.xlu1 %v3986_v10, %s3682_s27 }
  0xec   : > { %888 = vrot.lane.b32.xlu0 %v3861_v6, %s3683_s28 }
  0xed   : > { %v4238_v11 = vpop.permute.xlu2 %742  ;;  %v4240_v61 = vpop.permute.xlu1 %722 }
  0xee   : > { %5617 = vst [vmem:[#allocation19_spill] sm:$0xff] %v4238_v11  ;;  %v4243_v47 = vpop.permute.xlu0 %720  ;;  %1273 = vmatpush.bf16.msra.mxu0 %v3605_v35  ;;  %3629 = vmatpush.bf16.msra.mxu2 %v3605_v35 }
  0xf3   : > { %843 = vrot.lane.b32.xlu2 %v3775_v45, %s3679_s24  ;;  %810 = vrot.lane.b32.xlu1 %v4010_v23, %s3680_s25 }
  0xf4   : > { %806 = vrot.lane.b32.xlu0 %v3986_v10, %s3680_s25 }
  0xf5   : > { %v832_v6 = vpop.permute.xlu2 %831  ;;  %v4257_v50 = vpop.permute.xlu1 %728 }
  0xf6   : > { %v4259_v59 = vpop.permute.xlu0 %726 }
  0xf7   : > { %5618 = vst [vmem:[#allocation20_spill] sm:$0xff] %v4259_v59 }
  0xfb   : > { %894 = vrot.lane.b32.xlu2 %v3901_v3, %s3683_s28  ;;  %890 = vrot.lane.b32.xlu1 %v3851_v54, %s3683_s28 }
  0xfc   : > { %847 = vrot.lane.b32.xlu0 %v3828_v34, %s3679_s24 }
  0xfd   : > { %v762_v10 = vpop.permute.xlu2 %761  ;;  %v4267_v14 = vpop.permute.xlu1 %734 }
  0xfe   : > { %5619 = vst [vmem:[#allocation21_spill] sm:$0xff] %v4267_v14  ;;  %v4269_v11 = vpop.permute.xlu0 %732 }
  0xff   : > { %5620 = vst [vmem:[#allocation22_spill] sm:$0xff] %v4269_v11 }
 0x103   : > { %777 = vrot.lane.b32.xlu2 %v3901_v3, %s3681_s26  ;;  %929 = vrot.lane.b32.xlu1 %v4007_v62, %s3682_s27  ;;  %v947_v3 = vsel %vm945_vm3, %v3735_v5, %v4092_v21 }
 0x104   : > { %925 = vrot.lane.b32.xlu0 %v4013_v33, %s3682_s27 }
 0x105   : > { %v881_v35 = vpop.permute.xlu2 %880  ;;  %v4277_v59 = vpop.permute.xlu1 %740 }
 0x106   : > { %5621 = vst [vmem:[#allocation23_spill] sm:$0xff] %v4277_v59  ;;  %v4279_v54 = vpop.permute.xlu0 %738 }
 0x107   : > { %5622 = vst [vmem:[#allocation24_spill] sm:$0xff] %v4279_v54  ;;  %v980_v54 = vsel %vm978_vm5, %v947_v3, %v4153_v1 }
 0x108   : > { %v1013_v11 = vsel %vm5599_vm4, %v980_v54, %v4175_v41 }
 0x10b   : > { %845 = vrot.lane.b32.xlu2 %v3847_v52, %s3679_s24  ;;  %812 = vrot.lane.b32.xlu1 %v4007_v62, %s3680_s25 }
 0x10c   : > { %808 = vrot.lane.b32.xlu0 %v4013_v33, %s3680_s25 }
 0x10d   : > { %v4287_v34 = vpop.permute.xlu2 %765  ;;  %v795_v59 = vpop.permute.xlu1 %794 }
 0x10e   : > { %v760_v14 = vpop.permute.xlu0 %759 }
 0x10f   : > { %v1046_v62 = vsel %vm5600_vm6, %v1013_v11, %v760_v14 }
 0x110   : > { %v1079_v33 = vsel %vm5598_vm7, %v1046_v62, %v795_v59 }
 0x111   : > { %v1112_v1 = vsel %vm1110_vm8, %v1079_v33, %v832_v6 }
 0x113   : > { %896 = vrot.lane.b32.xlu2 %v3893_v51, %s3683_s28  ;;  %892 = vrot.lane.b32.xlu1 %v3907_v17, %s3683_s28 }
 0x114   : > { %849 = vrot.lane.b32.xlu0 %v3821_v27, %s3679_s24  ;;  %v949_v27 = vsel %vm945_vm3, %v3767_v39, %v4107_v26 }
 0x115   : > { %v914_v5 = vpop.permute.xlu1 %913  ;;  %v883_v21 = vpop.permute.xlu2 %882  ;;  %v982_v17 = vsel %vm978_vm5, %v949_v27, %v4115_v7 }
 0x116   : > { %v879_v41 = vpop.permute.xlu0 %878  ;;  %v1015_v59 = vsel %vm5599_vm4, %v982_v17, %v4227_v13 }
 0x117   : > { %v1145_v11 = vsel %vm1143_vm9, %v1112_v1, %v879_v41 }
 0x118   : > { %v1178_v14 = vsel %vm1176_vm10, %v1145_v11, %v914_v5 }
 0x119   : > { %3471 = vmatmul.msk.bf16.vlgmr.msra.gmra.mxu0 %vm1229_vm11, %v1178_v14 }
 0x11b   : > { %779 = vrot.lane.b32.xlu2 %v3893_v51, %s3681_s26  ;;  %931 = vrot.lane.b32.xlu1 %v4034_v18, %s3682_s27  ;;  %v1048_v51 = vsel %vm5600_vm6, %v1015_v59, %v762_v10 }
 0x11c   : > { %927 = vrot.lane.b32.xlu0 %v4010_v23, %s3682_s27 }
 0x11d   : > { %v834_v6 = vpop.permute.xlu1 %833  ;;  %v801_v3 = vpop.permute.xlu2 %800 }
 0x11e   : > { %v797_v54 = vpop.permute.xlu0 %796 }
 0x11f   : > { %v1081_v62 = vsel %vm5598_vm7, %v1048_v51, %v797_v54  ;;  %v750_v54 = vshll.u32 %v4095_v24, 16  ;;  %v955_v51 = vsel %vm945_vm3, %v3727_v0, %v4064_v40 }
 0x120   : > { %v1114_v39 = vsel %vm1110_vm8, %v1081_v62, %v834_v6  ;;  %v988_v62 = vsel %vm978_vm5, %v955_v51, %v4127_v28  ;;  %v959_v51 = vsel %vm945_vm3, %v3807_v8, %v4119_v38 }
 0x121   : > { %v1147_v7 = vsel %vm1143_vm9, %v1114_v39, %v881_v35 }
 0x123   : > { %898 = vrot.lane.b32.xlu2 %v3932_v57, %s3683_s28  ;;  %851 = vrot.lane.b32.xlu1 %v3888_v43, %s3679_s24  ;;  %v951_v43 = vsel %vm945_vm3, %v3731_v2, %v4090_v29 }
 0x124   : > { %814 = vrot.lane.b32.xlu0 %v4034_v18, %s3680_s25  ;;  %v984_v18 = vsel %vm978_vm5, %v951_v43, %v4167_v56 }
 0x125   : > { %v764_v23 = vpop.permute.xlu1 %763  ;;  %v920_v10 = vpop.permute.xlu2 %919  ;;  %v1017_v33 = vsel %vm5599_vm4, %v984_v18, %v4225_v19  ;;  %v791_v18 = vrot.slane %v4095_v24, 1 }
 0x126   : > { %v916_v26 = vpop.permute.xlu0 %915  ;;  %v1050_v1 = vsel %vm5600_vm6, %v1017_v33, %v764_v23  ;;  %v1021_v23 = vsel %vm5599_vm4, %v988_v62, %v4243_v47 }
 0x127   : > { %v1180_v13 = vsel %vm1176_vm10, %v1147_v7, %v916_v26  ;;  %v748_v26 = vshrl.u32 %v4095_v24, 16 }
 0x129   : > { %3472 = vmatmul.msk.bf16.gmra.mxu0 %vm1229_vm11, %v1180_v13 }
 0x12b   : > { %816 = vrot.lane.b32.xlu2 %v4031_v49, %s3680_s25  ;;  %781 = vrot.lane.b32.xlu1 %v3932_v57, %s3681_s26 }
 0x12c   : > { %933 = vrot.lane.b32.xlu0 %v4031_v49, %s3682_s27 }
 0x12d   : > { %v836_v35 = vpop.permute.xlu1 %835  ;;  %v840_v57 = vpop.permute.xlu2 %839 }
 0x12e   : > { %v799_v5 = vpop.permute.xlu0 %798 }
 0x12f   : > { %v1083_v41 = vsel %vm5598_vm7, %v1050_v1, %v799_v5  ;;  %v272_v5 = vld [vmem:[%s3724_s20 + $0xd4] sm:$0x1] }
 0x130   : > { %v1116_v2 = vsel %vm1110_vm8, %v1083_v41, %v836_v35 }
 0x131   : > { %v1149_v56 = vsel %vm1143_vm9, %v1116_v2, %v883_v21  ;;  %v864_v2 = vunpack.c.l.b16 %v272_v5 }
 0x133   : > { %935 = vrot.lane.b32.xlu2 %v4028_v12, %s3682_s27  ;;  %900 = vrot.lane.b32.xlu1 %v3929_v55, %s3683_s28 }
 0x134   : > { %853 = vrot.lane.b32.xlu0 %v3871_v20, %s3679_s24  ;;  %v953_v20 = vsel %vm945_vm3, %v3761_v30, %v4105_v9 }
 0x135   : > { %v768_v49 = vpop.permute.xlu1 %767  ;;  %v986_v21 = vsel %vm978_vm5, %v953_v20, %v4165_v15  ;;  %v4369_v14 = vpop.permute.xlu2 %771 }
 0x136   : > { %v918_v29 = vpop.permute.xlu0 %917 }
 0x137   : > { %v1182_v19 = vsel %vm1176_vm10, %v1149_v56, %v918_v29  ;;  %v865_v56 = vpack.c.b16 %v864_v2, %v864_v2 }
 0x139   : > { %3473 = vmatmul.msk.bf16.gmra.mxu0 %vm1229_vm11, %v1182_v19 }
 0x13b   : > { %855 = vrot.lane.b32.xlu2 %v3855_v58, %s3679_s24  ;;  %818 = vrot.lane.b32.xlu1 %v4028_v12, %s3680_s25  ;;  %v1019_v58 = vsel %vm5599_vm4, %v986_v21, %v4187_v31  ;;  %v269_v31 = vld [vmem:[%s3724_s20 + $0xc8] sm:$0x1] }
 0x13c   : > { %783 = vrot.lane.b32.xlu0 %v3929_v55, %s3681_s26  ;;  %v1052_v12 = vsel %vm5600_vm6, %v1019_v58, %v4287_v34  ;;  %v745_v59 = vunpack.c.l.b16 %v269_v31 }
 0x13d   : > { %v885_v11 = vpop.permute.xlu1 %884  ;;  %v1085_v17 = vsel %vm5598_vm7, %v1052_v12, %v801_v3  ;;  %v842_v6 = vpop.permute.xlu2 %841 }
 0x13e   : > { %v838_v27 = vpop.permute.xlu0 %837 }
 0x13f   : > { %v1118_v55 = vsel %vm1110_vm8, %v1085_v17, %v838_v27  ;;  %v874_v17 = vshll.u32 %v865_v56, 16 }
 0x140   : > { %v1151_v9 = vsel %vm1143_vm9, %v1118_v55, %v885_v11 }
 0x141   : > { %v1184_v34 = vsel %vm1176_vm10, %v1151_v9, %v920_v10  ;;  %v876_v9 = vrot.slane %v874_v17, 1 }
 0x143   : > { %785 = vrot.lane.b32.xlu2 %v3926_v53, %s3681_s26  ;;  %937 = vrot.lane.b32.xlu1 %v4050_v4, %s3682_s27 }
 0x144   : > { %902 = vrot.lane.b32.xlu0 %v3926_v53, %s3683_s28  ;;  %v746_v53 = vpack.c.b16 %v745_v59, %v745_v59 }
 0x145   : > { %v803_v30 = vpop.permute.xlu1 %802  ;;  %v776_v10 = vpop.permute.xlu2 %775 }
 0x146   : > { %v770_v15 = vpop.permute.xlu0 %769  ;;  %v755_v7 = vshll.u32 %v746_v53, 16  ;;  %v792_v35 = vrot.slane %v746_v53, 1 }
 0x148   : > { %v757_v28 = vrot.slane %v755_v7, 1  ;;  %v793_v41 = vsel %vm5596_vm1, %v791_v18, %v792_v35  ;;  %v1514_v35 = vld [vmem:[#allocation2 + $0x14] sm:$0x1] }
 0x149   : > { %3474 = vmatmul.msk.bf16.gmra.mxu0 %vm1229_vm11, %v1184_v34  ;;  %v1515_v5 = vsel %vm4482_vm2, 0, %v1514_v35 }
 0x14a   : > { %1516 = vst [vmem:[#allocation2 + $0x14] sm:$0x1] %v1515_v5 }
 0x14b   : > { %904 = vrot.lane.b32.xlu2 %v3951_v32, %s3683_s28  ;;  %857 = vrot.lane.b32.xlu1 %v3913_v22, %s3679_s24  ;;  %v1054_v22 = vsel %vm5600_vm6, %v1021_v23, %v768_v49  ;;  %v957_v49 = vsel %vm945_vm3, %v3747_v16, %v4072_v46 }
 0x14c   : > { %820 = vrot.lane.b32.xlu0 %v4050_v4, %s3680_s25  ;;  %v752_v4 = vrot.slane %v750_v54, 1  ;;  %v1087_v13 = vsel %vm5598_vm7, %v1054_v22, %v803_v30  ;;  %v990_v20 = vsel %vm978_vm5, %v957_v49, %v4179_v48  ;;  %v911_v48 = vrot.slane %v865_v56, 1  ;;  %v5628_v56 = vld [vmem:[#allocation6_spill] sm:$0xff] }
 0x14d   : > { %v922_v3 = vpop.permute.xlu1 %921  ;;  %v1120_v0 = vsel %vm1110_vm8, %v1087_v13, %v840_v57  ;;  %v844_v57 = vpop.permute.xlu2 %843  ;;  %v1023_v21 = vsel %vm5599_vm4, %v990_v20, %v4240_v61  ;;  %v5629_v20 = vld [vmem:[#allocation15_spill] sm:$0xff] }
 0x14e   : > { %v887_v39 = vpop.permute.xlu0 %886  ;;  %v753_v40 = vor.u32 %v752_v4, %v748_v26  ;;  %v1056_v27 = vsel %vm5600_vm6, %v1023_v21, %v770_v15  ;;  %v5630_v21 = vld [vmem:[#allocation20_spill] sm:$0xff] }
 0x14f   : > { %v1153_v47 = vsel %vm1143_vm9, %v1120_v0, %v887_v39  ;;  %v992_v39 = vsel %vm978_vm5, %v959_v51, %v4177_v60  ;;  %v1464_v0 = vld [vmem:[#allocation2 + $0xc] sm:$0x1] }
 0x150   : > { %v1186_v1 = vsel %vm1176_vm10, %v1153_v47, %v922_v3  ;;  %v1025_v22 = vsel %vm5599_vm4, %v992_v39, %v4199_v37 }
 0x151   : > { %v1058_v26 = vsel %vm5600_vm6, %v1025_v22, %v4369_v14 }
 0x153   : > { %822 = vrot.lane.b32.xlu2 %v4047_v63, %s3680_s25  ;;  %787 = vrot.lane.b32.xlu1 %v3951_v32, %s3681_s26  ;;  %v758_v32 = vsel %vm5597_vm0, %v753_v40, %v757_v28  ;;  %v1465_v40 = vsel %vm4473_vm14, 0, %v1464_v0 }
 0x154   : > { %939 = vrot.lane.b32.xlu0 %v4047_v63, %s3682_s27  ;;  %v3604_v63 = vld [vmem:[%s3724_s20 + $0xcc] sm:$0xff]  ;;  %1466 = vst [vmem:[#allocation2 + $0xc] sm:$0x1] %v1465_v40 }
 0x155   : > { %v805_v43 = vpop.permute.xlu1 %804  ;;  %v869_v19 = vshll.u32 %v3604_v63, 16  ;;  %v867_v12 = vshrl.u32 %v3604_v63, 16  ;;  %v910_v46 = vrot.slane %v3604_v63, 1  ;;  %v895_v31 = vpop.permute.xlu2 %894 }
 0x156   : > { %v4413_v33 = vpop.permute.xlu0 %773  ;;  %v1089_v58 = vsel %vm5598_vm7, %v1056_v27, %v805_v43 }
 0x157   : > { %v1122_v16 = vsel %vm1110_vm8, %v1089_v58, %v842_v6  ;;  %v912_v59 = vsel %vm5596_vm1, %v910_v46, %v911_v48  ;;  %v963_v6 = vsel %vm945_vm3, %v3775_v45, %v4080_v25  ;;  %v1467_v58 = vld [vmem:[#allocation2 + $0x18] sm:$0x1] }
 0x158   : > { %v996_v3 = vsel %vm978_vm5, %v963_v6, %v4191_v44  ;;  %v1468_v17 = vsel %vm4473_vm14, 0, %v1467_v58  ;;  %v5632_v6 = vld [vmem:[#allocation9_spill] sm:$0xff] }
 0x159   : > { %3475 = vmatmul.msk.bf16.gmra.mxu0 %vm1229_vm11, %v1186_v1  ;;  %v1029_v23 = vsel %vm5599_vm4, %v996_v3, %v4257_v50  ;;  %1469 = vst [vmem:[#allocation2 + $0x18] sm:$0x1] %v1468_v17  ;;  %v5633_v3 = vld [vmem:[#allocation22_spill] sm:$0xff] }
 0x15a   : > { %v1062_v45 = vsel %vm5600_vm6, %v1029_v23, %v776_v10 }
 0x15b   : > { %941 = vrot.lane.b32.xlu2 %v793_v41, %s3682_s27  ;;  %906 = vrot.lane.b32.xlu1 %v758_v32, %s3683_s28 }
 0x15c   : > { %859 = vrot.lane.b32.xlu0 %v4095_v24, %s3679_s24  ;;  %v871_v24 = vrot.slane %v869_v19, 1 }
 0x15d   : > { %v924_v29 = vpop.permute.xlu1 %923  ;;  %v778_v25 = vpop.permute.xlu2 %777 }
 0x15e   : > { %v889_v11 = vpop.permute.xlu0 %888  ;;  %v872_v30 = vor.u32 %v871_v24, %v867_v12 }
 0x15f   : > { %v1155_v55 = vsel %vm1143_vm9, %v1122_v16, %v889_v11 }
 0x160   : > { %v1188_v34 = vsel %vm1176_vm10, %v1155_v55, %v924_v29  ;;  %v877_v53 = vsel %vm5597_vm0, %v872_v30, %v876_v9  ;;  %vm1451_vm0 = vcmask 27648  }
 0x163   : > { %861 = vrot.lane.b32.xlu2 %v3604_v63, %s3679_s24  ;;  %824 = vrot.lane.b32.xlu1 %v793_v41, %s3680_s25  ;;  %v3651_v63 = vld [vmem:[%s3724_s20 + $0x54] sm:$0xff] }
 0x164   : > { %789 = vrot.lane.b32.xlu0 %v758_v32, %s3681_s26  ;;  %v965_v32 = vsel %vm945_vm3, %v3847_v52, %v4131_v42  ;;  %v961_v2 = vsel %vm945_vm3, %v3651_v63, %v4117_v36  ;;  %v5636_v63 = vld [vmem:[#allocation3_spill] sm:$0xff] }
 0x165   : > { %v811_v61 = vpop.permute.xlu1 %810  ;;  %v846_v28 = vpop.permute.xlu2 %845  ;;  %v994_v19 = vsel %vm978_vm5, %v961_v2, %v5628_v56 }
 0x166   : > { %v807_v15 = vpop.permute.xlu0 %806  ;;  %v1095_v8 = vsel %vm5598_vm7, %v1062_v45, %v811_v61  ;;  %v1027_v27 = vsel %vm5599_vm4, %v994_v19, %v5630_v21  ;;  %v5637_v19 = vld [vmem:[#allocation14_spill] sm:$0xff] }
 0x167   : > { %v1091_v38 = vsel %vm5598_vm7, %v1058_v26, %v807_v15  ;;  %v1060_v42 = vsel %vm5600_vm6, %v1027_v27, %v4413_v33 }
 0x168   : > { %v1124_v60 = vsel %vm1110_vm8, %v1091_v38, %v844_v57  ;;  %v5627_v57 = vld [vmem:[#allocation12_spill] sm:$0xff] }
 0x169   : > { %3476 = vmatmul.msk.bf16.gmra.mxu0 %vm1229_vm11, %v1188_v34  ;;  %v998_v49 = vsel %vm978_vm5, %v965_v32, %v5627_v57  ;;  %v3652_v34 = vld [vmem:[%s3724_s20 + $0x78] sm:$0xff]  ;;  %v1470_v38 = vld [vmem:[#allocation2 + $0x24] sm:$0x1]  ;;  %v1520_v32 = vld [vmem:[#allocation2 + $0x2c] sm:$0x1] }
 0x16a   : > { %v1031_v11 = vsel %vm5599_vm4, %v998_v49, %v5629_v20  ;;  %v1521_v56 = vsel %vm4482_vm2, 0, %v1520_v32  ;;  %v5643_v32 = vld [vmem:[#allocation13_spill] sm:$0xff] }
 0x16b   : > { %943 = vrot.lane.b32.xlu1 %v912_v59, %s3682_s27  ;;  %v1064_v52 = vsel %vm5600_vm6, %v1031_v11, %v778_v25  ;;  %v5631_v59 = vld [vmem:[#allocation5_spill] sm:$0xff]  ;;  %1522 = vst [vmem:[#allocation2 + $0x2c] sm:$0x1] %v1521_v56 }
 0x16c   : > { %908 = vrot.lane.b32.xlu0 %v877_v53, %s3683_s28  ;;  %v967_v53 = vsel %vm945_vm3, %v3652_v34, %v5631_v59  ;;  %v5638_v11 = vld [vmem:[#allocation21_spill] sm:$0xff] }
 0x16d   : > { %v891_v54 = vpop.permute.xlu1 %890  ;;  %v897_v1 = vpop.permute.xlu2 %896 }
 0x16e   : > { %v848_v62 = vpop.permute.xlu0 %847  ;;  %v1157_v7 = vsel %vm1143_vm9, %v1124_v60, %v891_v54  ;;  %v1000_v54 = vsel %vm978_vm5, %v967_v53, %v5632_v6  ;;  %v1471_v60 = vsel %vm4473_vm14, 0, %v1470_v38 }
 0x16f   : > { %v1128_v44 = vsel %vm1110_vm8, %v1095_v8, %v848_v62  ;;  %v1033_v62 = vsel %vm5599_vm4, %v1000_v54, %v5633_v3  ;;  %1472 = vst [vmem:[#allocation2 + $0x24] sm:$0x1] %v1471_v60 }
 0x170   : > { %v1161_v50 = vsel %vm1143_vm9, %v1128_v44, %v895_v31  ;;  %v1517_v31 = vld [vmem:[#allocation2 + $0x20] sm:$0x1] }
 0x171   : > { %v1518_v15 = vsel %vm4482_vm2, 0, %v1517_v31 }
 0x172   : > { %1519 = vst [vmem:[#allocation2 + $0x20] sm:$0x1] %v1518_v15  ;;  %v1473_v15 = vld [vmem:[#allocation2 + $0x30] sm:$0x1] }
 0x173   : > { %v1474_v6 = vsel %vm4473_vm14, 0, %v1473_v15 }
 0x174   : > { %1475 = vst [vmem:[#allocation2 + $0x30] sm:$0x1] %v1474_v6 }
 0x175   : > { %v930_v4 = vpop.permute.xlu1 %929  ;;  %v780_v55 = vpop.permute.xlu2 %779 }
 0x176   : > { %v926_v37 = vpop.permute.xlu0 %925  ;;  %v1194_v13 = vsel %vm1176_vm10, %v1161_v50, %v930_v4  ;;  %v1066_v22 = vsel %vm5600_vm6, %v1033_v62, %v780_v55 }
 0x177   : > { %3479 = vmatmul.msk.bf16.vlgmr.msra.gmra.mxu2 %vm1229_vm11, %v1194_v13  ;;  %v1190_v14 = vsel %vm1176_vm10, %v1157_v7, %v926_v37 }
 0x179   : > { %3477 = vmatmul.msk.bf16.gmra.mxu0 %vm1229_vm11, %v1190_v14 }
 0x17d   : > { %v813_v47 = vpop.permute.xlu1 %812  ;;  %v899_v25 = vpop.permute.xlu2 %898 }
 0x17e   : > { %v809_v43 = vpop.permute.xlu0 %808  ;;  %v1097_v36 = vsel %vm5598_vm7, %v1064_v52, %v813_v47  ;;  %v1918_v47 = vld [vmem:[#allocation2 + $0xc] sm:$0xf] }
 0x17f   : > { %v1093_v12 = vsel %vm5598_vm7, %v1060_v42, %v809_v43 }
 0x180   : > { %v1126_v16 = vsel %vm1110_vm8, %v1093_v12, %v846_v28 }
 0x185   : > { %v893_v41 = vpop.permute.xlu1 %892  ;;  %v817_v57 = vpop.permute.xlu2 %816 }
 0x186   : > { %v850_v29 = vpop.permute.xlu0 %849  ;;  %v1159_v33 = vsel %vm1143_vm9, %v1126_v16, %v893_v41  ;;  %v3653_v41 = vld [vmem:[%s3724_s20 + $0x84] sm:$0xff] }
 0x187   : > { %v1130_v24 = vsel %vm1110_vm8, %v1097_v36, %v850_v29  ;;  %v969_v2 = vsel %vm945_vm3, %v3653_v41, %v5636_v63  ;;  %v3684_v36 = vmov 0  }
 0x188   : > { %v1163_v48 = vsel %vm1143_vm9, %v1130_v24, %v897_v1  ;;  %v1002_v20 = vsel %vm978_vm5, %v969_v2, %v5637_v19  ;;  %1452 = vst.msk [vmem:[#allocation2] sm:$0xf] %vm1451_vm0, %v3684_v36  ;;  %v1922_v24 = vld [vmem:[#allocation2 + $0x14] sm:$0x1] }
 0x189   : > { %v1035_v21 = vsel %vm5599_vm4, %v1002_v20, %v5638_v11  ;;  %1453 = vst.msk [vmem:[#allocation2 + $0x4] sm:$0xf] %vm1451_vm0, %v3684_v36 }
 0x18a   : > { %1455 = vst.msk [vmem:[#allocation2 + $0x8] sm:$0x1] %vm1454_vm12, %v3684_v36 }
 0x18b   : > { %1457 = vst.msk [vmem:[#allocation2 + $0xcc] sm:$0xf] %vm1451_vm0, %v3684_v36 }
 0x18c   : > { %1458 = vst.msk [vmem:[#allocation2 + $0xd0] sm:$0xf] %vm1451_vm0, %v3684_v36 }
 0x18d   : > { %v932_v46 = vpop.permute.xlu1 %931  ;;  %1459 = vst.msk [vmem:[#allocation2 + $0xd4] sm:$0x1] %vm1454_vm12, %v3684_v36  ;;  %v936_v54 = vpop.permute.xlu2 %935  ;;  %vm5646_vm12 = vcmask 130048  }
 0x18e   : > { %v928_v61 = vpop.permute.xlu0 %927  ;;  %v1196_v30 = vsel %vm1176_vm10, %v1163_v48, %v932_v46 }
 0x18f   : > { %v1192_v9 = vsel %vm1176_vm10, %v1159_v33, %v928_v61  ;;  %3480 = vmatmul.msk.bf16.gmra.mxu2 %vm1229_vm11, %v1196_v30 }
 0x190   : > { %3478 = vmatmul.msk.bf16.gmra.mxu0 %vm1229_vm11, %v1192_v9  ;;  %v3607_v62 = vld [vmem:[#allocation2] sm:$0xff] }
 0x195   : > { %v852_v51 = vpop.permute.xlu1 %851 }
 0x196   : > { %v1275_v39 = vpop.f32.mrf.mxu0  ;;  %v815_v23 = vpop.permute.xlu0 %814 }
 0x197   : > { %vm1355_vm1 = vcmp.ge.f32.partialorder %v1275_v39, 0.0  ;;  %v1387_v45 = vmul.f32 0.01, %v1275_v39  ;;  %v1099_v26 = vsel %vm5598_vm7, %v1066_v22, %v815_v23 }
 0x198   : > { %v1132_v4 = vsel %vm1110_vm8, %v1099_v26, %v852_v51  ;;  %v1925_v26 = vld [vmem:[#allocation2 + $0x18] sm:$0xf] }
 0x199   : > { %v1419_v8 = vsel %vm1355_vm1, %v1275_v39, %v1387_v45  ;;  %v1165_v40 = vsel %vm1143_vm9, %v1132_v4, %v899_v25  ;;  %vm4534_vm1 = vmand %vm1451_vm0, %vm1512_vm15  ;;  %v2032_v25 = vld [vmem:[#allocation2 + $0x8] sm:$0x1] }
 0x19a   : > { %v1562_v44 = vpack.c.bf16 %v1419_v8, %v1419_v8 }
 0x19c   : > { %v1597_v50 = vshrl.u32 %v1562_v44, 16  ;;  %v1600_v13 = vshll.u32 %v1562_v44, 16  ;;  %v2180_v44 = vunpack.c.l.b16 %v2032_v25 }
 0x19d   : > { %v782_v7 = vpop.permute.xlu1 %781 }
 0x19e   : > { %v1599_v37 = vrot.slane %v1597_v50, 7  ;;  %v1277_v14 = vpop.f32.mrf.mxu0  ;;  %v934_v0 = vpop.permute.xlu0 %933  ;;  %v1068_v52 = vsel %vm5600_vm6, %v1035_v21, %v782_v7  ;;  %vm5641_vm6 = vcmask 162816   ;;  %v1523_v7 = vld [vmem:[#allocation2 + $0x38] sm:$0x1] }
 0x19f   : > { %vm1356_vm7 = vcmp.ge.f32.partialorder %v1277_v14, 0.0  ;;  %v1388_v43 = vmul.f32 0.01, %v1277_v14  ;;  %v1198_v35 = vsel %vm1176_vm10, %v1165_v40, %v934_v0  ;;  %v1101_v30 = vsel %vm5641_vm6, %v1068_v52, %v817_v57  ;;  %v3654_v0 = vld [vmem:[%s3724_s20 + $0x90] sm:$0xff]  ;;  %v5642_v40 = vld [vmem:[#allocation8_spill] sm:$0xff]  ;;  %v856_v52 = vpop.permute.xlu2 %855 }
 0x1a0   : > { %v1602_v5 = vor.u32 %v1600_v13, %v1599_v37  ;;  %3481 = vmatmul.msk.bf16.gmra.mxu2 %vm1229_vm11, %v1198_v35  ;;  %v1603_v55 = vrot.slane %v1599_v37, 4  ;;  %v4575_v37 = vpack.c.b16 %v2180_v44, %v2180_v44  ;;  %v2213_v13 = vshrl.u32 %v3607_v62, 16  ;;  %v1932_v44 = vld [vmem:[#allocation2 + $0x24] sm:$0xf] }
 0x1a1   : > { %v1420_v1 = vsel %vm1356_vm7, %v1277_v14, %v1388_v43  ;;  %vm1594_vm7 = vsmask.f32 4368  ;;  %v2215_v14 = vshll.u32 %v3607_v62, 16  ;;  %vm5645_vm6 = vcmask 97280  }
 0x1a2   : > { %v1919_v49 = vsel %vm4534_vm1, %v1602_v5, %v1918_v47  ;;  %v1563_v29 = vpack.c.bf16 %v1420_v1, %v1420_v1  ;;  %vm4555_vm15 = vmor %vm1462_vm13, %vm1594_vm7  ;;  %v971_v47 = vsel %vm945_vm3, %v3654_v0, %v5642_v40  ;;  %v1524_v1 = vsel %vm4482_vm2, 0, %v1523_v7  ;;  %v1526_v0 = vld [vmem:[#allocation2 + $0x44] sm:$0x1]  ;;  %v3655_v40 = vld [vmem:[%s3724_s20 + $0x9c] sm:$0xff] }
 0x1a3   : > { %1920 = vst [vmem:[#allocation2 + $0xc] sm:$0xf] %v1919_v49  ;;  %v1004_v41 = vsel %vm978_vm5, %v971_v47, %v5643_v32  ;;  %v2217_v2 = vrot.slane %v2215_v14, 1  ;;  %v2220_v57 = vshll.u32 %v4575_v37, 16  ;;  %v5644_v49 = vld [vmem:[#allocation18_spill] sm:$0xff]  ;;  %vm5647_vm7 = vcmask 162816  }
 0x1a4   : > { %v1605_v27 = vshrl.u32 %v1563_v29, 16  ;;  %v1608_v12 = vshll.u32 %v1563_v29, 16  ;;  %v1037_v29 = vsel %vm5645_vm6, %v1004_v41, %v5644_v49  ;;  %1525 = vst [vmem:[#allocation2 + $0x38] sm:$0x1] %v1524_v1  ;;  %v5650_v47 = vld [vmem:[#allocation7_spill] sm:$0xff]  ;;  %v1527_v32 = vsel %vm4482_vm2, 0, %v1526_v0 }
 0x1a5   : > { %v901_v42 = vpop.permute.xlu1 %900  ;;  %v2218_v21 = vor.u32 %v2217_v2, %v2213_v13  ;;  %v5651_v41 = vld [vmem:[#allocation11_spill] sm:$0xff]  ;;  %1528 = vst [vmem:[#allocation2 + $0x44] sm:$0x1] %v1527_v32 }
 0x1a6   : > { %v1607_v58 = vrot.slane %v1605_v27, 7  ;;  %v1280_v17 = vpop.f32.mrf.mxu0  ;;  %v854_v16 = vpop.permute.xlu0 %853  ;;  %v2222_v27 = vrot.slane %v2220_v57, 1  ;;  %v5652_v57 = vld [vmem:[#allocation24_spill] sm:$0xff] }
 0x1a7   : > { %vm1357_vm4 = vcmp.ge.f32.partialorder %v1280_v17, 0.0  ;;  %v1389_v48 = vmul.f32 0.01, %v1280_v17  ;;  %v1134_v31 = vsel %vm1110_vm8, %v1101_v30, %v854_v16 }
 0x1a8   : > { %v1610_v33 = vor.u32 %v1608_v12, %v1607_v58  ;;  %v1612_v61 = vrot.slane %v1607_v58, 4  ;;  %v1167_v3 = vsel %vm1143_vm9, %v1134_v31, %v901_v42  ;;  %v1929_v12 = vld [vmem:[#allocation2 + $0x20] sm:$0x1] }
 0x1a9   : > { %v1421_v9 = vsel %vm1357_vm4, %v1280_v17, %v1389_v48  ;;  %v1200_v38 = vsel %vm1176_vm10, %v1167_v3, %v936_v54 }
 0x1aa   : > { %v1611_v34 = vsel %vm4555_vm15, %v1603_v55, %v1610_v33  ;;  %v1923_v59 = vsel %vm4473_vm14, %v1612_v61, %v1922_v24  ;;  %v1564_v53 = vpack.c.bf16 %v1421_v9, %v1421_v9 }
 0x1ab   : > { %1921 = vst.msk [vmem:[#allocation2 + $0x10] sm:$0xf] %vm1451_vm0, %v1611_v34 }
 0x1ac   : > { %1924 = vst [vmem:[#allocation2 + $0x14] sm:$0x1] %v1923_v59  ;;  %v1614_v51 = vshrl.u32 %v1564_v53, 16  ;;  %v1617_v23 = vshll.u32 %v1564_v53, 16  ;;  %v1476_v53 = vld [vmem:[#allocation2 + $0x3c] sm:$0x1] }
 0x1ad   : > { %v819_v4 = vpop.permute.xlu1 %818 }
 0x1ae   : > { %v1616_v39 = vrot.slane %v1614_v51, 7  ;;  %v1282_v22 = vpop.f32.mrf.mxu0  ;;  %v784_v45 = vpop.permute.xlu0 %783 }
 0x1af   : > { %vm1358_vm4 = vcmp.ge.f32.partialorder %v1282_v22, 0.0  ;;  %v1390_v8 = vmul.f32 0.01, %v1282_v22  ;;  %v1070_v20 = vsel %vm5646_vm12, %v1037_v29, %v784_v45 }
 0x1b0   : > { %v1619_v60 = vor.u32 %v1617_v23, %v1616_v39  ;;  %3482 = vmatmul.msk.bf16.gmra.mxu2 %vm1229_vm11, %v1200_v38  ;;  %v1620_v42 = vrot.slane %v1616_v39, 4  ;;  %v1103_v9 = vsel %vm5647_vm7, %v1070_v20, %v819_v4  ;;  %v1477_v23 = vsel %vm4473_vm14, 0, %v1476_v53 }
 0x1b1   : > { %v1422_v50 = vsel %vm1358_vm4, %v1282_v22, %v1390_v8  ;;  %vm5648_vm4 = vsmask.f32 7424  ;;  %v1136_v39 = vsel %vm1110_vm8, %v1103_v9, %v856_v52  ;;  %1478 = vst [vmem:[#allocation2 + $0x3c] sm:$0x1] %v1477_v23  ;;  %vm5654_vm7 = vcmask 130048  }
 0x1b2   : > { %v1926_v43 = vsel %vm4534_vm1, %v1619_v60, %v1925_v26  ;;  %v1565_v35 = vpack.c.bf16 %v1422_v50, %v1422_v50  ;;  %v3608_v5 = vld [vmem:[#allocation2 + $0xc] sm:$0xff]  ;;  %v2223_v59 = vsel %vm5648_vm4, %v2218_v21, %v2222_v27  ;;  %vm5649_vm6 = vmmov %vm5648_vm4  ;;  %v786_v50 = vpop.permute.xlu2 %785  ;;  %vm5655_vm4 = vcmask 162816  }
 0x1b3   : > { %1927 = vst [vmem:[#allocation2 + $0x18] sm:$0xf] %v1926_v43  ;;  %v2035_v63 = vld [vmem:[#allocation2 + $0x14] sm:$0x1]  ;;  %v2227_v11 = vshll.u32 %v3608_v5, 16  ;;  %v2225_v55 = vshrl.u32 %v3608_v5, 16  ;;  %2404 = vrot.lane.b32.xlu2 %v2223_v59, %s3676_s21  ;;  %v973_v43 = vsel %vm945_vm3, %v3655_v40, %v5650_v47 }
 0x1b4   : > { %v1622_v56 = vshrl.u32 %v1565_v35, 16  ;;  %v2181_v19 = vunpack.c.l.b16 %v2035_v63  ;;  %v1625_v58 = vshll.u32 %v1565_v35, 16  ;;  %v1006_v63 = vsel %vm978_vm5, %v973_v43, %v5651_v41  ;;  %v1936_v52 = vld [vmem:[#allocation2 + $0x2c] sm:$0x1]  ;;  %v1529_v47 = vld [vmem:[#allocation2 + $0x50] sm:$0x1] }
 0x1b5   : > { %v2229_v33 = vrot.slane %v2227_v11, 1  ;;  %v938_v51 = vpop.permute.xlu1 %937  ;;  %v5659_v43 = vld [vmem:[#allocation23_spill] sm:$0xff] }
 0x1b6   : > { %v1624_v36 = vrot.slane %v1622_v56, 7  ;;  %v1285_v24 = vpop.f32.mrf.mxu0  ;;  %v4590_v17 = vpack.c.b16 %v2181_v19, %v2181_v19  ;;  %v903_v48 = vpop.permute.xlu0 %902 }
 0x1b7   : > { %vm1359_vm13 = vcmp.ge.f32.partialorder %v1285_v24, 0.0  ;;  %v1391_v16 = vmul.f32 0.01, %v1285_v24  ;;  %v2230_v34 = vor.u32 %v2229_v33, %v2225_v55  ;;  %v1169_v45 = vsel %vm1143_vm9, %v1136_v39, %v903_v48 }
 0x1b8   : > { %v1627_v61 = vor.u32 %v1625_v58, %v1624_v36  ;;  %v1629_v30 = vrot.slane %v1624_v36, 4  ;;  %v2232_v31 = vshll.u32 %v4590_v17, 16  ;;  %v1202_v4 = vsel %vm1176_vm10, %v1169_v45, %v938_v51 }
 0x1b9   : > { %v1423_v15 = vsel %vm1359_vm13, %v1285_v24, %v1391_v16  ;;  %vm5653_vm13 = vcmask 97280  }
 0x1ba   : > { %v1628_v6 = vsel %vm4555_vm15, %v1620_v42, %v1627_v61  ;;  %v1930_v54 = vsel %vm4473_vm14, %v1629_v30, %v1929_v12  ;;  %v1566_v3 = vpack.c.bf16 %v1423_v15, %v1423_v15  ;;  %v2234_v62 = vrot.slane %v2232_v31, 1  ;;  %v905_v61 = vpop.permute.xlu2 %904  ;;  %v1479_v15 = vld [vmem:[#allocation2 + $0x48] sm:$0x1] }
 0x1bb   : > { %1928 = vst.msk [vmem:[#allocation2 + $0x1c] sm:$0xf] %vm1451_vm0, %v1628_v6  ;;  %v1039_v49 = vsel %vm5653_vm13, %v1006_v63, %v5652_v57  ;;  %v1530_v63 = vsel %vm4482_vm2, 0, %v1529_v47 }
 0x1bc   : > { %1931 = vst [vmem:[#allocation2 + $0x20] sm:$0x1] %v1930_v54  ;;  %v1631_v22 = vshrl.u32 %v1566_v3, 16  ;;  %v4606_v25 = vsel %vm5649_vm6, %v2230_v34, %v2234_v62  ;;  %v1634_v8 = vshll.u32 %v1566_v3, 16  ;;  %v1072_v20 = vsel %vm5654_vm7, %v1039_v49, %v786_v50  ;;  %v5657_v50 = vld [vmem:[#allocation4_spill] sm:$0xff] }
 0x1bd   : > { %2406 = vrot.lane.b32.xlu0 %v4606_v25, %s3676_s21  ;;  %v858_v29 = vpop.permute.xlu1 %857  ;;  %v1480_v3 = vsel %vm4473_vm14, 0, %v1479_v15  ;;  %vm5660_vm7 = vcmask 97280   ;;  %1531 = vst [vmem:[#allocation2 + $0x50] sm:$0x1] %v1530_v63  ;;  %v1482_v15 = vld [vmem:[#allocation2 + $0x54] sm:$0x1] }
 0x1be   : > { %v1633_v26 = vrot.slane %v1631_v22, 7  ;;  %v1287_v38 = vpop.f32.mrf.mxu0  ;;  %v821_v14 = vpop.permute.xlu0 %820  ;;  %1481 = vst [vmem:[#allocation2 + $0x48] sm:$0x1] %v1480_v3 }
 0x1bf   : > { %vm1360_vm12 = vcmp.ge.f32.partialorder %v1287_v38, 0.0  ;;  %v1392_v60 = vmul.f32 0.01, %v1287_v38  ;;  %v1105_v42 = vsel %vm5655_vm4, %v1072_v20, %v821_v14  ;;  %v5658_v14 = vld [vmem:[#allocation17_spill] sm:$0xff]  ;;  %vm5661_vm4 = vcmask 130048  }
 0x1c0   : > { %v1636_v7 = vor.u32 %v1634_v8, %v1633_v26  ;;  %3483 = vmatmul.msk.bf16.gmra.mxu2 %vm1229_vm11, %v1202_v4  ;;  %v1637_v48 = vrot.slane %v1633_v26, 4  ;;  %v1138_v54 = vsel %vm1110_vm8, %v1105_v42, %v858_v29  ;;  %v3656_v4 = vld [vmem:[%s3724_s20 + $0xa8] sm:$0xff] }
 0x1c1   : > { %v1424_v13 = vsel %vm1360_vm12, %v1287_v38, %v1392_v60  ;;  %vm5656_vm12 = vsmask.f32 7424  ;;  %v1171_v23 = vsel %vm1143_vm9, %v1138_v54, %v905_v61  ;;  %v1939_v38 = vld [vmem:[#allocation2 + $0x30] sm:$0xf]  ;;  %v1483_v54 = vsel %vm4473_vm14, 0, %v1482_v15 }
 0x1c2   : > { %v1933_v35 = vsel %vm4534_vm1, %v1636_v7, %v1932_v44  ;;  %v1567_v5 = vpack.c.bf16 %v1424_v13, %v1424_v13  ;;  %v3609_v1 = vld [vmem:[#allocation2 + $0x18] sm:$0xff]  ;;  %v975_v7 = vsel %vm945_vm3, %v3656_v4, %v5657_v50  ;;  %1484 = vst [vmem:[#allocation2 + $0x54] sm:$0x1] %v1483_v54 }
 0x1c3   : > { %1934 = vst [vmem:[#allocation2 + $0x24] sm:$0xf] %v1933_v35  ;;  %v2038_v2 = vld [vmem:[#allocation2 + $0x20] sm:$0x1]  ;;  %v2239_v11 = vshll.u32 %v3609_v1, 16  ;;  %v2237_v24 = vshrl.u32 %v3609_v1, 16  ;;  %v1008_v0 = vsel %vm978_vm5, %v975_v7, %v5658_v14  ;;  %v823_v1 = vpop.permute.xlu2 %822 }
 0x1c4   : > { %v1639_v56 = vshrl.u32 %v1567_v5, 16  ;;  %v2182_v19 = vunpack.c.l.b16 %v2038_v2  ;;  %v1642_v27 = vshll.u32 %v1567_v5, 16  ;;  %v1041_v35 = vsel %vm5660_vm7, %v1008_v0, %v5659_v43  ;;  %v1946_v4 = vld [vmem:[#allocation2 + $0x3c] sm:$0xf]  ;;  %v5665_v0 = vld [vmem:[#allocation16_spill] sm:$0xff] }
 0x1c5   : > { %v2241_v16 = vrot.slane %v2239_v11, 1  ;;  %v788_v22 = vpop.permute.xlu1 %787  ;;  %v5666_v43 = vld [vmem:[#allocation19_spill] sm:$0xff] }
 0x1c6   : > { %v1641_v21 = vrot.slane %v1639_v56, 7  ;;  %v1290_v36 = vpop.f32.mrf.mxu0  ;;  %v4625_v58 = vpack.c.b16 %v2182_v19, %v2182_v19  ;;  %v940_v51 = vpop.permute.xlu0 %939  ;;  %v1074_v2 = vsel %vm5661_vm4, %v1041_v35, %v788_v22  ;;  %v3657_v22 = vld [vmem:[%s3724_s20 + $0xb4] sm:$0xff]  ;;  %vm5667_vm4 = vcmask 97280   ;;  %s5406_s20 = scalar_lea.vmem %s5591_s1, %s3585_s17 }
 0x1c7   : > { %vm1361_vm6 = vcmp.ge.f32.partialorder %v1290_v36, 0.0  ;;  %v1393_v12 = vmul.f32 0.01, %v1290_v36  ;;  %v2242_v31 = vor.u32 %v2241_v16, %v2237_v24  ;;  %v1204_v60 = vsel %vm1176_vm10, %v1171_v23, %v940_v51 }
 0x1c8   : > { %v1644_v55 = vor.u32 %v1642_v27, %v1641_v21  ;;  %v1646_v33 = vrot.slane %v1641_v21, 4  ;;  %v2244_v30 = vshll.u32 %v4625_v58, 16  ;;  %v1943_v27 = vld [vmem:[#allocation2 + $0x38] sm:$0x1] }
 0x1c9   : > { %v1425_v9 = vsel %vm1361_vm6, %v1290_v36, %v1393_v12  ;;  %vm5662_vm6 = vcmask 162816  }
 0x1ca   : > { %v1645_v34 = vsel %vm4555_vm15, %v1637_v48, %v1644_v55  ;;  %v1937_v59 = vsel %vm4473_vm14, %v1646_v33, %v1936_v52  ;;  %v1568_v53 = vpack.c.bf16 %v1425_v9, %v1425_v9  ;;  %v2246_v6 = vrot.slane %v2244_v30, 1 }
 0x1cb   : > { %1935 = vst.msk [vmem:[#allocation2 + $0x28] sm:$0xf] %vm1451_vm0, %v1645_v34  ;;  %v1107_v20 = vsel %vm5662_vm6, %v1074_v2, %v823_v1  ;;  %v942_v3 = vpop.permute.xlu2 %941  ;;  %v1532_v1 = vld [vmem:[#allocation2 + $0x5c] sm:$0x1]  ;;  %vm5668_vm6 = vcmask 130048  }
 0x1cc   : > { %1938 = vst [vmem:[#allocation2 + $0x2c] sm:$0x1] %v1937_v59  ;;  %v1648_v62 = vshrl.u32 %v1568_v53, 16  ;;  %v4637_v39 = vsel %vm5656_vm12, %v2242_v31, %v2246_v6  ;;  %v1651_v26 = vshll.u32 %v1568_v53, 16 }
 0x1cd   : > { %2408 = vrot.lane.b32.xlu1 %v4637_v39, %s3676_s21  ;;  %v907_v33 = vpop.permute.xlu1 %906 }
 0x1ce   : > { %v1650_v45 = vrot.slane %v1648_v62, 7  ;;  %v1292_v8 = vpop.f32.mrf.mxu0  ;;  %v860_v56 = vpop.permute.xlu0 %859 }
 0x1cf   : > { %vm1362_vm13 = vcmp.ge.f32.partialorder %v1292_v8, 0.0  ;;  %v1394_v44 = vmul.f32 0.01, %v1292_v8  ;;  %v1140_v30 = vsel %vm1110_vm8, %v1107_v20, %v860_v56 }
 0x1d0   : > { %v1653_v13 = vor.u32 %v1651_v26, %v1650_v45  ;;  %3484 = vmatmul.msk.bf16.gmra.mxu2 %vm1229_vm11, %v1204_v60  ;;  %v1654_v16 = vrot.slane %v1650_v45, 4  ;;  %v1173_v51 = vsel %vm1143_vm9, %v1140_v30, %v907_v33  ;;  %v5664_v45 = vld [vmem:[#allocation10_spill] sm:$0xff]  ;;  %v1488_v60 = vld [vmem:[#allocation2 + $0x6c] sm:$0x1] }
 0x1d1   : > { %v1426_v40 = vsel %vm1362_vm13, %v1292_v8, %v1394_v44  ;;  %vm5663_vm13 = vsmask.f32 7424  ;;  %v977_v26 = vsel %vm945_vm3, %v3657_v22, %v5664_v45  ;;  %v1489_v14 = vsel %vm4473_vm14, 0, %v1488_v60 }
 0x1d2   : > { %v1940_v5 = vsel %vm4534_vm1, %v1653_v13, %v1939_v38  ;;  %v1569_v32 = vpack.c.bf16 %v1426_v40, %v1426_v40  ;;  %v3610_v41 = vld [vmem:[#allocation2 + $0x24] sm:$0xff]  ;;  %v1206_v13 = vsel %vm1176_vm10, %v1173_v51, %v942_v3  ;;  %v1010_v40 = vsel %vm978_vm5, %v977_v26, %v5665_v0  ;;  %1490 = vst [vmem:[#allocation2 + $0x6c] sm:$0x1] %v1489_v14  ;;  %v1485_v14 = vld [vmem:[#allocation2 + $0x60] sm:$0x1] }
 0x1d3   : > { %1941 = vst [vmem:[#allocation2 + $0x30] sm:$0xf] %v1940_v5  ;;  %v2041_v57 = vld [vmem:[#allocation2 + $0x2c] sm:$0x1]  ;;  %v2251_v19 = vshll.u32 %v3610_v41, 16  ;;  %v2249_v12 = vshrl.u32 %v3610_v41, 16  ;;  %v1043_v35 = vsel %vm5667_vm4, %v1010_v40, %v5666_v43 }
 0x1d4   : > { %v1656_v49 = vshrl.u32 %v1569_v32, 16  ;;  %v2183_v29 = vunpack.c.l.b16 %v2041_v57  ;;  %v1659_v21 = vshll.u32 %v1569_v32, 16  ;;  %v1486_v40 = vsel %vm4473_vm14, 0, %v1485_v14 }
 0x1d5   : > { %v2253_v24 = vrot.slane %v2251_v19, 1  ;;  %v825_v63 = vpop.permute.xlu1 %824  ;;  %1487 = vst [vmem:[#allocation2 + $0x60] sm:$0x1] %v1486_v40 }
 0x1d6   : > { %v1658_v11 = vrot.slane %v1656_v49, 7  ;;  %v1295_v52 = vpop.f32.mrf.mxu0  ;;  %v4657_v42 = vpack.c.b16 %v2183_v29, %v2183_v29  ;;  %v790_v50 = vpop.permute.xlu0 %789  ;;  %v1533_v49 = vsel %vm4482_vm2, 0, %v1532_v1 }
 0x1d7   : > { %vm1363_vm12 = vcmp.ge.f32.partialorder %v1295_v52, 0.0  ;;  %v1395_v36 = vmul.f32 0.01, %v1295_v52  ;;  %v2254_v31 = vor.u32 %v2253_v24, %v2249_v12  ;;  %v1076_v41 = vsel %vm5668_vm6, %v1043_v35, %v790_v50  ;;  %1534 = vst [vmem:[#allocation2 + $0x5c] sm:$0x1] %v1533_v49 }
 0x1d8   : > { %v1661_v48 = vor.u32 %v1659_v21, %v1658_v11  ;;  %v1663_v55 = vrot.slane %v1658_v11, 4  ;;  %v2256_v61 = vshll.u32 %v4657_v42, 16  ;;  %v1950_v11 = vld [vmem:[#allocation2 + $0x44] sm:$0x1] }
 0x1d9   : > { %v1427_v9 = vsel %vm1363_vm12, %v1295_v52, %v1395_v36  ;;  %vm5669_vm12 = vcmask 162816  }
 0x1da   : > { %v1662_v34 = vsel %vm4555_vm15, %v1654_v16, %v1661_v48  ;;  %v1944_v59 = vsel %vm4473_vm14, %v1663_v55, %v1943_v27  ;;  %v1570_v53 = vpack.c.bf16 %v1427_v9, %v1427_v9  ;;  %v2258_v6 = vrot.slane %v2256_v61, 1  ;;  %v1538_v16 = vld [vmem:[#allocation2 + $0x74] sm:$0x1]  ;;  %v862_v61 = vpop.permute.xlu2 %861 }
 0x1db   : > { %1942 = vst.msk [vmem:[#allocation2 + $0x34] sm:$0xf] %vm1451_vm0, %v1662_v34  ;;  %v1109_v20 = vsel %vm5669_vm12, %v1076_v41, %v825_v63  ;;  %v1539_v15 = vsel %vm4482_vm2, 0, %v1538_v16  ;;  %v1491_v41 = vld [vmem:[#allocation2 + $0x78] sm:$0x1] }
 0x1dc   : > { %1945 = vst [vmem:[#allocation2 + $0x38] sm:$0x1] %v1944_v59  ;;  %v1665_v62 = vshrl.u32 %v1570_v53, 16  ;;  %v4670_v23 = vsel %vm5663_vm13, %v2254_v31, %v2258_v6  ;;  %v1668_v38 = vshll.u32 %v1570_v53, 16  ;;  %v1957_v63 = vld [vmem:[#allocation2 + $0x50] sm:$0x1] }
 0x1dd   : > { %2410 = vrot.lane.b32.xlu2 %v4670_v23, %s3676_s21  ;;  %1540 = vst [vmem:[#allocation2 + $0x74] sm:$0x1] %v1539_v15  ;;  %v944_v45 = vpop.permute.xlu1 %943  ;;  %v1492_v49 = vsel %vm4473_vm14, 0, %v1491_v41  ;;  %v1960_v15 = vld [vmem:[#allocation2 + $0x54] sm:$0xf] }
 0x1de   : > { %v1667_v8 = vrot.slane %v1665_v62, 7  ;;  %v1297_v44 = vpop.f32.mrf.mxu0  ;;  %v909_v34 = vpop.permute.xlu0 %908  ;;  %v1142_v62 = vsel %vm1110_vm8, %v1109_v20, %v862_v61  ;;  %1493 = vst [vmem:[#allocation2 + $0x78] sm:$0x1] %v1492_v49  ;;  %v1535_v20 = vld [vmem:[#allocation2 + $0x68] sm:$0x1] }
 0x1df   : > { %vm1364_vm7 = vcmp.ge.f32.partialorder %v1297_v44, 0.0  ;;  %v1396_v7 = vmul.f32 0.01, %v1297_v44  ;;  %v1175_v22 = vsel %vm1143_vm9, %v1142_v62, %v909_v34  ;;  %v1964_v40 = vld [vmem:[#allocation2 + $0x5c] sm:$0x1] }
 0x1e0   : > { %v1670_v47 = vor.u32 %v1668_v38, %v1667_v8  ;;  %3485 = vmatmul.msk.bf16.gmra.mxu2 %vm1229_vm11, %v1206_v13  ;;  %v1671_v27 = vrot.slane %v1667_v8, 4 }
 0x1e1   : > { %v1428_v5 = vsel %vm1364_vm7, %v1297_v44, %v1396_v7  ;;  %vm5670_vm7 = vsmask.f32 7424  ;;  %v1208_v7 = vsel %vm1176_vm10, %v1175_v22, %v944_v45  ;;  %v1974_v22 = vld [vmem:[#allocation2 + $0x6c] sm:$0xf] }
 0x1e2   : > { %v1947_v32 = vsel %vm4534_vm1, %v1670_v47, %v1946_v4  ;;  %v1571_v2 = vpack.c.bf16 %v1428_v5, %v1428_v5  ;;  %v4688_v57 = vld [vmem:[#allocation2 + $0x30] sm:$0xff]  ;;  %v1953_v4 = vld [vmem:[#allocation2 + $0x48] sm:$0xf] }
 0x1e3   : > { %1948 = vst [vmem:[#allocation2 + $0x3c] sm:$0xf] %v1947_v32  ;;  %v2044_v29 = vld [vmem:[#allocation2 + $0x38] sm:$0x1]  ;;  %v2263_v21 = vshll.u32 %v4688_v57, 16  ;;  %v2261_v55 = vshrl.u32 %v4688_v57, 16 }
 0x1e4   : > { %v1673_v56 = vshrl.u32 %v1571_v2, 16  ;;  %v2184_v19 = vunpack.c.l.b16 %v2044_v29  ;;  %v1676_v36 = vshll.u32 %v1571_v2, 16  ;;  %v1978_v49 = vld [vmem:[#allocation2 + $0x74] sm:$0x1] }
 0x1e5   : > { %v2265_v33 = vrot.slane %v2263_v21, 1  ;;  %v1536_v21 = vsel %vm4482_vm2, 0, %v1535_v20 }
 0x1e6   : > { %v1675_v52 = vrot.slane %v1673_v56, 7  ;;  %v1300_v12 = vpop.f32.mrf.mxu0  ;;  %v4694_v24 = vpack.c.b16 %v2184_v19, %v2184_v19  ;;  %1537 = vst [vmem:[#allocation2 + $0x68] sm:$0x1] %v1536_v21 }
 0x1e7   : > { %vm1365_vm13 = vcmp.ge.f32.partialorder %v1300_v12, 0.0  ;;  %v1397_v48 = vmul.f32 0.01, %v1300_v12  ;;  %v2266_v53 = vor.u32 %v2265_v33, %v2261_v55 }
 0x1e8   : > { %v1678_v30 = vor.u32 %v1676_v36, %v1675_v52  ;;  %v1680_v9 = vrot.slane %v1675_v52, 4  ;;  %v2268_v31 = vshll.u32 %v4694_v24, 16 }
 0x1e9   : > { %v1429_v59 = vsel %vm1365_vm13, %v1300_v12, %v1397_v48 }
 0x1ea   : > { %v1679_v6 = vsel %vm4555_vm15, %v1671_v27, %v1678_v30  ;;  %v1951_v54 = vsel %vm4473_vm14, %v1680_v9, %v1950_v11  ;;  %v1572_v51 = vpack.c.bf16 %v1429_v59, %v1429_v59  ;;  %v2270_v3 = vrot.slane %v2268_v31, 1  ;;  %v1541_v31 = vld [vmem:[#allocation2 + $0x80] sm:$0x1] }
 0x1eb   : > { %1949 = vst.msk [vmem:[#allocation2 + $0x40] sm:$0xf] %vm1451_vm0, %v1679_v6  ;;  %v1542_v59 = vsel %vm4482_vm2, 0, %v1541_v31 }
 0x1ec   : > { %1952 = vst [vmem:[#allocation2 + $0x44] sm:$0x1] %v1951_v54  ;;  %v1682_v26 = vshrl.u32 %v1572_v51, 16  ;;  %v4708_v8 = vsel %vm5670_vm7, %v2266_v53, %v2270_v3  ;;  %v1685_v44 = vshll.u32 %v1572_v51, 16 }
 0x1ed   : > { %2412 = vrot.lane.b32.xlu0 %v4708_v8, %s3676_s21  ;;  %1543 = vst [vmem:[#allocation2 + $0x80] sm:$0x1] %v1542_v59 }
 0x1ee   : > { %v1684_v38 = vrot.slane %v1682_v26, 7  ;;  %v1302_v60 = vpop.f32.mrf.mxu0 }
 0x1ef   : > { %vm1366_vm4 = vcmp.ge.f32.partialorder %v1302_v60, 0.0  ;;  %v1398_v50 = vmul.f32 0.01, %v1302_v60 }
 0x1f0   : > { %v1687_v13 = vor.u32 %v1685_v44, %v1684_v38  ;;  %3486 = vmatmul.msk.bf16.gmra.mxu2 %vm1229_vm11, %v1208_v7  ;;  %v1688_v29 = vrot.slane %v1684_v38, 4 }
 0x1f1   : > { %v1430_v0 = vsel %vm1366_vm4, %v1302_v60, %v1398_v50 }
 0x1f2   : > { %v1954_v47 = vsel %vm4534_vm1, %v1687_v13, %v1953_v4  ;;  %v1573_v43 = vpack.c.bf16 %v1430_v0, %v1430_v0  ;;  %v1494_v0 = vld [vmem:[#allocation2 + $0x84] sm:$0x1] }
 0x1f3   : > { %1955 = vst [vmem:[#allocation2 + $0x48] sm:$0xf] %v1954_v47  ;;  %v1495_v47 = vsel %vm4473_vm14, 0, %v1494_v0 }
 0x1f4   : > { %v1690_v35 = vshrl.u32 %v1573_v43, 16  ;;  %v1693_v1 = vshll.u32 %v1573_v43, 16  ;;  %1496 = vst [vmem:[#allocation2 + $0x84] sm:$0x1] %v1495_v47 }
 0x1f6   : > { %v1692_v5 = vrot.slane %v1690_v35, 7  ;;  %v1305_v32 = vpop.f32.mrf.mxu0 }
 0x1f7   : > { %vm1367_vm6 = vcmp.ge.f32.partialorder %v1305_v32, 0.0  ;;  %v1399_v2 = vmul.f32 0.01, %v1305_v32 }
 0x1f8   : > { %v1695_v56 = vor.u32 %v1693_v1, %v1692_v5  ;;  %v1697_v19 = vrot.slane %v1692_v5, 4 }
 0x1f9   : > { %v1431_v11 = vsel %vm1367_vm6, %v1305_v32, %v1399_v2 }
 0x1fa   : > { %v1696_v27 = vsel %vm4555_vm15, %v1688_v29, %v1695_v56  ;;  %v1958_v52 = vsel %vm4473_vm14, %v1697_v19, %v1957_v63  ;;  %v1574_v36 = vpack.c.bf16 %v1431_v11, %v1431_v11  ;;  %v1315_v12 = vpop.f32.mrf.mxu2 }
 0x1fb   : > { %1956 = vst.msk [vmem:[#allocation2 + $0x4c] sm:$0xf] %vm1451_vm0, %v1696_v27  ;;  %vm1371_vm12 = vcmp.ge.f32.partialorder %v1315_v12, 0.0  ;;  %v1403_v16 = vmul.f32 0.01, %v1315_v12 }
 0x1fc   : > { %1959 = vst [vmem:[#allocation2 + $0x50] sm:$0x1] %v1958_v52  ;;  %v1699_v48 = vshrl.u32 %v1574_v36, 16  ;;  %v1702_v61 = vshll.u32 %v1574_v36, 16  ;;  %v1544_v52 = vld [vmem:[#allocation2 + $0x8c] sm:$0x1] }
 0x1fd   : > { %v1435_v55 = vsel %vm1371_vm12, %v1315_v12, %v1403_v16  ;;  %v1545_v36 = vsel %vm4482_vm2, 0, %v1544_v52 }
 0x1fe   : > { %v1701_v33 = vrot.slane %v1699_v48, 7  ;;  %v1578_v30 = vpack.c.bf16 %v1435_v55, %v1435_v55  ;;  %v1307_v9 = vpop.f32.mrf.mxu0  ;;  %1546 = vst [vmem:[#allocation2 + $0x8c] sm:$0x1] %v1545_v36 }
 0x1ff   : > { %vm1368_vm13 = vcmp.ge.f32.partialorder %v1307_v9, 0.0  ;;  %v1400_v34 = vmul.f32 0.01, %v1307_v9 }
 0x200   : > { %v1704_v53 = vor.u32 %v1702_v61, %v1701_v33  ;;  %v1733_v6 = vshrl.u32 %v1578_v30, 16  ;;  %v1736_v62 = vshll.u32 %v1578_v30, 16  ;;  %v1705_v43 = vrot.slane %v1701_v33, 4 }
 0x201   : > { %v1432_v54 = vsel %vm1368_vm13, %v1307_v9, %v1400_v34  ;;  %v1967_v9 = vld [vmem:[#allocation2 + $0x60] sm:$0xf] }
 0x202   : > { %v1961_v51 = vsel %vm4534_vm1, %v1704_v53, %v1960_v15  ;;  %v1735_v3 = vrot.slane %v1733_v6, 7  ;;  %v1575_v45 = vpack.c.bf16 %v1432_v54, %v1432_v54  ;;  %v1317_v26 = vpop.f32.mrf.mxu2  ;;  %v1497_v6 = vld [vmem:[#allocation2 + $0x90] sm:$0x1] }
 0x203   : > { %1962 = vst [vmem:[#allocation2 + $0x54] sm:$0xf] %v1961_v51  ;;  %vm1372_vm7 = vcmp.ge.f32.partialorder %v1317_v26, 0.0  ;;  %v1404_v38 = vmul.f32 0.01, %v1317_v26 }
 0x204   : > { %v1738_v44 = vor.u32 %v1736_v62, %v1735_v3  ;;  %v1707_v60 = vshrl.u32 %v1575_v45, 16  ;;  %v1710_v13 = vshll.u32 %v1575_v45, 16  ;;  %v1739_v29 = vrot.slane %v1735_v3, 4 }
 0x205   : > { %v1436_v4 = vsel %vm1372_vm7, %v1317_v26, %v1404_v38  ;;  %v1498_v3 = vsel %vm4473_vm14, 0, %v1497_v6  ;;  %vm5671_vm7 = vsmask.f32 7424  ;;  %v1500_v6 = vld [vmem:[#allocation2 + $0x9c] sm:$0x1] }
 0x206   : > { %v1975_v50 = vsel %vm4534_vm1, %v1738_v44, %v1974_v22  ;;  %v1709_v7 = vrot.slane %v1707_v60, 7  ;;  %v1579_v14 = vpack.c.bf16 %v1436_v4, %v1436_v4  ;;  %1499 = vst [vmem:[#allocation2 + $0x90] sm:$0x1] %v1498_v3 }
 0x207   : > { %1976 = vst [vmem:[#allocation2 + $0x6c] sm:$0xf] %v1975_v50 }
 0x208   : > { %v1712_v35 = vor.u32 %v1710_v13, %v1709_v7  ;;  %v1714_v5 = vrot.slane %v1709_v7, 4  ;;  %v1741_v1 = vshrl.u32 %v1579_v14, 16  ;;  %v1744_v2 = vshll.u32 %v1579_v14, 16  ;;  %v1981_v13 = vld [vmem:[#allocation2 + $0x78] sm:$0xf] }
 0x20a   : > { %v1713_v32 = vsel %vm4555_vm15, %v1705_v43, %v1712_v35  ;;  %v1965_v41 = vsel %vm4473_vm14, %v1714_v5, %v1964_v40  ;;  %v1743_v63 = vrot.slane %v1741_v1, 7 }
 0x20b   : > { %1963 = vst.msk [vmem:[#allocation2 + $0x58] sm:$0xf] %vm1451_vm0, %v1713_v32 }
 0x20c   : > { %1966 = vst [vmem:[#allocation2 + $0x5c] sm:$0x1] %v1965_v41  ;;  %v1746_v56 = vor.u32 %v1744_v2, %v1743_v63  ;;  %v1748_v19 = vrot.slane %v1743_v63, 4  ;;  %v1971_v63 = vld [vmem:[#allocation2 + $0x68] sm:$0x1] }
 0x20d   : > { %v1310_v20 = vpop.f32.mrf.mxu0 }
 0x20e   : > { %v1747_v11 = vsel %vm4555_vm15, %v1739_v29, %v1746_v56  ;;  %v1979_v21 = vsel %vm4473_vm14, %v1748_v19, %v1978_v49  ;;  %vm1369_vm4 = vcmp.ge.f32.partialorder %v1310_v20, 0.0  ;;  %v1401_v27 = vmul.f32 0.01, %v1310_v20  ;;  %v1547_v56 = vld [vmem:[#allocation2 + $0x98] sm:$0x1] }
 0x20f   : > { %1977 = vst.msk [vmem:[#allocation2 + $0x70] sm:$0xf] %vm1451_vm0, %v1747_v11 }
 0x210   : > { %1980 = vst [vmem:[#allocation2 + $0x74] sm:$0x1] %v1979_v21  ;;  %v1433_v12 = vsel %vm1369_vm4, %v1310_v20, %v1401_v27  ;;  %v1548_v21 = vsel %vm4482_vm2, 0, %v1547_v56 }
 0x211   : > { %v1576_v16 = vpack.c.bf16 %v1433_v12, %v1433_v12  ;;  %1549 = vst [vmem:[#allocation2 + $0x98] sm:$0x1] %v1548_v21 }
 0x212   : > { %v1320_v48 = vpop.f32.mrf.mxu2 }
 0x213   : > { %v1716_v55 = vshrl.u32 %v1576_v16, 16  ;;  %vm1373_vm6 = vcmp.ge.f32.partialorder %v1320_v48, 0.0  ;;  %v1405_v33 = vmul.f32 0.01, %v1320_v48  ;;  %v1719_v30 = vshll.u32 %v1576_v16, 16 }
 0x215   : > { %v1718_v61 = vrot.slane %v1716_v55, 7  ;;  %v1437_v31 = vsel %vm1373_vm6, %v1320_v48, %v1405_v33  ;;  %v1312_v15 = vpop.f32.mrf.mxu0  ;;  %v1985_v33 = vld [vmem:[#allocation2 + $0x80] sm:$0x1] }
 0x216   : > { %v1580_v34 = vpack.c.bf16 %v1437_v31, %v1437_v31  ;;  %vm1370_vm12 = vcmp.ge.f32.partialorder %v1312_v15, 0.0  ;;  %v1402_v59 = vmul.f32 0.01, %v1312_v15  ;;  %v4747_v53 = vld [vmem:[#allocation2 + $0x6c] sm:$0xff] }
 0x217   : > { %v1721_v54 = vor.u32 %v1719_v30, %v1718_v61  ;;  %v2059_v51 = vld [vmem:[#allocation2 + $0x74] sm:$0x1]  ;;  %v2323_v44 = vshll.u32 %v4747_v53, 16  ;;  %v2321_v47 = vshrl.u32 %v4747_v53, 16  ;;  %v1722_v19 = vrot.slane %v1718_v61, 4 }
 0x218   : > { %v1750_v62 = vshrl.u32 %v1580_v34, 16  ;;  %v1434_v22 = vsel %vm1370_vm12, %v1312_v15, %v1402_v59  ;;  %v2189_v45 = vunpack.c.l.b16 %v2059_v51  ;;  %v1753_v4 = vshll.u32 %v1580_v34, 16 }
 0x219   : > { %v1968_v26 = vsel %vm4534_vm1, %v1721_v54, %v1967_v9  ;;  %v1577_v38 = vpack.c.bf16 %v1434_v22, %v1434_v22  ;;  %v2325_v43 = vrot.slane %v2323_v44, 1  ;;  %v1501_v51 = vsel %vm4473_vm14, 0, %v1500_v6 }
 0x21a   : > { %1969 = vst [vmem:[#allocation2 + $0x60] sm:$0xf] %v1968_v26  ;;  %v1752_v60 = vrot.slane %v1750_v62, 7  ;;  %v1322_v50 = vpop.f32.mrf.mxu2  ;;  %v4754_v7 = vpack.c.b16 %v2189_v45, %v2189_v45  ;;  %v1988_v26 = vld [vmem:[#allocation2 + $0x84] sm:$0xf] }
 0x21b   : > { %v1724_v14 = vshrl.u32 %v1577_v38, 16  ;;  %vm1374_vm13 = vcmp.ge.f32.partialorder %v1322_v50, 0.0  ;;  %v1406_v0 = vmul.f32 0.01, %v1322_v50  ;;  %v1727_v1 = vshll.u32 %v1577_v38, 16 }
 0x21c   : > { %v1755_v40 = vor.u32 %v1753_v4, %v1752_v60  ;;  %v2328_v35 = vshll.u32 %v4754_v7, 16  ;;  %v2326_v49 = vor.u32 %v2325_v43, %v2321_v47  ;;  %v1756_v55 = vrot.slane %v1752_v60, 4  ;;  %1502 = vst [vmem:[#allocation2 + $0x9c] sm:$0x1] %v1501_v51 }
 0x21d   : > { %v1726_v5 = vrot.slane %v1724_v14, 7  ;;  %v1438_v32 = vsel %vm1374_vm13, %v1322_v50, %v1406_v0  ;;  %v1550_v50 = vld [vmem:[#allocation2 + $0xa4] sm:$0x1]  ;;  %vm5672_vm13 = vmmov %vm5671_vm7 }
 0x21e   : > { %v1982_v41 = vsel %vm4534_vm1, %v1755_v40, %v1981_v13  ;;  %v1581_v2 = vpack.c.bf16 %v1438_v32, %v1438_v32  ;;  %v2330_v29 = vrot.slane %v2328_v35, 1  ;;  %v1551_v40 = vsel %vm4482_vm2, 0, %v1550_v50 }
 0x21f   : > { %1983 = vst [vmem:[#allocation2 + $0x78] sm:$0xf] %v1982_v41  ;;  %v1729_v20 = vor.u32 %v1727_v1, %v1726_v5  ;;  %v1731_v11 = vrot.slane %v1726_v5, 4 }
 0x220   : > { %v1758_v27 = vshrl.u32 %v1581_v2, 16  ;;  %v4763_v52 = vsel %vm5671_vm7, %v2326_v49, %v2330_v29  ;;  %v1761_v48 = vshll.u32 %v1581_v2, 16  ;;  %1552 = vst [vmem:[#allocation2 + $0xa4] sm:$0x1] %v1551_v40  ;;  %v1992_v49 = vld [vmem:[#allocation2 + $0x8c] sm:$0x1] }
 0x221   : > { %v1730_v36 = vsel %vm4555_vm15, %v1722_v19, %v1729_v20  ;;  %v1972_v12 = vsel %vm4473_vm14, %v1731_v11, %v1971_v63  ;;  %2422 = vrot.lane.b32.xlu2 %v4763_v52, %s3676_s21 }
 0x222   : > { %1970 = vst.msk [vmem:[#allocation2 + $0x64] sm:$0xf] %vm1451_vm0, %v1730_v36  ;;  %v1760_v16 = vrot.slane %v1758_v27, 7 }
 0x223   : > { %1973 = vst [vmem:[#allocation2 + $0x68] sm:$0x1] %v1972_v12  ;;  %v1325_v61 = vpop.f32.mrf.mxu2  ;;  %v1503_v12 = vld [vmem:[#allocation2 + $0xa8] sm:$0x1] }
 0x224   : > { %v1763_v30 = vor.u32 %v1761_v48, %v1760_v16  ;;  %v1765_v9 = vrot.slane %v1760_v16, 4  ;;  %vm1375_vm4 = vcmp.ge.f32.partialorder %v1325_v61, 0.0  ;;  %v1407_v31 = vmul.f32 0.01, %v1325_v61 }
 0x226   : > { %v1764_v15 = vsel %vm4555_vm15, %v1756_v55, %v1763_v30  ;;  %v1986_v34 = vsel %vm4473_vm14, %v1765_v9, %v1985_v33  ;;  %v1439_v59 = vsel %vm1375_vm4, %v1325_v61, %v1407_v31  ;;  %v1504_v33 = vsel %vm4473_vm14, 0, %v1503_v12 }
 0x227   : > { %1984 = vst.msk [vmem:[#allocation2 + $0x7c] sm:$0xf] %vm1451_vm0, %v1764_v15  ;;  %v1582_v54 = vpack.c.bf16 %v1439_v59, %v1439_v59  ;;  %v1995_v59 = vld [vmem:[#allocation2 + $0x90] sm:$0xf] }
 0x228   : > { %1987 = vst [vmem:[#allocation2 + $0x80] sm:$0x1] %v1986_v34  ;;  %v2047_v34 = vld [vmem:[#allocation2 + $0x44] sm:$0x1] }
 0x229   : > { %v1767_v3 = vshrl.u32 %v1582_v54, 16  ;;  %v1770_v22 = vshll.u32 %v1582_v54, 16  ;;  %1505 = vst [vmem:[#allocation2 + $0xa8] sm:$0x1] %v1504_v33 }
 0x22b   : > { %v1769_v62 = vrot.slane %v1767_v3, 7  ;;  %v1327_v45 = vpop.f32.mrf.mxu2  ;;  %v4802_v3 = vld [vmem:[#allocation2 + $0x3c] sm:$0xff] }
 0x22c   : > { %vm1376_vm6 = vcmp.ge.f32.partialorder %v1327_v45, 0.0  ;;  %v1408_v38 = vmul.f32 0.01, %v1327_v45 }
 0x22d   : > { %v1772_v44 = vor.u32 %v1770_v22, %v1769_v62  ;;  %v1773_v20 = vrot.slane %v1769_v62, 4 }
 0x22e   : > { %v1440_v60 = vsel %vm1376_vm6, %v1327_v45, %v1408_v38  ;;  %v4779_v4 = vld [vmem:[#allocation2 + $0x78] sm:$0xff]  ;;  %v1553_v38 = vld [vmem:[#allocation2 + $0xb0] sm:$0x1]  ;;  %vm5673_vm6 = vmmov %vm5672_vm13 }
 0x22f   : > { %v1989_v13 = vsel %vm4534_vm1, %v1772_v44, %v1988_v26  ;;  %v1583_v14 = vpack.c.bf16 %v1440_v60, %v1440_v60  ;;  %v2062_v0 = vld [vmem:[#allocation2 + $0x80] sm:$0x1]  ;;  %v2335_v43 = vshll.u32 %v4779_v4, 16  ;;  %v2333_v1 = vshrl.u32 %v4779_v4, 16 }
 0x230   : > { %1990 = vst [vmem:[#allocation2 + $0x84] sm:$0xf] %v1989_v13  ;;  %v2190_v47 = vunpack.c.l.b16 %v2062_v0  ;;  %v2185_v26 = vunpack.c.l.b16 %v2047_v34  ;;  %v1554_v60 = vsel %vm4482_vm2, 0, %v1553_v38  ;;  %v2275_v0 = vshll.u32 %v4802_v3, 16 }
 0x231   : > { %v1775_v35 = vshrl.u32 %v1583_v14, 16  ;;  %v2337_v32 = vrot.slane %v2335_v43, 1  ;;  %v1778_v63 = vshll.u32 %v1583_v14, 16  ;;  %1555 = vst [vmem:[#allocation2 + $0xb0] sm:$0x1] %v1554_v60 }
 0x232   : > { %v4786_v5 = vpack.c.b16 %v2190_v47, %v2190_v47  ;;  %v1999_v43 = vld [vmem:[#allocation2 + $0x98] sm:$0x1] }
 0x233   : > { %v1777_v41 = vrot.slane %v1775_v35, 7  ;;  %v1330_v2 = vpop.f32.mrf.mxu2  ;;  %v2338_v56 = vor.u32 %v2337_v32, %v2333_v1  ;;  %v4814_v32 = vpack.c.b16 %v2185_v26, %v2185_v26 }
 0x234   : > { %vm1377_vm12 = vcmp.ge.f32.partialorder %v1330_v2, 0.0  ;;  %v1409_v29 = vmul.f32 0.01, %v1330_v2  ;;  %v2340_v19 = vshll.u32 %v4786_v5, 16 }
 0x235   : > { %v1780_v11 = vor.u32 %v1778_v63, %v1777_v41  ;;  %v1782_v21 = vrot.slane %v1777_v41, 4 }
 0x236   : > { %v1441_v27 = vsel %vm1377_vm12, %v1330_v2, %v1409_v29  ;;  %v2342_v36 = vrot.slane %v2340_v19, 1 }
 0x237   : > { %v1781_v16 = vsel %vm4555_vm15, %v1773_v20, %v1780_v11  ;;  %v1993_v48 = vsel %vm4473_vm14, %v1782_v21, %v1992_v49  ;;  %v1584_v55 = vpack.c.bf16 %v1441_v27, %v1441_v27 }
 0x238   : > { %1991 = vst.msk [vmem:[#allocation2 + $0x88] sm:$0xf] %vm1451_vm0, %v1781_v16  ;;  %v4798_v61 = vsel %vm5672_vm13, %v2338_v56, %v2342_v36  ;;  %v1506_v16 = vld [vmem:[#allocation2 + $0xb4] sm:$0x1]  ;;  %vm5674_vm13 = vmmov %vm5673_vm6 }
 0x239   : > { %1994 = vst [vmem:[#allocation2 + $0x8c] sm:$0x1] %v1993_v48  ;;  %v1784_v30 = vshrl.u32 %v1584_v55, 16  ;;  %2424 = vrot.lane.b32.xlu0 %v4798_v61, %s3676_s21  ;;  %v1787_v31 = vshll.u32 %v1584_v55, 16  ;;  %v1507_v48 = vsel %vm4473_vm14, 0, %v1506_v16  ;;  %v4849_v16 = vld [vmem:[#allocation2 + $0xc] sm:$0xff] }
 0x23a   : > { %1508 = vst [vmem:[#allocation2 + $0xb4] sm:$0x1] %v1507_v48  ;;  %v2439_v48 = vrot.slane %v4849_v16, 1 }
 0x23b   : > { %v1786_v9 = vrot.slane %v1784_v30, 7  ;;  %v1332_v15 = vpop.f32.mrf.mxu2  ;;  %v2277_v30 = vrot.slane %v2275_v0, 1 }
 0x23c   : > { %vm1378_vm7 = vcmp.ge.f32.partialorder %v1332_v15, 0.0  ;;  %v1410_v6 = vmul.f32 0.01, %v1332_v15 }
 0x23d   : > { %v1789_v54 = vor.u32 %v1787_v31, %v1786_v9  ;;  %v1790_v49 = vrot.slane %v1786_v9, 4  ;;  %v2280_v9 = vshll.u32 %v4814_v32, 16 }
 0x23e   : > { %v1442_v51 = vsel %vm1378_vm7, %v1332_v15, %v1410_v6  ;;  %v2002_v6 = vld [vmem:[#allocation2 + $0x9c] sm:$0xf] }
 0x23f   : > { %v1996_v62 = vsel %vm4534_vm1, %v1789_v54, %v1995_v59  ;;  %v1585_v22 = vpack.c.bf16 %v1442_v51, %v1442_v51  ;;  %v4806_v45 = vld [vmem:[#allocation2 + $0x84] sm:$0xff]  ;;  %v2273_v59 = vshrl.u32 %v4802_v3, 16 }
 0x240   : > { %1997 = vst [vmem:[#allocation2 + $0x90] sm:$0xf] %v1996_v62  ;;  %v2065_v44 = vld [vmem:[#allocation2 + $0x8c] sm:$0x1]  ;;  %v2347_v14 = vshll.u32 %v4806_v45, 16  ;;  %v2345_v63 = vshrl.u32 %v4806_v45, 16 }
 0x241   : > { %v1792_v50 = vshrl.u32 %v1585_v22, 16  ;;  %v2191_v13 = vunpack.c.l.b16 %v2065_v44  ;;  %v1795_v47 = vshll.u32 %v1585_v22, 16  ;;  %v2278_v62 = vor.u32 %v2277_v30, %v2273_v59  ;;  %v4852_v30 = vld [vmem:[#allocation2 + $0x48] sm:$0xff] }
 0x242   : > { %v2349_v2 = vrot.slane %v2347_v14, 1  ;;  %v2282_v22 = vrot.slane %v2280_v9, 1 }
 0x243   : > { %v1794_v40 = vrot.slane %v1792_v50, 7  ;;  %v1335_v35 = vpop.f32.mrf.mxu2  ;;  %v4812_v1 = vpack.c.b16 %v2191_v13, %v2191_v13  ;;  %v1556_v50 = vld [vmem:[#allocation2 + $0xbc] sm:$0x1] }
 0x244   : > { %vm1379_vm4 = vcmp.ge.f32.partialorder %v1335_v35, 0.0  ;;  %v1411_v41 = vmul.f32 0.01, %v1335_v35  ;;  %v2350_v11 = vor.u32 %v2349_v2, %v2345_v63  ;;  %v1557_v14 = vsel %vm4482_vm2, 0, %v1556_v50  ;;  %v2006_v2 = vld [vmem:[#allocation2 + $0xa4] sm:$0x1] }
 0x245   : > { %v1797_v29 = vor.u32 %v1795_v47, %v1794_v40  ;;  %v1799_v56 = vrot.slane %v1794_v40, 4  ;;  %v2352_v19 = vshll.u32 %v4812_v1, 16  ;;  %v4839_v40 = vsel %vm5674_vm13, %v2278_v62, %v2282_v22  ;;  %1558 = vst [vmem:[#allocation2 + $0xbc] sm:$0x1] %v1557_v14  ;;  %v2009_v14 = vld [vmem:[#allocation2 + $0xa8] sm:$0xf] }
 0x246   : > { %v1443_v20 = vsel %vm1379_vm4, %v1335_v35, %v1411_v41  ;;  %vm5675_vm4 = vcmask 1046528  }
 0x247   : > { %v1798_v21 = vsel %vm4555_vm15, %v1790_v49, %v1797_v29  ;;  %v2000_v27 = vsel %vm4473_vm14, %v1799_v56, %v1999_v43  ;;  %v1586_v36 = vpack.c.bf16 %v1443_v20, %v1443_v20  ;;  %v2354_v12 = vrot.slane %v2352_v19, 1  ;;  %v2050_v56 = vld [vmem:[#allocation2 + $0x50] sm:$0x1]  ;;  %vm5676_vm13 = vmmov %vm5675_vm4 }
 0x248   : > { %1998 = vst.msk [vmem:[#allocation2 + $0x94] sm:$0xf] %vm1451_vm0, %v1798_v21  ;;  %v2440_v43 = vrot.slane %v4590_v17, 1  ;;  %v2186_v9 = vunpack.c.l.b16 %v2050_v56 }
 0x249   : > { %2001 = vst [vmem:[#allocation2 + $0x98] sm:$0x1] %v2000_v27  ;;  %v1801_v55 = vshrl.u32 %v1586_v36, 16  ;;  %v4826_v33 = vsel %vm5673_vm6, %v2350_v11, %v2354_v12  ;;  %v1804_v15 = vshll.u32 %v1586_v36, 16 }
 0x24a   : > { %2426 = vrot.lane.b32.xlu1 %v4826_v33, %s3676_s21  ;;  %v4862_v62 = vsel %vm5675_vm4, %v2439_v48, %v2440_v43  ;;  %v2449_v43 = vrot.slane %v4694_v24, 1 }
 0x24b   : > { %v1803_v31 = vrot.slane %v1801_v55, 7  ;;  %v1337_v34 = vpop.f32.mrf.mxu2 }
 0x24c   : > { %vm1380_vm12 = vcmp.ge.f32.partialorder %v1337_v34, 0.0  ;;  %v1412_v54 = vmul.f32 0.01, %v1337_v34 }
 0x24d   : > { %v1806_v51 = vor.u32 %v1804_v15, %v1803_v31  ;;  %v1807_v21 = vrot.slane %v1803_v31, 4 }
 0x24e   : > { %v1444_v26 = vsel %vm1380_vm12, %v1337_v34, %v1412_v54 }
 0x24f   : > { %v2003_v38 = vsel %vm4534_vm1, %v1806_v51, %v2002_v6  ;;  %v1587_v44 = vpack.c.bf16 %v1444_v26, %v1444_v26  ;;  %v4834_v60 = vld [vmem:[#allocation2 + $0x90] sm:$0xff]  ;;  %v1509_v6 = vld [vmem:[#allocation2 + $0xc0] sm:$0x1]  ;;  %v2287_v26 = vshll.u32 %v4852_v30, 16 }
 0x250   : > { %2004 = vst [vmem:[#allocation2 + $0x9c] sm:$0xf] %v2003_v38  ;;  %v2068_v13 = vld [vmem:[#allocation2 + $0x98] sm:$0x1]  ;;  %v2359_v35 = vshll.u32 %v4834_v60, 16  ;;  %v2357_v20 = vshrl.u32 %v4834_v60, 16 }
 0x251   : > { %v1809_v0 = vshrl.u32 %v1587_v44, 16  ;;  %v2192_v47 = vunpack.c.l.b16 %v2068_v13  ;;  %v1812_v63 = vshll.u32 %v1587_v44, 16  ;;  %v1510_v54 = vsel %vm4473_vm14, 0, %v1509_v6 }
 0x252   : > { %2414 = vrot.lane.b32.xlu1 %v4839_v40, %s3676_s21  ;;  %v2361_v11 = vrot.slane %v2359_v35, 1  ;;  %1511 = vst [vmem:[#allocation2 + $0xc0] sm:$0x1] %v1510_v54  ;;  %v4872_v13 = vpack.c.b16 %v2186_v9, %v2186_v9  ;;  %v2443_v35 = vrot.slane %v4625_v58, 1  ;;  %v2285_v58 = vshrl.u32 %v4852_v30, 16 }
 0x253   : > { %v1811_v41 = vrot.slane %v1809_v0, 7  ;;  %v1340_v49 = vpop.f32.mrf.mxu2  ;;  %v4845_v29 = vpack.c.b16 %v2192_v47, %v2192_v47 }
 0x254   : > { %vm1381_vm7 = vcmp.ge.f32.partialorder %v1340_v49, 0.0  ;;  %v1413_v19 = vmul.f32 0.01, %v1340_v49  ;;  %v2362_v55 = vor.u32 %v2361_v11, %v2357_v20  ;;  %v2448_v20 = vrot.slane %v4688_v57, 1 }
 0x255   : > { %v1814_v27 = vor.u32 %v1812_v63, %v1811_v41  ;;  %v1816_v36 = vrot.slane %v1811_v41, 4  ;;  %v2364_v17 = vshll.u32 %v4845_v29, 16  ;;  %v4876_v63 = vld [vmem:[#allocation2 + $0x18] sm:$0xff]  ;;  %v2292_v11 = vshll.u32 %v4872_v13, 16 }
 0x256   : > { %v1445_v12 = vsel %vm1381_vm7, %v1340_v49, %v1413_v19  ;;  %v2289_v49 = vrot.slane %v2287_v26, 1  ;;  %vm5677_vm7 = vmmov %vm5675_vm4 }
 0x257   : > { %v1815_v15 = vsel %vm4555_vm15, %v1807_v21, %v1814_v27  ;;  %v2007_v34 = vsel %vm4473_vm14, %v1816_v36, %v2006_v2  ;;  %v1588_v31 = vpack.c.bf16 %v1445_v12, %v1445_v12  ;;  %v2366_v59 = vrot.slane %v2364_v17, 1  ;;  %v1559_v27 = vld [vmem:[#allocation2 + $0xc8] sm:$0x1]  ;;  %vm5678_vm4 = vmmov %vm5673_vm6 }
 0x258   : > { %2005 = vst.msk [vmem:[#allocation2 + $0xa0] sm:$0xf] %vm1451_vm0, %v1815_v15  ;;  %v2442_v2 = vrot.slane %v4876_v63, 1  ;;  %v1560_v36 = vsel %vm4482_vm2, 0, %v1559_v27  ;;  %v4889_v12 = vsel %vm5676_vm13, %v2448_v20, %v2449_v43  ;;  %vm5680_vm13 = vmmov %vm5677_vm7 }
 0x259   : > { %2008 = vst [vmem:[#allocation2 + $0xa4] sm:$0x1] %v2007_v34  ;;  %v1818_v51 = vshrl.u32 %v1588_v31, 16  ;;  %v4865_v22 = vsel %vm5673_vm6, %v2362_v55, %v2366_v59  ;;  %v1821_v44 = vshll.u32 %v1588_v31, 16  ;;  %v2290_v55 = vor.u32 %v2289_v49, %v2285_v58  ;;  %v2013_v34 = vld [vmem:[#allocation2 + $0xb0] sm:$0x1]  ;;  %vm5679_vm6 = vmmov %vm5678_vm4 }
 0x25a   : > { %2486 = vrot.lane.b32.xlu1 %v4862_v62, %s3677_s22  ;;  %2428 = vrot.lane.b32.xlu2 %v4865_v22, %s3676_s21  ;;  %v4892_v48 = vsel %vm5677_vm7, %v2442_v2, %v2443_v35  ;;  %1561 = vst [vmem:[#allocation2 + $0xc8] sm:$0x1] %v1560_v36  ;;  %v2294_v59 = vrot.slane %v2292_v11, 1  ;;  %v4918_v58 = vld [vmem:[#allocation2] sm:$0xff]  ;;  %v2437_v36 = vrot.slane %v4575_v37, 1 }
 0x25b   : > { %v1820_v38 = vrot.slane %v1818_v51, 7  ;;  %v1342_v50 = vpop.f32.mrf.mxu2 }
 0x25c   : > { %vm1382_vm12 = vcmp.ge.f32.partialorder %v1342_v50, 0.0  ;;  %v1414_v0 = vmul.f32 0.01, %v1342_v50 }
 0x25d   : > { %v1823_v47 = vor.u32 %v1821_v44, %v1820_v38  ;;  %v1824_v44 = vrot.slane %v1820_v38, 4  ;;  %v4909_v38 = vsel %vm5678_vm4, %v2290_v55, %v2294_v59  ;;  %vm5681_vm4 = vmmov %vm5677_vm7 }
 0x25e   : > { %v1446_v41 = vsel %vm1382_vm12, %v1342_v50, %v1414_v0 }
 0x25f   : > { %v2010_v56 = vsel %vm4534_vm1, %v1823_v47, %v2009_v14  ;;  %v1589_v19 = vpack.c.bf16 %v1446_v41, %v1446_v41  ;;  %v4883_v21 = vld [vmem:[#allocation2 + $0x9c] sm:$0xff] }
 0x260   : > { %2011 = vst [vmem:[#allocation2 + $0xa8] sm:$0xf] %v2010_v56  ;;  %v2071_v24 = vld [vmem:[#allocation2 + $0xa4] sm:$0x1]  ;;  %v2371_v9 = vshll.u32 %v4883_v21, 16  ;;  %v2369_v51 = vshrl.u32 %v4883_v21, 16 }
 0x261   : > { %v1826_v17 = vshrl.u32 %v1589_v19, 16  ;;  %v2193_v57 = vunpack.c.l.b16 %v2071_v24  ;;  %v1829_v15 = vshll.u32 %v1589_v19, 16  ;;  %v2436_v24 = vrot.slane %v4918_v58, 1 }
 0x262   : > { %2492 = vrot.lane.b32.xlu1 %v4889_v12, %s3677_s22  ;;  %2488 = vrot.lane.b32.xlu2 %v4892_v48, %s3677_s22  ;;  %v2373_v26 = vrot.slane %v2371_v9, 1 }
 0x263   : > { %v1828_v18 = vrot.slane %v1826_v17, 7  ;;  %v1345_v31 = vpop.f32.mrf.mxu2  ;;  %v4899_v6 = vpack.c.b16 %v2193_v57, %v2193_v57  ;;  %v2053_v17 = vld [vmem:[#allocation2 + $0x5c] sm:$0x1]  ;;  %v2016_v57 = vld [vmem:[#allocation2 + $0xb4] sm:$0xf] }
 0x264   : > { %vm1383_vm2 = vcmp.ge.f32.partialorder %v1345_v31, 0.0  ;;  %v1415_v54 = vmul.f32 0.01, %v1345_v31  ;;  %v2374_v43 = vor.u32 %v2373_v26, %v2369_v51  ;;  %v2451_v51 = vrot.slane %v4802_v3, 1 }
 0x265   : > { %v1831_v50 = vor.u32 %v1829_v15, %v1828_v18  ;;  %v1833_v14 = vrot.slane %v1828_v18, 4  ;;  %v2376_v0 = vshll.u32 %v4899_v6, 16  ;;  %v2452_v18 = vrot.slane %v4814_v32, 1 }
 0x266   : > { %v1447_v47 = vsel %vm1383_vm2, %v1345_v31, %v1415_v54  ;;  %v2187_v31 = vunpack.c.l.b16 %v2053_v17  ;;  %v2438_v26 = vsel %vm5680_vm13, %v2436_v24, %v2437_v36 }
 0x267   : > { %v1832_v35 = vsel %vm4555_vm15, %v1824_v44, %v1831_v50  ;;  %v2014_v41 = vsel %vm4473_vm14, %v1833_v14, %v2013_v34  ;;  %v1590_v2 = vpack.c.bf16 %v1447_v47, %v1447_v47  ;;  %v2378_v49 = vrot.slane %v2376_v0, 1  ;;  %v4923_v34 = vld [vmem:[#allocation2 + $0x54] sm:$0xff] }
 0x268   : > { %2012 = vst.msk [vmem:[#allocation2 + $0xac] sm:$0xf] %vm1451_vm0, %v1832_v35  ;;  %v4932_v14 = vsel %vm5677_vm7, %v2451_v51, %v2452_v18  ;;  %v2446_v0 = vrot.slane %v4657_v42, 1  ;;  %v2299_v35 = vshll.u32 %v4923_v34, 16 }
 0x269   : > { %2015 = vst [vmem:[#allocation2 + $0xb0] sm:$0x1] %v2014_v41  ;;  %v1835_v56 = vshrl.u32 %v1590_v2, 16  ;;  %v4912_v19 = vsel %vm5679_vm6, %v2374_v43, %v2378_v49  ;;  %v1838_v11 = vshll.u32 %v1590_v2, 16  ;;  %v2203_v43 = vpack.c.b16 %v2187_v31, %v2187_v31  ;;  %v2020_v49 = vld [vmem:[#allocation2 + $0xbc] sm:$0x1]  ;;  %vm5682_vm6 = vmmov %vm5681_vm4 }
 0x26a   : > { %2416 = vrot.lane.b32.xlu2 %v4909_v38, %s3676_s21  ;;  %2430 = vrot.lane.b32.xlu0 %v4912_v19, %s3676_s21  ;;  %v4946_v31 = vld [vmem:[#allocation2 + $0x24] sm:$0xff] }
 0x26b   : > { %v1837_v20 = vrot.slane %v1835_v56, 7  ;;  %v1347_v27 = vpop.f32.mrf.mxu2 }
 0x26c   : > { %vm1384_vm12 = vcmp.ge.f32.partialorder %v1347_v27, 0.0  ;;  %v1416_v55 = vmul.f32 0.01, %v1347_v27 }
 0x26d   : > { %v1840_v9 = vor.u32 %v1838_v11, %v1837_v20  ;;  %v2470_v11 = vrot.slane %v4812_v1, 1 }
 0x26e   : > { %v1448_v15 = vsel %vm1384_vm12, %v1347_v27, %v1416_v55  ;;  %vm5683_vm12 = vsmask.f32 7424 }
 0x26f   : > { %v2017_v59 = vsel %vm4534_vm1, %v1840_v9, %v2016_v57  ;;  %v1591_v54 = vpack.c.bf16 %v1448_v15, %v1448_v15  ;;  %v4929_v37 = vld [vmem:[#allocation2 + $0xa8] sm:$0xff]  ;;  %v1841_v57 = vrot.slane %v1837_v20, 4  ;;  %v2469_v15 = vrot.slane %v4806_v45, 1  ;;  %vm5684_vm7 = vmmov %vm5683_vm12 }
 0x270   : > { %2018 = vst [vmem:[#allocation2 + $0xb4] sm:$0xf] %v2017_v59  ;;  %v2074_v44 = vld [vmem:[#allocation2 + $0xb0] sm:$0x1]  ;;  %v2383_v47 = vshll.u32 %v4929_v37, 16  ;;  %v2381_v36 = vshrl.u32 %v4929_v37, 16 }
 0x271   : > { %v1843_v50 = vshrl.u32 %v1591_v54, 16  ;;  %v2194_v32 = vunpack.c.l.b16 %v2074_v44  ;;  %v1846_v2 = vshll.u32 %v1591_v54, 16  ;;  %v2445_v59 = vrot.slane %v4946_v31, 1 }
 0x272   : > { %2494 = vrot.lane.b32.xlu2 %v4932_v14, %s3677_s22  ;;  %2484 = vrot.lane.b32.xlu0 %v2438_v26, %s3677_s22  ;;  %v2385_v17 = vrot.slane %v2383_v47, 1  ;;  %v4958_v47 = vsel %vm5682_vm6, %v2469_v15, %v2470_v11  ;;  %v2023_v11 = vld [vmem:[#allocation2 + $0xc0] sm:$0xf] }
 0x273   : > { %v1845_v41 = vrot.slane %v1843_v50, 7  ;;  %v1350_v56 = vpop.f32.mrf.mxu2  ;;  %v4941_v27 = vpack.c.b16 %v2194_v32, %v2194_v32  ;;  %v4955_v44 = vsel %vm5681_vm4, %v2445_v59, %v2446_v0  ;;  %v2301_v50 = vrot.slane %v2299_v35, 1  ;;  %v2056_v59 = vld [vmem:[#allocation2 + $0x68] sm:$0x1] }
 0x274   : > { %vm1385_vm2 = vcmp.ge.f32.partialorder %v1350_v56, 0.0  ;;  %v1417_v24 = vmul.f32 0.01, %v1350_v56  ;;  %v2386_v1 = vor.u32 %v2385_v17, %v2381_v36  ;;  %v2297_v35 = vshrl.u32 %v4923_v34, 16 }
 0x275   : > { %v1848_v42 = vor.u32 %v1846_v2, %v1845_v41  ;;  %v1850_v55 = vrot.slane %v1845_v41, 4  ;;  %v2388_v9 = vshll.u32 %v4941_v27, 16  ;;  %v2304_v2 = vshll.u32 %v2203_v43, 16 }
 0x276   : > { %v1449_v18 = vsel %vm1385_vm2, %v1350_v56, %v1417_v24  ;;  %v2302_v17 = vor.u32 %v2301_v50, %v2297_v35  ;;  %vm5685_vm2 = vmmov %vm5681_vm4  ;;  %v4984_v50 = vld [vmem:[#allocation2 + $0x60] sm:$0xff]  ;;  %v2027_v35 = vld [vmem:[#allocation2 + $0xc8] sm:$0x1] }
 0x277   : > { %v1849_v54 = vsel %vm4555_vm15, %v1841_v57, %v1848_v42  ;;  %v2021_v51 = vsel %vm4473_vm14, %v1850_v55, %v2020_v49  ;;  %v1592_v26 = vpack.c.bf16 %v1449_v18, %v1449_v18  ;;  %v2390_v20 = vrot.slane %v2388_v9, 1  ;;  %vm5687_vm4 = vmmov %vm5684_vm7 }
 0x278   : > { %2019 = vst.msk [vmem:[#allocation2 + $0xb8] sm:$0xf] %vm1451_vm0, %v1849_v54  ;;  %v2306_v57 = vrot.slane %v2304_v2, 1  ;;  %v2458_v55 = vrot.slane %v2203_v43, 1  ;;  %vm5691_vm6 = vmmov %vm5687_vm4 }
 0x279   : > { %2022 = vst [vmem:[#allocation2 + $0xbc] sm:$0x1] %v2021_v51  ;;  %v1852_v32 = vshrl.u32 %v1592_v26, 16  ;;  %v4961_v41 = vsel %vm5683_vm12, %v2386_v1, %v2390_v20  ;;  %v1855_v56 = vshll.u32 %v1592_v26, 16  ;;  %v2457_v1 = vrot.slane %v4923_v34, 1 }
 0x27a   : > { %2506 = vrot.lane.b32.xlu2 %v4958_v47, %s3677_s22  ;;  %2490 = vrot.lane.b32.xlu0 %v4955_v44, %s3677_s22  ;;  %v4976_v26 = vsel %vm5684_vm7, %v2302_v17, %v2306_v57 }
 0x27b   : > { %v1854_v49 = vrot.slane %v1852_v32, 7  ;;  %2432 = vrot.lane.b32.xlu1 %v4961_v41, %s3676_s21  ;;  %v1352_v0 = vpop.f32.mrf.mxu2  ;;  %v4981_v43 = vsel %vm5685_vm2, %v2457_v1, %v2458_v55  ;;  %v2188_v32 = vunpack.c.l.b16 %v2056_v59  ;;  %v2311_v1 = vshll.u32 %v4984_v50, 16 }
 0x27c   : > { %vm1386_vm13 = vcmp.ge.f32.partialorder %v1352_v0, 0.0  ;;  %v1418_v24 = vmul.f32 0.01, %v1352_v0 }
 0x27d   : > { %v1857_v36 = vor.u32 %v1855_v56, %v1854_v49  ;;  %v1858_v17 = vrot.slane %v1854_v49, 4  ;;  %v2466_v49 = vrot.slane %v4779_v4, 1  ;;  %v2313_v46 = vrot.slane %v2311_v1, 1  ;;  %v2407_v1 = vpop.permute.xlu0 %2406 }
 0x27e   : > { %v1450_v42 = vsel %vm1386_vm13, %v1352_v0, %v1418_v24  ;;  %vm5693_vm13 = vcmask 1041408  }
 0x27f   : > { %v2024_v9 = vsel %vm4534_vm1, %v1857_v36, %v2023_v11  ;;  %v1593_v18 = vpack.c.bf16 %v1450_v42, %v1450_v42  ;;  %v4972_v15 = vld [vmem:[#allocation2 + $0xb4] sm:$0xff]  ;;  %v2455_v11 = vrot.slane %v4872_v13, 1  ;;  %vm5686_vm1 = vmmov %vm5685_vm2  ;;  %vm5695_vm2 = vcmask 97280  }
 0x280   : > { %2025 = vst [vmem:[#allocation2 + $0xc0] sm:$0xf] %v2024_v9  ;;  %v2077_v54 = vld [vmem:[#allocation2 + $0xbc] sm:$0x1]  ;;  %v2395_v28 = vshll.u32 %v4972_v15, 16  ;;  %v2393_v24 = vshrl.u32 %v4972_v15, 16 }
 0x281   : > { %v1860_v51 = vshrl.u32 %v1593_v18, 16  ;;  %v2195_v20 = vunpack.c.l.b16 %v2077_v54  ;;  %v1863_v56 = vshll.u32 %v1593_v18, 16  ;;  %v2467_v9 = vrot.slane %v4786_v5, 1 }
 0x282   : > { %2418 = vrot.lane.b32.xlu0 %v4976_v26, %s3676_s21  ;;  %v2397_v36 = vrot.slane %v2395_v28, 1  ;;  %v2204_v18 = vpack.c.b16 %v2188_v32, %v2188_v32 }
 0x283   : > { %v1862_v2 = vrot.slane %v1860_v51, 7  ;;  %2498 = vrot.lane.b32.xlu1 %v4981_v43, %s3677_s22  ;;  %v4988_v0 = vpack.c.b16 %v2195_v20, %v2195_v20  ;;  %v2454_v51 = vrot.slane %v4852_v30, 1 }
 0x284   : > { %v2398_v59 = vor.u32 %v2397_v36, %v2393_v24  ;;  %v2316_v32 = vshll.u32 %v2204_v18, 16  ;;  %v2463_v36 = vrot.slane %v4747_v53, 1 }
 0x285   : > { %v1865_v57 = vor.u32 %v1863_v56, %v1862_v2  ;;  %v1867_v42 = vrot.slane %v1862_v2, 4  ;;  %v2400_v55 = vshll.u32 %v4988_v0, 16  ;;  %v5003_v5 = vsel %vm5686_vm1, %v2454_v51, %v2455_v11 }
 0x286   : > { %v2309_v2 = vshrl.u32 %v4984_v50, 16  ;;  %v2464_v56 = vrot.slane %v4754_v7, 1  ;;  %v2318_v24 = vrot.slane %v2316_v32, 1  ;;  %v5033_v7 = vpop.permute.xlu2 %2404  ;;  %v2757_v51 = vsel %vm945_vm3, %v4849_v16, %v2407_v1 }
 0x287   : > { %v1866_v54 = vsel %vm4555_vm15, %v1858_v17, %v1865_v57  ;;  %v2028_v13 = vsel %vm4473_vm14, %v1867_v42, %v2027_v35  ;;  %v2402_v20 = vrot.slane %v2400_v55, 1  ;;  %vm5688_vm15 = vmmov %vm5686_vm1  ;;  %v2461_v35 = vrot.slane %v2204_v18, 1 }
 0x288   : > { %2026 = vst.msk [vmem:[#allocation2 + $0xc4] sm:$0xf] %vm1451_vm0, %v1866_v54  ;;  %v2468_v10 = vsel %vm5688_vm15, %v2466_v49, %v2467_v9  ;;  %v2314_v11 = vor.u32 %v2313_v46, %v2309_v2  ;;  %v2460_v17 = vrot.slane %v4984_v50, 1  ;;  %vm5689_vm0 = vmmov %vm5686_vm1  ;;  %vm5696_vm1 = vcmask 130048  }
 0x289   : > { %2029 = vst [vmem:[#allocation2 + $0xc8] sm:$0x1] %v2028_v13  ;;  %v5006_v28 = vsel %vm5687_vm4, %v2398_v59, %v2402_v20  ;;  %v5019_v57 = vsel %vm5689_vm0, %v2463_v36, %v2464_v56  ;;  %vm5690_vm14 = vmmov %vm5689_vm0  ;;  %v5062_v59 = vpop.permute.xlu1 %2408  ;;  %vm5697_vm4 = vcmask 162816  }
 0x28a   : > { %2496 = vrot.lane.b32.xlu0 %v5003_v5, %s3677_s22  ;;  %2434 = vrot.lane.b32.xlu2 %v5006_v28, %s3676_s21  ;;  %v5022_v42 = vsel %vm5690_vm14, %v2460_v17, %v2461_v35  ;;  %v5027_v55 = vsel %vm5691_vm6, %v2314_v11, %v2318_v24  ;;  %v2473_v35 = vrot.slane %v4845_v29, 1  ;;  %v2472_v11 = vrot.slane %v4834_v60, 1  ;;  %vm5692_vm12 = vmmov %vm5689_vm0 }
 0x28b   : > { %2504 = vrot.lane.b32.xlu1 %v2468_v10, %s3677_s22  ;;  %vm5694_vm7 = vmmov %vm5689_vm0 }
 0x28c   : > { %v5119_v24 = vsel %vm5692_vm12, %v2472_v11, %v2473_v35  ;;  %v3625_v35 = vld [vmem:[%s5593_s3] sm:$0xff]  ;;  %vm5698_vm15 = vmmov %vm5695_vm2 }
 0x28d   : > { %vm5699_vm0 = vmmov %vm5696_vm1 }
 0x28e   : > { %v5046_v9 = vpop.permute.xlu2 %2410  ;;  %vm5700_vm14 = vmmov %vm5697_vm4 }
 0x28f   : > { %vm5701_vm6 = vmmov %vm5694_vm7 }
 0x290   : > { %vm5702_vm12 = vmmov %vm5695_vm2 }
 0x292   : > { %2502 = vrot.lane.b32.xlu0 %v5019_v57, %s3677_s22  ;;  %2500 = vrot.lane.b32.xlu2 %v5022_v42, %s3677_s22 }
 0x293   : > { %2420 = vrot.lane.b32.xlu1 %v5027_v55, %s3676_s21 }
 0x29a   : > { %2537 = vrot.lane.b32.xlu0 %v4747_v53, %s3678_s23  ;;  %2619 = vrot.lane.b32.xlu2 %v5019_v57, %s3680_s25  ;;  %v5054_v53 = vpop.permute.xlu2 %2422 }
 0x29b   : > { %2584 = vrot.lane.b32.xlu1 %v4763_v52, %s3681_s26 }
 0x2a2   : > { %2656 = vrot.lane.b32.xlu0 %v4779_v4, %s3679_s24  ;;  %2738 = vrot.lane.b32.xlu2 %v2468_v10, %s3682_s27 }
 0x2a3   : > { %2703 = vrot.lane.b32.xlu1 %v4798_v61, %s3683_s28 }
 0x2aa   : > { %2521 = vrot.lane.b32.xlu0 %v4849_v16, %s3678_s23  ;;  %2603 = vrot.lane.b32.xlu2 %v4862_v62, %s3680_s25 }
 0x2ab   : > { %2568 = vrot.lane.b32.xlu1 %v4606_v25, %s3681_s26 }
 0x2b2   : > { %2640 = vrot.lane.b32.xlu0 %v4876_v63, %s3679_s24  ;;  %2722 = vrot.lane.b32.xlu2 %v4892_v48, %s3682_s27 }
 0x2b3   : > { %2687 = vrot.lane.b32.xlu1 %v4637_v39, %s3683_s28 }
 0x2b4   : > { %v5064_v18 = vpop.permute.xlu2 %2428 }
 0x2ba   : > { %2539 = vrot.lane.b32.xlu0 %v4779_v4, %s3678_s23  ;;  %2621 = vrot.lane.b32.xlu2 %v2468_v10, %s3680_s25 }
 0x2bb   : > { %2586 = vrot.lane.b32.xlu1 %v4798_v61, %s3681_s26  ;;  %v5083_v61 = vpop.permute.xlu0 %2412 }
 0x2bc   : > { %v2427_v25 = vpop.permute.xlu1 %2426  ;;  %v5071_v62 = vpop.permute.xlu2 %2488 }
 0x2bd   : > { %v2777_v16 = vsel %vm945_vm3, %v4806_v45, %v2427_v25  ;;  %v3014_v25 = vld [vmem:[%s5593_s3 + $0x10] sm:$0x3] }
 0x2be   : > { %v3056_v1 = vunpack.c.l.b16 %v3014_v25 }
 0x2c2   : > { %2658 = vrot.lane.b32.xlu0 %v4806_v45, %s3679_s24  ;;  %2740 = vrot.lane.b32.xlu2 %v4958_v47, %s3682_s27 }
 0x2c3   : > { %2705 = vrot.lane.b32.xlu1 %v4826_v33, %s3683_s28 }
 0x2c4   : > { %v2415_v54 = vpop.permute.xlu1 %2414  ;;  %v2417_v13 = vpop.permute.xlu2 %2416 }
 0x2c5   : > { %v2765_v20 = vsel %vm945_vm3, %v4802_v3, %v2415_v54  ;;  %v3059_v54 = vpack.c.b16 %v3056_v1, %v3056_v1  ;;  %v2767_v11 = vsel %vm945_vm3, %v4852_v30, %v2417_v13 }
 0x2ca   : > { %2523 = vrot.lane.b32.xlu0 %v4876_v63, %s3678_s23  ;;  %2605 = vrot.lane.b32.xlu2 %v4892_v48, %s3680_s25 }
 0x2cb   : > { %2570 = vrot.lane.b32.xlu1 %v4637_v39, %s3681_s26  ;;  %v2425_v39 = vpop.permute.xlu0 %2424 }
 0x2cc   : > { %v2487_v49 = vpop.permute.xlu1 %2486  ;;  %v2495_v10 = vpop.permute.xlu2 %2494 }
 0x2cd   : > { %v5092_v46 = vsel %vm978_vm5, %v2757_v51, %v2487_v49  ;;  %v5095_v32 = vsel %vm978_vm5, %v2765_v20, %v2495_v10  ;;  %v5146_v51 = vld [vmem:[#allocation2 + $0x30] sm:$0xff]  ;;  %v3626_v49 = vld [vmem:[%s5593_s3 + $0x8] sm:$0xff] }
 0x2d2   : > { %2642 = vrot.lane.b32.xlu0 %v4946_v31, %s3679_s24  ;;  %2724 = vrot.lane.b32.xlu2 %v4955_v44, %s3682_s27 }
 0x2d3   : > { %2689 = vrot.lane.b32.xlu1 %v4670_v23, %s3683_s28 }
 0x2d4   : > { %v2507_v48 = vpop.permute.xlu2 %2506 }
 0x2d5   : > { %v5106_v2 = vsel %vm978_vm5, %v2777_v16, %v2507_v48 }
 0x2da   : > { %2541 = vrot.lane.b32.xlu0 %v4806_v45, %s3678_s23  ;;  %2623 = vrot.lane.b32.xlu2 %v4958_v47, %s3680_s25  ;;  %v5131_v47 = vpop.permute.xlu1 %2492 }
 0x2db   : > { %2588 = vrot.lane.b32.xlu1 %v4826_v33, %s3681_s26 }
 0x2dc   : > { %v5114_v56 = vpop.permute.xlu0 %2430 }
 0x2e2   : > { %2660 = vrot.lane.b32.xlu0 %v4834_v60, %s3679_s24  ;;  %2742 = vrot.lane.b32.xlu2 %v5119_v24, %s3682_s27 }
 0x2e3   : > { %2707 = vrot.lane.b32.xlu1 %v4865_v22, %s3683_s28 }
 0x2e4   : > { %v5127_v45 = vpop.permute.xlu2 %2434  ;;  %v5129_v33 = vpop.permute.xlu0 %2484 }
 0x2ea   : > { %2525 = vrot.lane.b32.xlu0 %v4946_v31, %s3678_s23  ;;  %2607 = vrot.lane.b32.xlu2 %v4955_v44, %s3680_s25 }
 0x2eb   : > { %2572 = vrot.lane.b32.xlu1 %v4670_v23, %s3681_s26  ;;  %v3095_v23 = vsel %vm5693_vm13, %v3059_v54, 0  ;;  %v2775_v54 = vsel %vm945_vm3, %v4779_v4, %v2425_v39  ;;  %vm5703_vm13 = vmmov %vm5699_vm0 }
 0x2ec   : > { %v2501_v29 = vpop.permute.xlu2 %2500  ;;  %v5139_v36 = vpop.permute.xlu0 %2490  ;;  %3630 = vmatpush.bf16.msra.mxu3 %v3095_v23  ;;  %3102 = vmatpush.bf16.msra.mxu1 %v3095_v23 }
 0x2ed   : > { %v5141_v17 = vpop.permute.xlu1 %2432 }
 0x2f0   : > { %3631 = vmatpush.bf16.msra.mxu3 %v3626_v49  ;;  %3103 = vmatpush.bf16.msra.mxu1 %v3626_v49 }
 0x2f2   : > { %2644 = vrot.lane.b32.xlu0 %v5146_v51, %s3679_s24  ;;  %2726 = vrot.lane.b32.xlu2 %v4889_v12, %s3682_s27 }
 0x2f3   : > { %2691 = vrot.lane.b32.xlu1 %v4708_v8, %s3683_s28 }
 0x2f4   : > { %v2620_v44 = vpop.permute.xlu2 %2619  ;;  %v2419_v20 = vpop.permute.xlu0 %2418  ;;  %3632 = vmatpush.bf16.msra.mxu3 %v3625_v35  ;;  %3104 = vmatpush.bf16.msra.mxu1 %v3625_v35 }
 0x2f5   : > { %v2499_v10 = vpop.permute.xlu1 %2498  ;;  %v2769_v16 = vsel %vm945_vm3, %v4923_v34, %v2419_v20 }
 0x2f6   : > { %v5161_v48 = vsel %vm978_vm5, %v2769_v16, %v2499_v10 }
 0x2fa   : > { %2543 = vrot.lane.b32.xlu0 %v4834_v60, %s3678_s23  ;;  %2625 = vrot.lane.b32.xlu2 %v5119_v24, %s3680_s25  ;;  %v2476_v60 = vrot.slane %v4899_v6, 1 }
 0x2fb   : > { %2590 = vrot.lane.b32.xlu1 %v4865_v22, %s3681_s26  ;;  %v2475_v22 = vrot.slane %v4883_v21, 1 }
 0x2fc   : > { %v2739_v25 = vpop.permute.xlu2 %2738  ;;  %v2497_v1 = vpop.permute.xlu0 %2496 }
 0x2fd   : > { %v2505_v23 = vpop.permute.xlu1 %2504  ;;  %v5177_v20 = vsel %vm978_vm5, %v2767_v11, %v2497_v1  ;;  %v5185_v13 = vsel %vm5694_vm7, %v2475_v22, %v2476_v60  ;;  %vm5704_vm7 = vmmov %vm5697_vm4 }
 0x2fe   : > { %v5181_v49 = vsel %vm978_vm5, %v2775_v54, %v2505_v23 }
 0x302   : > { %2662 = vrot.lane.b32.xlu0 %v4883_v21, %s3679_s24  ;;  %2744 = vrot.lane.b32.xlu2 %v5185_v13, %s3682_s27 }
 0x303   : > { %2709 = vrot.lane.b32.xlu1 %v4912_v19, %s3683_s28 }
 0x304   : > { %v2604_v4 = vpop.permute.xlu2 %2603  ;;  %v2503_v39 = vpop.permute.xlu0 %2502 }
 0x305   : > { %v2421_v6 = vpop.permute.xlu1 %2420 }
 0x306   : > { %v2771_v10 = vsel %vm945_vm3, %v4984_v50, %v2421_v6 }
 0x307   : > { %v2803_v1 = vsel %vm978_vm5, %v2771_v10, %v2501_v29 }
 0x30a   : > { %2527 = vrot.lane.b32.xlu0 %v5146_v51, %s3678_s23  ;;  %2609 = vrot.lane.b32.xlu2 %v4889_v12, %s3680_s25 }
 0x30b   : > { %2574 = vrot.lane.b32.xlu1 %v4708_v8, %s3681_s26 }
 0x30c   : > { %v2723_v16 = vpop.permute.xlu2 %2722  ;;  %v2538_v35 = vpop.permute.xlu0 %2537 }
 0x30d   : > { %v2585_v11 = vpop.permute.xlu1 %2584  ;;  %v2835_v54 = vsel %vm5695_vm2, %v2803_v1, %v2538_v35 }
 0x30e   : > { %v2867_v23 = vsel %vm5696_vm1, %v2835_v54, %v2585_v11  ;;  %vm5705_vm1 = vmmov %vm5699_vm0 }
 0x30f   : > { %v2899_v8 = vsel %vm5697_vm4, %v2867_v23, %v2620_v44  ;;  %v2755_v44 = vsel %vm945_vm3, %v4918_v58, %v5033_v7  ;;  %v2479_v23 = vrot.slane %v4941_v27, 1  ;;  %v5250_v27 = vld [vmem:[#allocation2 + $0x6c] sm:$0xff] }
 0x312   : > { %2646 = vrot.lane.b32.xlu0 %v4802_v3, %s3679_s24  ;;  %2728 = vrot.lane.b32.xlu2 %v4932_v14, %s3682_s27 }
 0x313   : > { %2693 = vrot.lane.b32.xlu1 %v4839_v40, %s3683_s28 }
 0x314   : > { %v2622_v12 = vpop.permute.xlu2 %2621  ;;  %v2657_v60 = vpop.permute.xlu0 %2656 }
 0x315   : > { %v2704_v22 = vpop.permute.xlu1 %2703  ;;  %v2931_v29 = vsel %vm1110_vm8, %v2899_v8, %v2657_v60 }
 0x316   : > { %v2963_v6 = vsel %vm1143_vm9, %v2931_v29, %v2704_v22  ;;  %v2478_v22 = vrot.slane %v4929_v37, 1 }
 0x317   : > { %v2995_v10 = vsel %vm1176_vm10, %v2963_v6, %v2739_v25  ;;  %v2787_v25 = vsel %vm978_vm5, %v2755_v44, %v5129_v33 }
 0x318   : > { %3575 = vmatmul.msk.bf16.vlgmr.msra.gmra.mxu3 %vm1229_vm11, %v2995_v10  ;;  %v5242_v29 = vsel %vm5701_vm6, %v2478_v22, %v2479_v23 }
 0x31a   : > { %2508 = vrot.lane.b32.xlu0 %v5119_v24, %s3677_s22  ;;  %2592 = vrot.lane.b32.xlu2 %v4912_v19, %s3681_s26 }
 0x31b   : > { %2545 = vrot.lane.b32.xlu1 %v4883_v21, %s3678_s23 }
 0x31c   : > { %v2741_v35 = vpop.permute.xlu2 %2740  ;;  %v2522_v11 = vpop.permute.xlu0 %2521 }
 0x31d   : > { %v2569_v1 = vpop.permute.xlu1 %2568  ;;  %v2819_v54 = vsel %vm5698_vm15, %v2787_v25, %v2522_v11  ;;  %vm5706_vm15 = vmmov %vm5701_vm6 }
 0x31e   : > { %v2851_v24 = vsel %vm5699_vm0, %v2819_v54, %v2569_v1  ;;  %vm5707_vm0 = vmmov %vm5695_vm2 }
 0x31f   : > { %v2883_v19 = vsel %vm5700_vm14, %v2851_v24, %v2604_v4  ;;  %v2773_v4 = vsel %vm945_vm3, %v5250_v27, %v5054_v53  ;;  %vm5708_vm14 = vmmov %vm5705_vm1 }
 0x320   : > { %v2805_v10 = vsel %vm978_vm5, %v2773_v4, %v2503_v39  ;;  %vm5709_vm6 = vmmov %vm5697_vm4 }
 0x322   : > { %2627 = vrot.lane.b32.xlu0 %v5185_v13, %s3680_s25  ;;  %2711 = vrot.lane.b32.xlu2 %v4961_v41, %s3683_s28 }
 0x323   : > { %2664 = vrot.lane.b32.xlu1 %v4929_v37, %s3679_s24 }
 0x324   : > { %v2606_v21 = vpop.permute.xlu2 %2605  ;;  %v2641_v58 = vpop.permute.xlu0 %2640 }
 0x325   : > { %v2688_v7 = vpop.permute.xlu1 %2687  ;;  %v2915_v33 = vsel %vm1110_vm8, %v2883_v19, %v2641_v58 }
 0x326   : > { %v2947_v8 = vsel %vm1143_vm9, %v2915_v33, %v2688_v7 }
 0x327   : > { %v2979_v60 = vsel %vm1176_vm10, %v2947_v8, %v2723_v16  ;;  %v2482_v8 = vrot.slane %v4988_v0, 1 }
 0x328   : > { %3567 = vmatmul.msk.bf16.vlgmr.msra.gmra.mxu1 %vm1229_vm11, %v2979_v60 }
 0x32a   : > { %2746 = vrot.lane.b32.xlu0 %v5242_v29, %s3682_s27  ;;  %2576 = vrot.lane.b32.xlu2 %v4839_v40, %s3681_s26 }
 0x32b   : > { %2529 = vrot.lane.b32.xlu1 %v4802_v3, %s3678_s23 }
 0x32c   : > { %v2725_v16 = vpop.permute.xlu2 %2724  ;;  %v2540_v6 = vpop.permute.xlu0 %2539 }
 0x32d   : > { %v2587_v44 = vpop.permute.xlu1 %2586  ;;  %v2837_v11 = vsel %vm5702_vm12, %v2805_v10, %v2540_v6  ;;  %vm5710_vm12 = vmmov %vm5707_vm0 }
 0x32e   : > { %v2869_v25 = vsel %vm5703_vm13, %v2837_v11, %v2587_v44  ;;  %vm5711_vm13 = vmmov %vm5705_vm1 }
 0x32f   : > { %v2901_v40 = vsel %vm5704_vm7, %v2869_v25, %v2622_v12  ;;  %vm5712_vm7 = vmmov %vm5697_vm4 }
 0x332   : > { %2611 = vrot.lane.b32.xlu0 %v4932_v14, %s3680_s25  ;;  %2695 = vrot.lane.b32.xlu2 %v4909_v38, %s3683_s28 }
 0x333   : > { %2648 = vrot.lane.b32.xlu1 %v4852_v30, %s3679_s24 }
 0x334   : > { %v2624_v3 = vpop.permute.xlu2 %2623  ;;  %v2659_v53 = vpop.permute.xlu0 %2658 }
 0x335   : > { %v2706_v1 = vpop.permute.xlu1 %2705  ;;  %v2933_v39 = vsel %vm1110_vm8, %v2901_v40, %v2659_v53  ;;  %v2080_v53 = vld [vmem:[#allocation2 + $0xc8] sm:$0x1] }
 0x336   : > { %v2965_v54 = vsel %vm1143_vm9, %v2933_v39, %v2706_v1 }
 0x337   : > { %v2997_v24 = vsel %vm1176_vm10, %v2965_v54, %v2741_v35 }
 0x338   : > { %3576 = vmatmul.msk.bf16.gmra.mxu3 %vm1229_vm11, %v2997_v24 }
 0x33a   : > { %2730 = vrot.lane.b32.xlu0 %v5003_v5, %s3682_s27  ;;  %2547 = vrot.lane.b32.xlu2 %v4929_v37, %s3678_s23 }
 0x33b   : > { %2510 = vrot.lane.b32.xlu1 %v5185_v13, %s3677_s22 }
 0x33c   : > { %v2743_v14 = vpop.permute.xlu2 %2742  ;;  %v2524_v12 = vpop.permute.xlu0 %2523 }
 0x33d   : > { %v2571_v19 = vpop.permute.xlu1 %2570  ;;  %v2821_v58 = vsel %vm5695_vm2, %v5092_v46, %v2524_v12  ;;  %vm5713_vm2 = vmmov %vm5706_vm15 }
 0x33e   : > { %v2853_v7 = vsel %vm5705_vm1, %v2821_v58, %v2571_v19  ;;  %vm5714_vm1 = vsmask.f32 7424 }
 0x33f   : > { %v2885_v13 = vsel %vm5697_vm4, %v2853_v7, %v2606_v21  ;;  %vm5715_vm4 = vmmov %vm5707_vm0 }
 0x342   : > { %2594 = vrot.lane.b32.xlu0 %v4961_v41, %s3681_s26  ;;  %2666 = vrot.lane.b32.xlu2 %v4972_v15, %s3679_s24  ;;  %v2481_v41 = vrot.slane %v4972_v15, 1 }
 0x343   : > { %2629 = vrot.lane.b32.xlu1 %v5242_v29, %s3680_s25 }
 0x344   : > { %v2608_v37 = vpop.permute.xlu2 %2607  ;;  %v2643_v35 = vpop.permute.xlu0 %2642  ;;  %v5292_v22 = vsel %vm5706_vm15, %v2481_v41, %v2482_v8  ;;  %vm5716_vm15 = vmmov %vm5711_vm13 }
 0x345   : > { %v2690_v33 = vpop.permute.xlu1 %2689  ;;  %v2917_v23 = vsel %vm1110_vm8, %v2885_v13, %v2643_v35 }
 0x346   : > { %v2949_v46 = vsel %vm1143_vm9, %v2917_v23, %v2690_v33 }
 0x347   : > { %v2981_v60 = vsel %vm1176_vm10, %v2949_v46, %v2725_v16 }
 0x348   : > { %3568 = vmatmul.msk.bf16.gmra.mxu1 %vm1229_vm11, %v2981_v60 }
 0x34a   : > { %2713 = vrot.lane.b32.xlu0 %v5006_v28, %s3683_s28  ;;  %2531 = vrot.lane.b32.xlu2 %v4852_v30, %s3678_s23 }
 0x34b   : > { %2748 = vrot.lane.b32.xlu1 %v5292_v22, %s3682_s27 }
 0x34c   : > { %v2727_v21 = vpop.permute.xlu2 %2726  ;;  %v2542_v0 = vpop.permute.xlu0 %2541 }
 0x34d   : > { %v2589_v4 = vpop.permute.xlu1 %2588  ;;  %v2839_v16 = vsel %vm5707_vm0, %v5181_v49, %v2542_v0  ;;  %vm5717_vm0 = vmmov %vm5709_vm6 }
 0x34e   : > { %v2871_v6 = vsel %vm5708_vm14, %v2839_v16, %v2589_v4  ;;  %vm5718_vm14 = vmmov %vm5715_vm4 }
 0x34f   : > { %v2903_v10 = vsel %vm5709_vm6, %v2871_v6, %v2624_v3  ;;  %v2759_v3 = vsel %vm945_vm3, %v4876_v63, %v5062_v59  ;;  %vm5719_vm6 = vmmov %vm5711_vm13 }
 0x350   : > { %v2791_v54 = vsel %vm978_vm5, %v2759_v3, %v5071_v62 }
 0x352   : > { %2578 = vrot.lane.b32.xlu0 %v4909_v38, %s3681_s26  ;;  %2650 = vrot.lane.b32.xlu2 %v4923_v34, %s3679_s24  ;;  %v5318_v38 = vld [vmem:[#allocation2 + $0xc0] sm:$0xff] }
 0x353   : > { %2613 = vrot.lane.b32.xlu1 %v5003_v5, %s3680_s25  ;;  %v2554_v5 = vunpack.c.l.b16 %v2080_v53  ;;  %v2557_v13 = vshrl.u32 %v5318_v38, 16  ;;  %v2600_v41 = vrot.slane %v5318_v38, 1 }
 0x354   : > { %v2626_v30 = vpop.permute.xlu2 %2625  ;;  %v2661_v44 = vpop.permute.xlu0 %2660 }
 0x355   : > { %v2708_v11 = vpop.permute.xlu1 %2707  ;;  %v2935_v25 = vsel %vm1110_vm8, %v2903_v10, %v2661_v44  ;;  %v2555_v12 = vpack.c.b16 %v2554_v5, %v2554_v5  ;;  %v3624_v5 = vld [vmem:[#allocation2 + $0xcc] sm:$0xff] }
 0x356   : > { %v2967_v49 = vsel %vm1143_vm9, %v2935_v25, %v2708_v11  ;;  %v2083_v25 = vld [vmem:[#allocation2 + $0xd4] sm:$0x1] }
 0x357   : > { %v2999_v40 = vsel %vm1176_vm10, %v2967_v49, %v2743_v14  ;;  %v2564_v59 = vshll.u32 %v2555_v12, 16  ;;  %v2601_v23 = vrot.slane %v2555_v12, 1 }
 0x358   : > { %3577 = vmatmul.msk.bf16.gmra.mxu3 %vm1229_vm11, %v2999_v40 }
 0x359   : > { %v2566_v8 = vrot.slane %v2564_v59, 1 }
 0x35a   : > { %2697 = vrot.lane.b32.xlu0 %v4976_v26, %s3683_s28  ;;  %2512 = vrot.lane.b32.xlu2 %v5242_v29, %s3677_s22  ;;  %v2559_v29 = vshll.u32 %v5318_v38, 16 }
 0x35b   : > { %2732 = vrot.lane.b32.xlu1 %v4981_v43, %s3682_s27 }
 0x35c   : > { %v2745_v1 = vpop.permute.xlu2 %2744  ;;  %v2526_v39 = vpop.permute.xlu0 %2525  ;;  %v2561_v63 = vrot.slane %v2559_v29, 1 }
 0x35d   : > { %v2573_v24 = vpop.permute.xlu1 %2572  ;;  %v2823_v14 = vsel %vm5710_vm12, %v2791_v54, %v2526_v39  ;;  %vm5720_vm12 = vmmov %vm5717_vm0 }
 0x35e   : > { %v2855_v19 = vsel %vm5711_vm13, %v2823_v14, %v2573_v24  ;;  %v2562_v46 = vor.u32 %v2561_v63, %v2557_v13  ;;  %v2676_v14 = vshrl.u32 %v3624_v5, 16  ;;  %vm5721_vm13 = vmmov %vm5714_vm1 }
 0x35f   : > { %v2887_v58 = vsel %vm5712_vm7, %v2855_v19, %v2608_v37  ;;  %vm5722_vm7 = vmmov %vm5713_vm2 }
 0x360   : > { %v2567_v37 = vsel %vm5714_vm1, %v2562_v46, %v2566_v8  ;;  %vm5724_vm1 = vmmov %vm5719_vm6 }
 0x362   : > { %2549 = vrot.lane.b32.xlu0 %v4972_v15, %s3678_s23  ;;  %2631 = vrot.lane.b32.xlu2 %v5292_v22, %s3680_s25 }
 0x363   : > { %2596 = vrot.lane.b32.xlu1 %v5006_v28, %s3681_s26  ;;  %v2602_v28 = vsel %vm5713_vm2, %v2600_v41, %v2601_v23  ;;  %vm5723_vm2 = vmmov %vm5715_vm4 }
 0x364   : > { %v2610_v62 = vpop.permute.xlu2 %2609  ;;  %v2645_v7 = vpop.permute.xlu0 %2644 }
 0x365   : > { %v2692_v35 = vpop.permute.xlu1 %2691  ;;  %v2919_v33 = vsel %vm1110_vm8, %v2887_v58, %v2645_v7 }
 0x366   : > { %v2951_v15 = vsel %vm1143_vm9, %v2919_v33, %v2692_v35 }
 0x367   : > { %v2983_v60 = vsel %vm1176_vm10, %v2951_v15, %v2727_v21  ;;  %v3664_v15 = vld [vmem:[#allocation2 + $0x90] sm:$0xff] }
 0x368   : > { %3569 = vmatmul.msk.bf16.gmra.mxu1 %vm1229_vm11, %v2983_v60  ;;  %v2779_v46 = vsel %vm945_vm3, %v3664_v15, %v5064_v18 }
 0x36a   : > { %2668 = vrot.lane.b32.xlu0 %v5318_v38, %s3679_s24  ;;  %2750 = vrot.lane.b32.xlu2 %v2602_v28, %s3682_s27 }
 0x36b   : > { %2715 = vrot.lane.b32.xlu1 %v2567_v37, %s3683_s28 }
 0x36c   : > { %v2729_v0 = vpop.permute.xlu2 %2728  ;;  %v2544_v4 = vpop.permute.xlu0 %2543 }
 0x36d   : > { %v2591_v16 = vpop.permute.xlu1 %2590  ;;  %v2841_v21 = vsel %vm5715_vm4, %v5106_v2, %v2544_v4  ;;  %vm5725_vm4 = vmmov %vm5717_vm0 }
 0x36e   : > { %v2873_v6 = vsel %vm5716_vm15, %v2841_v21, %v2591_v16  ;;  %v3031_v21 = vld [vmem:[%s5406_s20 + $0x80] sm:$0xff] }
 0x36f   : > { %v2905_v44 = vsel %vm5717_vm0, %v2873_v6, %v2626_v30  ;;  %v2761_v30 = vsel %vm945_vm3, %v4946_v31, %v5046_v9  ;;  %vm5726_vm0 = vmmov %vm5723_vm2 }
 0x370   : > { %v2793_v39 = vsel %vm978_vm5, %v2761_v30, %v5139_v36 }
 0x372   : > { %2533 = vrot.lane.b32.xlu0 %v4923_v34, %s3678_s23  ;;  %2615 = vrot.lane.b32.xlu2 %v4981_v43, %s3680_s25  ;;  %v2673_v34 = vunpack.c.l.b16 %v2083_v25  ;;  %v2678_v43 = vshll.u32 %v3624_v5, 16 }
 0x373   : > { %2580 = vrot.lane.b32.xlu1 %v4976_v26, %s3681_s26 }
 0x374   : > { %v2593_v10 = vpop.permute.xlu2 %2592  ;;  %v2663_v11 = vpop.permute.xlu0 %2662  ;;  %v2674_v26 = vpack.c.b16 %v2673_v34, %v2673_v34  ;;  %v2680_v12 = vrot.slane %v2678_v43, 1 }
 0x375   : > { %v2710_v49 = vpop.permute.xlu1 %2709  ;;  %v2937_v40 = vsel %vm1110_vm8, %v2905_v44, %v2663_v11 }
 0x376   : > { %v2969_v2 = vsel %vm1143_vm9, %v2937_v40, %v2710_v49  ;;  %v2683_v29 = vshll.u32 %v2674_v26, 16  ;;  %v2681_v31 = vor.u32 %v2680_v12, %v2676_v14  ;;  %v3032_v40 = vld [vmem:[%s5406_s20 + $0x88] sm:$0xff] }
 0x377   : > { %v3001_v53 = vsel %vm1176_vm10, %v2969_v2, %v2745_v1  ;;  %v3016_v14 = vld [vmem:[%s5406_s20 + $0x8] sm:$0xff] }
 0x378   : > { %3578 = vmatmul.msk.bf16.gmra.mxu3 %vm1229_vm11, %v3001_v53  ;;  %v2685_v9 = vrot.slane %v2683_v29, 1 }
 0x37a   : > { %2652 = vrot.lane.b32.xlu0 %v4984_v50, %s3679_s24  ;;  %2734 = vrot.lane.b32.xlu2 %v5022_v42, %s3682_s27 }
 0x37b   : > { %2699 = vrot.lane.b32.xlu1 %v5027_v55, %s3683_s28 }
 0x37c   : > { %v2712_v3 = vpop.permute.xlu2 %2711  ;;  %v2528_v1 = vpop.permute.xlu0 %2527 }
 0x37d   : > { %v2575_v54 = vpop.permute.xlu1 %2574  ;;  %v2825_v24 = vsel %vm5718_vm14, %v2793_v39, %v2528_v1  ;;  %vm5727_vm14 = vmmov %vm5724_vm1 }
 0x37e   : > { %v2857_v19 = vsel %vm5719_vm6, %v2825_v24, %v2575_v54 }
 0x37f   : > { %v2889_v36 = vsel %vm5720_vm12, %v2857_v19, %v2610_v62  ;;  %v2720_v62 = vrot.slane %v2674_v26, 1  ;;  %vm5728_vm12 = vmmov %vm5725_vm4 }
 0x382   : > { %2514 = vrot.lane.b32.xlu0 %v5292_v22, %s3677_s22  ;;  %2598 = vrot.lane.b32.xlu2 %v2567_v37, %s3681_s26  ;;  %v2686_v22 = vsel %vm5721_vm13, %v2681_v31, %v2685_v9  ;;  %s5421_s22 = scalar_lea.vmem %s5594_s4, %s3585_s17 }
 0x383   : > { %2551 = vrot.lane.b32.xlu1 %v5318_v38, %s3678_s23  ;;  %v2719_v38 = vrot.slane %v3624_v5, 1 }
 0x384   : > { %v2647_v63 = vpop.permute.xlu0 %2646  ;;  %v2577_v7 = vpop.permute.xlu2 %2576 }
 0x385   : > { %v2694_v59 = vpop.permute.xlu1 %2693  ;;  %v2921_v58 = vsel %vm1110_vm8, %v2889_v36, %v2647_v63  ;;  %v2721_v60 = vsel %vm5722_vm7, %v2719_v38, %v2720_v62 }
 0x386   : > { %v2953_v13 = vsel %vm1143_vm9, %v2921_v58, %v2694_v59  ;;  %v3665_v58 = vld [vmem:[#allocation2 + $0x9c] sm:$0xff] }
 0x387   : > { %v2985_v35 = vsel %vm1176_vm10, %v2953_v13, %v2729_v0 }
 0x388   : > { %3570 = vmatmul.msk.bf16.gmra.mxu1 %vm1229_vm11, %v2985_v35 }
 0x38a   : > { %2633 = vrot.lane.b32.xlu0 %v2602_v28, %s3680_s25  ;;  %2717 = vrot.lane.b32.xlu2 %v2686_v22, %s3683_s28 }
 0x38b   : > { %2670 = vrot.lane.b32.xlu1 %v3624_v5, %s3679_s24  ;;  %v3015_v5 = vld [vmem:[%s5406_s20] sm:$0xff] }
 0x38c   : > { %v2509_v33 = vpop.permute.xlu0 %2508  ;;  %v2696_v41 = vpop.permute.xlu2 %2695 }
 0x38d   : > { %v2546_v23 = vpop.permute.xlu1 %2545  ;;  %v2811_v8 = vsel %vm978_vm5, %v2779_v46, %v2509_v33  ;;  %v3033_v46 = vld [vmem:[%s5406_s20 + $0x90] sm:$0xff] }
 0x38e   : > { %v2843_v28 = vsel %vm5723_vm2, %v2811_v8, %v2546_v23  ;;  %vm5729_vm2 = vmmov %vm5726_vm0 }
 0x38f   : > { %v2875_v18 = vsel %vm5724_vm1, %v2843_v28, %v2593_v10 }
 0x392   : > { %2752 = vrot.lane.b32.xlu0 %v2721_v60, %s3682_s27  ;;  %2582 = vrot.lane.b32.xlu2 %v5027_v55, %s3681_s26 }
 0x393   : > { %2535 = vrot.lane.b32.xlu1 %v4984_v50, %s3678_s23 }
 0x394   : > { %v2628_v37 = vpop.permute.xlu0 %2627  ;;  %v2548_v55 = vpop.permute.xlu2 %2547 }
 0x395   : > { %v2665_v0 = vpop.permute.xlu1 %2664  ;;  %v2907_v4 = vsel %vm5725_vm4, %v2875_v18, %v2628_v37 }
 0x396   : > { %v2939_v16 = vsel %vm1110_vm8, %v2907_v4, %v2665_v0 }
 0x397   : > { %v2971_v44 = vsel %vm1143_vm9, %v2939_v16, %v2712_v3  ;;  %v3034_v16 = vld [vmem:[%s5406_s20 + $0x98] sm:$0xff] }
 0x39a   : > { %2617 = vrot.lane.b32.xlu0 %v5022_v42, %s3680_s25  ;;  %2701 = vrot.lane.b32.xlu2 %v4763_v52, %s3683_s28  ;;  %v2763_v42 = vsel %vm945_vm3, %v5146_v51, %v5083_v61 }
 0x39b   : > { %2654 = vrot.lane.b32.xlu1 %v5250_v27, %s3679_s24  ;;  %v3146_v50 = vpop.f32.mrf.mxu3  ;;  %v2795_v49 = vsel %vm978_vm5, %v2763_v42, %v5131_v47 }
 0x39c   : > { %v3147_v6 = vadd.f32 %v3146_v50, %v3031_v21  ;;  %v2747_v10 = vpop.permute.xlu0 %2746  ;;  %v2667_v34 = vpop.permute.xlu2 %2666  ;;  %v3017_v50 = vld [vmem:[%s5406_s20 + $0x10] sm:$0xff] }
 0x39d   : > { %v2530_v11 = vpop.permute.xlu1 %2529  ;;  %v3003_v25 = vsel %vm1176_vm10, %v2971_v44, %v2747_v10 }
 0x39e   : > { %vm3202_vm15 = vcmp.ge.f32.partialorder %v3147_v6, 0.0  ;;  %v3234_v52 = vmul.f32 0.01, %v3147_v6  ;;  %3579 = vmatmul.msk.bf16.gmra.mxu3 %vm1229_vm11, %v3003_v25  ;;  %v2827_v2 = vsel %vm5726_vm0, %v2795_v49, %v2530_v11 }
 0x39f   : > { %v2859_v43 = vsel %vm5727_vm14, %v2827_v2, %v2577_v7  ;;  %v2781_v7 = vsel %vm945_vm3, %v3665_v58, %v5114_v56 }
 0x3a0   : > { %v3266_v27 = vsel %vm3202_vm15, %v3147_v6, %v3234_v52 }
 0x3a1   : > { %3298 = vst.msk [vmem:[%s5421_s22 + $0x80] sm:$0xff] %vm945_vm3, %v3266_v27 }
 0x3a2   : > { %2736 = vrot.lane.b32.xlu0 %v5019_v57, %s3682_s27 }
 0x3a3   : > { %v3148_v53 = vpop.f32.mrf.mxu3 }
 0x3a4   : > { %v3149_v26 = vadd.f32 %v3148_v53, %v3032_v40  ;;  %v2612_v61 = vpop.permute.xlu0 %2611  ;;  %v2532_v36 = vpop.permute.xlu2 %2531 }
 0x3a5   : > { %v2649_v51 = vpop.permute.xlu1 %2648  ;;  %v3106_v47 = vpop.f32.mrf.mxu1  ;;  %v2891_v3 = vsel %vm5728_vm12, %v2859_v43, %v2612_v61  ;;  %v2829_v44 = vsel %vm5726_vm0, %v5095_v32, %v2532_v36 }
 0x3a6   : > { %vm3203_vm6 = vcmp.ge.f32.partialorder %v3149_v26, 0.0  ;;  %v3235_v30 = vmul.f32 0.01, %v3149_v26  ;;  %v3107_v1 = vadd.f32 %v3106_v47, %v3015_v5  ;;  %v2923_v54 = vsel %vm1110_vm8, %v2891_v3, %v2649_v51  ;;  %v3018_v5 = vld [vmem:[%s5406_s20 + $0x18] sm:$0xff] }
 0x3a7   : > { %v2955_v29 = vsel %vm1143_vm9, %v2923_v54, %v2696_v41 }
 0x3a8   : > { %v3267_v39 = vsel %vm3203_vm6, %v3149_v26, %v3235_v30  ;;  %vm3186_vm13 = vcmp.ge.f32.partialorder %v3107_v1, 0.0  ;;  %v3218_v57 = vmul.f32 0.01, %v3107_v1  ;;  %vm5730_vm6 = vmmov %vm5724_vm1 }
 0x3a9   : > { %3299 = vst.msk [vmem:[%s5421_s22 + $0x88] sm:$0xff] %vm945_vm3, %v3267_v39  ;;  %v3666_v39 = vld [vmem:[#allocation2 + $0xa8] sm:$0xff] }
 0x3aa   : > { %v3250_v24 = vsel %vm3186_vm13, %v3107_v1, %v3218_v57  ;;  %vm5731_vm13 = vmmov %vm5725_vm4  ;;  %v2783_v57 = vsel %vm945_vm3, %v3666_v39, %v5141_v17 }
 0x3ab   : > { %3282 = vst.msk [vmem:[%s5421_s22] sm:$0xff] %vm945_vm3, %v3250_v24 }
 0x3ac   : > { %v2731_v12 = vpop.permute.xlu0 %2730  ;;  %v2651_v23 = vpop.permute.xlu2 %2650 }
 0x3ad   : > { %v2511_v19 = vpop.permute.xlu1 %2510  ;;  %v3108_v31 = vpop.f32.mrf.mxu1  ;;  %v2987_v9 = vsel %vm1176_vm10, %v2955_v29, %v2731_v12 }
 0x3ae   : > { %v3109_v63 = vadd.f32 %v3108_v31, %v3016_v14  ;;  %3571 = vmatmul.msk.bf16.gmra.mxu1 %vm1229_vm11, %v2987_v9  ;;  %v2813_v13 = vsel %vm978_vm5, %v2781_v7, %v2511_v19  ;;  %v3035_v31 = vld [vmem:[%s5406_s20 + $0xa0] sm:$0xff] }
 0x3af   : > { %v2845_v62 = vsel %vm5729_vm2, %v2813_v13, %v2548_v55  ;;  %vm5732_vm2 = vmmov %vm5726_vm0 }
 0x3b0   : > { %vm3187_vm7 = vcmp.ge.f32.partialorder %v3109_v63, 0.0  ;;  %v3219_v59 = vmul.f32 0.01, %v3109_v63 }
 0x3b2   : > { %v3251_v35 = vsel %vm3187_vm7, %v3109_v63, %v3219_v59 }
 0x3b3   : > { %3283 = vst.msk [vmem:[%s5421_s22 + $0x8] sm:$0xff] %vm945_vm3, %v3251_v35 }
 0x3b4   : > { %v2595_v22 = vpop.permute.xlu0 %2594  ;;  %v2513_v21 = vpop.permute.xlu2 %2512 }
 0x3b5   : > { %v2630_v38 = vpop.permute.xlu1 %2629  ;;  %v2877_v33 = vsel %vm5724_vm1, %v2845_v62, %v2595_v22  ;;  %v2815_v24 = vsel %vm978_vm5, %v2783_v57, %v2513_v21  ;;  %v3036_v62 = vld [vmem:[%s5406_s20 + $0xa8] sm:$0xff]  ;;  %v3038_v57 = vld [vmem:[%s5406_s20 + $0xb8] sm:$0xff] }
 0x3b6   : > { %v2909_v15 = vsel %vm5725_vm4, %v2877_v33, %v2630_v38  ;;  %v3020_v21 = vld [vmem:[%s5406_s20 + $0x28] sm:$0xff] }
 0x3b7   : > { %v2941_v60 = vsel %vm1110_vm8, %v2909_v15, %v2667_v34 }
 0x3bb   : > { %v3151_v8 = vpop.f32.mrf.mxu3 }
 0x3bc   : > { %v3152_v56 = vadd.f32 %v3151_v8, %v3033_v46  ;;  %v2714_v41 = vpop.permute.xlu0 %2713  ;;  %v2632_v32 = vpop.permute.xlu2 %2631 }
 0x3bd   : > { %v2749_v28 = vpop.permute.xlu1 %2748  ;;  %v2973_v37 = vsel %vm1143_vm9, %v2941_v60, %v2714_v41 }
 0x3be   : > { %vm3204_vm15 = vcmp.ge.f32.partialorder %v3152_v56, 0.0  ;;  %v3236_v0 = vmul.f32 0.01, %v3152_v56  ;;  %v3005_v18 = vsel %vm1176_vm10, %v2973_v37, %v2749_v28 }
 0x3bf   : > { %3580 = vmatmul.msk.bf16.gmra.mxu3 %vm1229_vm11, %v3005_v18 }
 0x3c0   : > { %v3268_v4 = vsel %vm3204_vm15, %v3152_v56, %v3236_v0 }
 0x3c1   : > { %3300 = vst.msk [vmem:[%s5421_s22 + $0x90] sm:$0xff] %vm945_vm3, %v3268_v4 }
 0x3c3   : > { %v3153_v55 = vpop.f32.mrf.mxu3 }
 0x3c4   : > { %v3154_v6 = vadd.f32 %v3153_v55, %v3034_v16  ;;  %v2579_v10 = vpop.permute.xlu0 %2578  ;;  %v2751_v29 = vpop.permute.xlu2 %2750 }
 0x3c5   : > { %v2614_v11 = vpop.permute.xlu1 %2613  ;;  %v3111_v25 = vpop.f32.mrf.mxu1  ;;  %v2861_v42 = vsel %vm5730_vm6, %v2829_v44, %v2579_v10 }
 0x3c6   : > { %vm3205_vm14 = vcmp.ge.f32.partialorder %v3154_v6, 0.0  ;;  %v3237_v52 = vmul.f32 0.01, %v3154_v6  ;;  %v3112_v27 = vadd.f32 %v3111_v25, %v3017_v50  ;;  %v2893_v2 = vsel %vm5731_vm13, %v2861_v42, %v2614_v11  ;;  %vm5735_vm13 = vmmov %vm5725_vm4 }
 0x3c7   : > { %v2925_v34 = vsel %vm1110_vm8, %v2893_v2, %v2651_v23  ;;  %v3019_v23 = vld [vmem:[%s5406_s20 + $0x20] sm:$0xff]  ;;  %v3667_v2 = vld [vmem:[#allocation2 + $0xb4] sm:$0xff] }
 0x3c8   : > { %v3269_v49 = vsel %vm3205_vm14, %v3154_v6, %v3237_v52  ;;  %vm3188_vm12 = vcmp.ge.f32.partialorder %v3112_v27, 0.0  ;;  %v3220_v40 = vmul.f32 0.01, %v3112_v27  ;;  %vm5733_vm14 = vmmov %vm5732_vm2 }
 0x3c9   : > { %3301 = vst.msk [vmem:[%s5421_s22 + $0x98] sm:$0xff] %vm945_vm3, %v3269_v49 }
 0x3ca   : > { %v3252_v53 = vsel %vm3188_vm12, %v3112_v27, %v3220_v40  ;;  %vm5734_vm12 = vmmov %vm5724_vm1 }
 0x3cb   : > { %3284 = vst.msk [vmem:[%s5421_s22 + $0x10] sm:$0xff] %vm945_vm3, %v3252_v53  ;;  %v2785_v53 = vsel %vm945_vm3, %v3667_v2, %v5127_v45 }
 0x3cc   : > { %v2698_v26 = vpop.permute.xlu0 %2697  ;;  %v2616_v38 = vpop.permute.xlu2 %2615 }
 0x3cd   : > { %v2733_v61 = vpop.permute.xlu1 %2732  ;;  %v2957_v51 = vsel %vm1143_vm9, %v2925_v34, %v2698_v26  ;;  %v3113_v43 = vpop.f32.mrf.mxu1 }
 0x3ce   : > { %v3114_v47 = vadd.f32 %v3113_v43, %v3018_v5  ;;  %v2989_v30 = vsel %vm1176_vm10, %v2957_v51, %v2733_v61 }
 0x3cf   : > { %3572 = vmatmul.msk.bf16.gmra.mxu1 %vm1229_vm11, %v2989_v30 }
 0x3d0   : > { %vm3189_vm7 = vcmp.ge.f32.partialorder %v3114_v47, 0.0  ;;  %v3221_v3 = vmul.f32 0.01, %v3114_v47 }
 0x3d2   : > { %v3253_v1 = vsel %vm3189_vm7, %v3114_v47, %v3221_v3 }
 0x3d3   : > { %3285 = vst.msk [vmem:[%s5421_s22 + $0x18] sm:$0xff] %vm945_vm3, %v3253_v1 }
 0x3d4   : > { %v2550_v54 = vpop.permute.xlu0 %2549  ;;  %v2735_v16 = vpop.permute.xlu2 %2734 }
 0x3d5   : > { %v2597_v14 = vpop.permute.xlu1 %2596  ;;  %v2847_v12 = vsel %vm5732_vm2, %v2815_v24, %v2550_v54  ;;  %v3021_v24 = vld [vmem:[%s5406_s20 + $0x30] sm:$0xff] }
 0x3d6   : > { %v2879_v19 = vsel %vm5724_vm1, %v2847_v12, %v2597_v14 }
 0x3d7   : > { %v2911_v63 = vsel %vm5725_vm4, %v2879_v19, %v2632_v32  ;;  %v3037_v32 = vld [vmem:[%s5406_s20 + $0xb0] sm:$0xff] }
 0x3db   : > { %v3156_v9 = vpop.f32.mrf.mxu3 }
 0x3dc   : > { %v3157_v36 = vadd.f32 %v3156_v9, %v3035_v31  ;;  %v2669_v59 = vpop.permute.xlu0 %2668  ;;  %v2599_v49 = vpop.permute.xlu2 %2598 }
 0x3dd   : > { %v2716_v58 = vpop.permute.xlu1 %2715  ;;  %v2943_v17 = vsel %vm1110_vm8, %v2911_v63, %v2669_v59 }
 0x3de   : > { %vm3206_vm15 = vcmp.ge.f32.partialorder %v3157_v36, 0.0  ;;  %v3238_v7 = vmul.f32 0.01, %v3157_v36  ;;  %v2975_v13 = vsel %vm1143_vm9, %v2943_v17, %v2716_v58 }
 0x3df   : > { %v3007_v35 = vsel %vm1176_vm10, %v2975_v13, %v2751_v29 }
 0x3e0   : > { %v3270_v22 = vsel %vm3206_vm15, %v3157_v36, %v3238_v7  ;;  %3581 = vmatmul.msk.bf16.gmra.mxu3 %vm1229_vm11, %v3007_v35  ;;  %vm5736_vm15 = vmmov %vm5735_vm13  ;;  %v3022_v35 = vld [vmem:[%s5406_s20 + $0x38] sm:$0xff] }
 0x3e1   : > { %3302 = vst.msk [vmem:[%s5421_s22 + $0xa0] sm:$0xff] %vm945_vm3, %v3270_v22 }
 0x3e3   : > { %v3158_v33 = vpop.f32.mrf.mxu3 }
 0x3e4   : > { %v3159_v15 = vadd.f32 %v3158_v33, %v3036_v62  ;;  %v2534_v46 = vpop.permute.xlu0 %2533  ;;  %v2718_v1 = vpop.permute.xlu2 %2717 }
 0x3e5   : > { %v2581_v8 = vpop.permute.xlu1 %2580  ;;  %v3116_v56 = vpop.f32.mrf.mxu1  ;;  %v2831_v41 = vsel %vm5733_vm14, %v5177_v20, %v2534_v46  ;;  %vm5737_vm14 = vmmov %vm5732_vm2 }
 0x3e6   : > { %vm3207_vm0 = vcmp.ge.f32.partialorder %v3159_v15, 0.0  ;;  %v3239_v60 = vmul.f32 0.01, %v3159_v15  ;;  %v3117_v28 = vadd.f32 %v3116_v56, %v3019_v23  ;;  %v2863_v18 = vsel %vm5734_vm12, %v2831_v41, %v2581_v8  ;;  %vm5739_vm12 = vmmov %vm5735_vm13 }
 0x3e7   : > { %v2895_v55 = vsel %vm5735_vm13, %v2863_v18, %v2616_v38 }
 0x3e8   : > { %v3271_v37 = vsel %vm3207_vm0, %v3159_v15, %v3239_v60  ;;  %vm3190_vm6 = vcmp.ge.f32.partialorder %v3117_v28, 0.0  ;;  %v3222_v0 = vmul.f32 0.01, %v3117_v28 }
 0x3e9   : > { %3303 = vst.msk [vmem:[%s5421_s22 + $0xa8] sm:$0xff] %vm945_vm3, %v3271_v37  ;;  %v3039_v37 = vld [vmem:[%s5406_s20 + $0xc0] sm:$0xff] }
 0x3ea   : > { %v3254_v4 = vsel %vm3190_vm6, %v3117_v28, %v3222_v0  ;;  %vm5738_vm6 = vmmov %vm5724_vm1 }
 0x3eb   : > { %3286 = vst.msk [vmem:[%s5421_s22 + $0x20] sm:$0xff] %vm945_vm3, %v3254_v4 }
 0x3ec   : > { %v2653_v50 = vpop.permute.xlu0 %2652  ;;  %v2583_v17 = vpop.permute.xlu2 %2582 }
 0x3ed   : > { %v2700_v6 = vpop.permute.xlu1 %2699  ;;  %v2927_v20 = vsel %vm1110_vm8, %v2895_v55, %v2653_v50  ;;  %v3118_v10 = vpop.f32.mrf.mxu1  ;;  %v3023_v50 = vld [vmem:[%s5406_s20 + $0x40] sm:$0xff] }
 0x3ee   : > { %v3119_v44 = vadd.f32 %v3118_v10, %v3020_v21  ;;  %v2959_v11 = vsel %vm1143_vm9, %v2927_v20, %v2700_v6  ;;  %v3040_v21 = vld [vmem:[%s5406_s20 + $0xc8] sm:$0xff] }
 0x3ef   : > { %v2991_v25 = vsel %vm1176_vm10, %v2959_v11, %v2735_v16 }
 0x3f0   : > { %vm3191_vm7 = vcmp.ge.f32.partialorder %v3119_v44, 0.0  ;;  %v3223_v52 = vmul.f32 0.01, %v3119_v44  ;;  %3573 = vmatmul.msk.bf16.gmra.mxu1 %vm1229_vm11, %v2991_v25 }
 0x3f2   : > { %v3255_v42 = vsel %vm3191_vm7, %v3119_v44, %v3223_v52 }
 0x3f3   : > { %3287 = vst.msk [vmem:[%s5421_s22 + $0x28] sm:$0xff] %vm945_vm3, %v3255_v42  ;;  %v3024_v42 = vld [vmem:[%s5406_s20 + $0x48] sm:$0xff] }
 0x3f4   : > { %v2515_v27 = vpop.permute.xlu0 %2514  ;;  %v2702_v56 = vpop.permute.xlu2 %2701 }
 0x3f5   : > { %v2552_v40 = vpop.permute.xlu1 %2551  ;;  %v2817_v5 = vsel %vm978_vm5, %v2785_v53, %v2515_v27  ;;  %v3041_v53 = vld [vmem:[%s5406_s20 + $0xd0] sm:$0xff] }
 0x3f6   : > { %v2849_v34 = vsel %vm5732_vm2, %v2817_v5, %v2552_v40 }
 0x3f7   : > { %v2881_v47 = vsel %vm5724_vm1, %v2849_v34, %v2599_v49 }
 0x3fb   : > { %v3161_v26 = vpop.f32.mrf.mxu3 }
 0x3fc   : > { %v3162_v61 = vadd.f32 %v3161_v26, %v3037_v32  ;;  %v2634_v51 = vpop.permute.xlu0 %2633 }
 0x3fd   : > { %v2671_v43 = vpop.permute.xlu1 %2670  ;;  %v2913_v3 = vsel %vm5736_vm15, %v2881_v47, %v2634_v51 }
 0x3fe   : > { %vm3208_vm4 = vcmp.ge.f32.partialorder %v3162_v61, 0.0  ;;  %v3240_v30 = vmul.f32 0.01, %v3162_v61  ;;  %v2945_v45 = vsel %vm1110_vm8, %v2913_v3, %v2671_v43  ;;  %v3025_v43 = vld [vmem:[%s5406_s20 + $0x50] sm:$0xff] }
 0x3ff   : > { %v2977_v29 = vsel %vm1143_vm9, %v2945_v45, %v2718_v1 }
 0x400   : > { %v3272_v39 = vsel %vm3208_vm4, %v3162_v61, %v3240_v30  ;;  %v3042_v61 = vld [vmem:[%s5406_s20 + $0xd8] sm:$0xff] }
 0x401   : > { %3304 = vst.msk [vmem:[%s5421_s22 + $0xb0] sm:$0xff] %vm945_vm3, %v3272_v39 }
 0x403   : > { %v3163_v54 = vpop.f32.mrf.mxu3 }
 0x404   : > { %v3164_v14 = vadd.f32 %v3163_v54, %v3038_v57  ;;  %v2753_v12 = vpop.permute.xlu0 %2752  ;;  %v3026_v54 = vld [vmem:[%s5406_s20 + $0x58] sm:$0xff] }
 0x405   : > { %v2536_v19 = vpop.permute.xlu1 %2535  ;;  %v3121_v31 = vpop.f32.mrf.mxu1  ;;  %v3009_v9 = vsel %vm1176_vm10, %v2977_v29, %v2753_v12 }
 0x406   : > { %vm3209_vm5 = vcmp.ge.f32.partialorder %v3164_v14, 0.0  ;;  %v3241_v36 = vmul.f32 0.01, %v3164_v14  ;;  %v3122_v63 = vadd.f32 %v3121_v31, %v3021_v24  ;;  %3582 = vmatmul.msk.bf16.gmra.mxu3 %vm1229_vm11, %v3009_v9  ;;  %v2833_v7 = vsel %vm5737_vm14, %v5161_v48, %v2536_v19  ;;  %v3043_v19 = vld [vmem:[%s5406_s20 + $0xe0] sm:$0xff] }
 0x407   : > { %v2865_v38 = vsel %vm5738_vm6, %v2833_v7, %v2583_v17  ;;  %v3027_v17 = vld [vmem:[%s5406_s20 + $0x60] sm:$0xff] }
 0x408   : > { %v3273_v59 = vsel %vm3209_vm5, %v3164_v14, %v3241_v36  ;;  %vm3192_vm0 = vcmp.ge.f32.partialorder %v3122_v63, 0.0  ;;  %v3224_v58 = vmul.f32 0.01, %v3122_v63 }
 0x409   : > { %3305 = vst.msk [vmem:[%s5421_s22 + $0xb8] sm:$0xff] %vm945_vm3, %v3273_v59  ;;  %v3044_v59 = vld [vmem:[%s5406_s20 + $0xe8] sm:$0xff] }
 0x40a   : > { %v3256_v13 = vsel %vm3192_vm0, %v3122_v63, %v3224_v58 }
 0x40b   : > { %3288 = vst.msk [vmem:[%s5421_s22 + $0x30] sm:$0xff] %vm945_vm3, %v3256_v13 }
 0x40c   : > { %v2618_v22 = vpop.permute.xlu0 %2617 }
 0x40d   : > { %v3123_v62 = vpop.f32.mrf.mxu1  ;;  %v2655_v33 = vpop.permute.xlu1 %2654  ;;  %v2897_v23 = vsel %vm5739_vm12, %v2865_v38, %v2618_v22 }
 0x40e   : > { %v3124_v15 = vadd.f32 %v3123_v62, %v3022_v35  ;;  %v2929_v8 = vsel %vm1110_vm8, %v2897_v23, %v2655_v33  ;;  %v3028_v23 = vld [vmem:[%s5406_s20 + $0x68] sm:$0xff] }
 0x40f   : > { %v2961_v41 = vsel %vm1143_vm9, %v2929_v8, %v2702_v56  ;;  %v3045_v56 = vld [vmem:[%s5406_s20 + $0xf0] sm:$0xff] }
 0x410   : > { %vm3193_vm13 = vcmp.ge.f32.partialorder %v3124_v15, 0.0  ;;  %v3225_v46 = vmul.f32 0.01, %v3124_v15 }
 0x412   : > { %v3257_v48 = vsel %vm3193_vm13, %v3124_v15, %v3225_v46 }
 0x413   : > { %3289 = vst.msk [vmem:[%s5421_s22 + $0x38] sm:$0xff] %vm945_vm3, %v3257_v48 }
 0x414   : > { %v2737_v60 = vpop.permute.xlu0 %2736 }
 0x415   : > { %v2993_v28 = vsel %vm1176_vm10, %v2961_v41, %v2737_v60 }
 0x416   : > { %3574 = vmatmul.msk.bf16.gmra.mxu1 %vm1229_vm11, %v2993_v28 }
 0x421   : > { %v3166_v0 = vpop.f32.mrf.mxu3 }
 0x422   : > { %v3167_v18 = vadd.f32 %v3166_v0, %v3039_v37  ;;  %v3046_v0 = vld [vmem:[%s5406_s20 + $0xf8] sm:$0xff] }
 0x424   : > { %vm3210_vm7 = vcmp.ge.f32.partialorder %v3167_v18, 0.0  ;;  %v3242_v4 = vmul.f32 0.01, %v3167_v18 }
 0x426   : > { %v3274_v16 = vsel %vm3210_vm7, %v3167_v18, %v3242_v4  ;;  %v3029_v4 = vld [vmem:[%s5406_s20 + $0x70] sm:$0xff] }
 0x427   : > { %3306 = vst.msk [vmem:[%s5421_s22 + $0xc0] sm:$0xff] %vm945_vm3, %v3274_v16 }
 0x429   : > { %v3168_v55 = vpop.f32.mrf.mxu3 }
 0x42a   : > { %v3169_v6 = vadd.f32 %v3168_v55, %v3040_v21 }
 0x42b   : > { %v3126_v20 = vpop.f32.mrf.mxu1 }
 0x42c   : > { %vm3211_vm8 = vcmp.ge.f32.partialorder %v3169_v6, 0.0  ;;  %v3243_v10 = vmul.f32 0.01, %v3169_v6  ;;  %v3127_v44 = vadd.f32 %v3126_v20, %v3023_v50 }
 0x42e   : > { %v3275_v11 = vsel %vm3211_vm8, %v3169_v6, %v3243_v10  ;;  %vm3194_vm9 = vcmp.ge.f32.partialorder %v3127_v44, 0.0  ;;  %v3226_v25 = vmul.f32 0.01, %v3127_v44 }
 0x42f   : > { %3307 = vst.msk [vmem:[%s5421_s22 + $0xc8] sm:$0xff] %vm945_vm3, %v3275_v11 }
 0x430   : > { %v3258_v52 = vsel %vm3194_vm9, %v3127_v44, %v3226_v25  ;;  %v3030_v44 = vld [vmem:[%s5406_s20 + $0x78] sm:$0xff] }
 0x431   : > { %3290 = vst.msk [vmem:[%s5421_s22 + $0x40] sm:$0xff] %vm945_vm3, %v3258_v52 }
 0x433   : > { %v3128_v27 = vpop.f32.mrf.mxu1 }
 0x434   : > { %v3129_v49 = vadd.f32 %v3128_v27, %v3024_v42 }
 0x436   : > { %vm3195_vm10 = vcmp.ge.f32.partialorder %v3129_v49, 0.0  ;;  %v3227_v40 = vmul.f32 0.01, %v3129_v49 }
 0x438   : > { %v3259_v2 = vsel %vm3195_vm10, %v3129_v49, %v3227_v40 }
 0x439   : > { %3291 = vst.msk [vmem:[%s5421_s22 + $0x48] sm:$0xff] %vm945_vm3, %v3259_v2 }
 0x442   : > { %v3171_v5 = vpop.f32.mrf.mxu3 }
 0x443   : > { %v3172_v32 = vadd.f32 %v3171_v5, %v3041_v53 }
 0x445   : > { %vm3212_vm11 = vcmp.ge.f32.partialorder %v3172_v32, 0.0  ;;  %v3244_v34 = vmul.f32 0.01, %v3172_v32 }
 0x447   : > { %v3276_v26 = vsel %vm3212_vm11, %v3172_v32, %v3244_v34 }
 0x448   : > { %3308 = vst.msk [vmem:[%s5421_s22 + $0xd0] sm:$0xff] %vm945_vm3, %v3276_v26 }
 0x44a   : > { %v3173_v51 = vpop.f32.mrf.mxu3 }
 0x44b   : > { %v3174_v47 = vadd.f32 %v3173_v51, %v3042_v61 }
 0x44c   : > { %v3131_v30 = vpop.f32.mrf.mxu1 }
 0x44d   : > { %vm3213_vm2 = vcmp.ge.f32.partialorder %v3174_v47, 0.0  ;;  %v3245_v3 = vmul.f32 0.01, %v3174_v47  ;;  %v3132_v1 = vadd.f32 %v3131_v30, %v3025_v43 }
 0x44f   : > { %v3277_v39 = vsel %vm3213_vm2, %v3174_v47, %v3245_v3  ;;  %vm3196_vm1 = vcmp.ge.f32.partialorder %v3132_v1, 0.0  ;;  %v3228_v45 = vmul.f32 0.01, %v3132_v1 }
 0x450   : > { %3309 = vst.msk [vmem:[%s5421_s22 + $0xd8] sm:$0xff] %vm945_vm3, %v3277_v39 }
 0x451   : > { %v3260_v57 = vsel %vm3196_vm1, %v3132_v1, %v3228_v45 }
 0x452   : > { %3292 = vst.msk [vmem:[%s5421_s22 + $0x50] sm:$0xff] %vm945_vm3, %v3260_v57 }
 0x454   : > { %v3133_v24 = vpop.f32.mrf.mxu1 }
 0x455   : > { %v3134_v14 = vadd.f32 %v3133_v24, %v3026_v54 }
 0x457   : > { %vm3197_vm4 = vcmp.ge.f32.partialorder %v3134_v14, 0.0  ;;  %v3229_v12 = vmul.f32 0.01, %v3134_v14 }
 0x459   : > { %v3261_v29 = vsel %vm3197_vm4, %v3134_v14, %v3229_v12 }
 0x45a   : > { %3293 = vst.msk [vmem:[%s5421_s22 + $0x58] sm:$0xff] %vm945_vm3, %v3261_v29 }
 0x463   : > { %v3176_v31 = vpop.f32.mrf.mxu3 }
 0x464   : > { %v3177_v9 = vadd.f32 %v3176_v31, %v3043_v19 }
 0x466   : > { %vm3214_vm15 = vcmp.ge.f32.partialorder %v3177_v9, 0.0  ;;  %v3246_v36 = vmul.f32 0.01, %v3177_v9 }
 0x468   : > { %v3278_v63 = vsel %vm3214_vm15, %v3177_v9, %v3246_v36 }
 0x469   : > { %3310 = vst.msk [vmem:[%s5421_s22 + $0xe0] sm:$0xff] %vm945_vm3, %v3278_v63 }
 0x46b   : > { %v3178_v58 = vpop.f32.mrf.mxu3 }
 0x46c   : > { %v3179_v7 = vadd.f32 %v3178_v58, %v3044_v59 }
 0x46d   : > { %v3136_v13 = vpop.f32.mrf.mxu1 }
 0x46e   : > { %vm3215_vm5 = vcmp.ge.f32.partialorder %v3179_v7, 0.0  ;;  %v3247_v35 = vmul.f32 0.01, %v3179_v7  ;;  %v3137_v22 = vadd.f32 %v3136_v13, %v3027_v17 }
 0x470   : > { %v3279_v38 = vsel %vm3215_vm5, %v3179_v7, %v3247_v35  ;;  %vm3198_vm0 = vcmp.ge.f32.partialorder %v3137_v22, 0.0  ;;  %v3230_v62 = vmul.f32 0.01, %v3137_v22 }
 0x471   : > { %3311 = vst.msk [vmem:[%s5421_s22 + $0xe8] sm:$0xff] %vm945_vm3, %v3279_v38 }
 0x472   : > { %v3262_v33 = vsel %vm3198_vm0, %v3137_v22, %v3230_v62 }
 0x473   : > { %3294 = vst.msk [vmem:[%s5421_s22 + $0x60] sm:$0xff] %vm945_vm3, %v3262_v33 }
 0x475   : > { %v3138_v15 = vpop.f32.mrf.mxu1 }
 0x476   : > { %v3139_v46 = vadd.f32 %v3138_v15, %v3028_v23 }
 0x478   : > { %vm3199_vm14 = vcmp.ge.f32.partialorder %v3139_v46, 0.0  ;;  %v3231_v8 = vmul.f32 0.01, %v3139_v46 }
 0x47a   : > { %v3263_v48 = vsel %vm3199_vm14, %v3139_v46, %v3231_v8 }
 0x47b   : > { %3295 = vst.msk [vmem:[%s5421_s22 + $0x68] sm:$0xff] %vm945_vm3, %v3263_v48 }
 0x489   : > { %v3181_v60 = vpop.f32.mrf.mxu3 }
 0x48a   : > { %v3182_v41 = vadd.f32 %v3181_v60, %v3045_v56 }
 0x48c   : > { %vm3216_vm6 = vcmp.ge.f32.partialorder %v3182_v41, 0.0  ;;  %v3248_v28 = vmul.f32 0.01, %v3182_v41 }
 0x48e   : > { %v3280_v37 = vsel %vm3216_vm6, %v3182_v41, %v3248_v28 }
 0x48f   : > { %3312 = vst.msk [vmem:[%s5421_s22 + $0xf0] sm:$0xff] %vm945_vm3, %v3280_v37 }
 0x491   : > { %v3183_v18 = vpop.f32.mrf.mxu3 }
 0x492   : > { %v3184_v16 = vadd.f32 %v3183_v18, %v3046_v0 }
 0x493   : > { %v3141_v21 = vpop.f32.mrf.mxu1 }
 0x494   : > { %vm3217_vm12 = vcmp.ge.f32.partialorder %v3184_v16, 0.0  ;;  %v3249_v55 = vmul.f32 0.01, %v3184_v16  ;;  %v3142_v50 = vadd.f32 %v3141_v21, %v3029_v4 }
 0x496   : > { %v3281_v6 = vsel %vm3217_vm12, %v3184_v16, %v3249_v55  ;;  %vm3200_vm13 = vcmp.ge.f32.partialorder %v3142_v50, 0.0  ;;  %v3232_v20 = vmul.f32 0.01, %v3142_v50 }
 0x497   : > { %3313 = vst.msk [vmem:[%s5421_s22 + $0xf8] sm:$0xff] %vm945_vm3, %v3281_v6 }
 0x498   : > { %v3264_v10 = vsel %vm3200_vm13, %v3142_v50, %v3232_v20 }
 0x499   : > { %3296 = vst.msk [vmem:[%s5421_s22 + $0x70] sm:$0xff] %vm945_vm3, %v3264_v10 }
 0x49b   : > { %v3143_v11 = vpop.f32.mrf.mxu1 }
 0x49c   : > { %v3144_v25 = vadd.f32 %v3143_v11, %v3030_v44 }
 0x49e   : > { %vm3201_vm7 = vcmp.ge.f32.partialorder %v3144_v25, 0.0  ;;  %v3233_v52 = vmul.f32 0.01, %v3144_v25 }
 0x4a0   : > { %v3265_v42 = vsel %vm3201_vm7, %v3144_v25, %v3233_v52 }
 0x4a1   : > { %3297 = vst.msk [vmem:[%s5421_s22 + $0x78] sm:$0xff] %vm945_vm3, %v3265_v42 }
 0x4a2 PF: > { %s14_s15 = sadd.s32 1, %s3674_s15  }
 0x4a3   : > { %p11_p4 = scmp.ge.s32.totalorder %s14_s15, 4  }
 0x4a5   :  { %13 = sbr.rel (!%p11_p4) target bundleno = 1 (0x1), region = 71 }

</bundles_post_ra>
